<compile_context>
chip_gen: v6e
topology: v6e:2x2x1
jax: 0.10.0
libtpu: 0.0.40
codegen_flags: <defaults>
</compile_context>

<pallas_src>
import functools
import numpy as np

import jax
import jax.numpy as jnp
from jax import lax
from jax.experimental import pallas as pl
from jax.experimental.pallas import tpu as pltpu


_VMEM_LIMIT = 32 * 1024 * 1024   # explicit cap: safe on v5e/v6e/v7x
_BN_EPS = 1e-5


# ----------------------------------------------------------------------------
# Pallas kernels (fused)
# ----------------------------------------------------------------------------

def _bnrelu_mm_bnrelu_kernel(x_ref, s1_ref, b1_ref, w_ref, s2_ref, b2_ref, o_ref):
    # relu(bn2( relu(bn1(x)) @ W ))
    xa = jnp.maximum(x_ref[...] * s1_ref[...] + b1_ref[...], 0.0)
    y = jnp.dot(xa, w_ref[...], preferred_element_type=jnp.float32)
    o_ref[...] = jnp.maximum(y * s2_ref[...] + b2_ref[...], 0.0)


def _bnrelu_mm_kernel(x_ref, s_ref, b_ref, w_ref, o_ref):
    # relu(bn(x)) @ W         (used only for the conv4 shortcut, cin != cout)
    xa = jnp.maximum(x_ref[...] * s_ref[...] + b_ref[...], 0.0)
    o_ref[...] = jnp.dot(xa, w_ref[...], preferred_element_type=jnp.float32)


def _mm_add_kernel(x_ref, r_ref, w_ref, o_ref):
    # x @ W + residual        (conv3 1x1 with fused residual add)
    o_ref[...] = (jnp.dot(x_ref[...], w_ref[...],
                          preferred_element_type=jnp.float32) + r_ref[...])


def _conv3x3_bnrelu_kernel(xp_ref, wb_ref, s_ref, b_ref, o_ref):
    # xp_ref: (H+2, (W+2)*C) padded activated input for one batch element
    # wb_ref: (3, (W+2)*C, W*Cout) banded per-dy weights
    # out:    relu( conv3x3 * scale + bias )  laid out (H, W*Cout)
    H = o_ref.shape[0]
    acc = jnp.dot(xp_ref[0:H, :], wb_ref[0], preferred_element_type=jnp.float32)
    acc = acc + jnp.dot(xp_ref[1:H + 1, :], wb_ref[1],
                        preferred_element_type=jnp.float32)
    acc = acc + jnp.dot(xp_ref[2:H + 2, :], wb_ref[2],
                        preferred_element_type=jnp.float32)
    o_ref[...] = jnp.maximum(acc * s_ref[...] + b_ref[...], 0.0)


def _mask_gate_kernel(x_ref, t_ref, sa_ref, ba_ref, wa_ref,
                      sb_ref, bb_ref, wb_ref, o_ref):
    # residual6 head + soft-mask gate:
    #   m = (relu(bn_b( relu(bn_a(x)) @ Wa )) @ Wb);  out = (1+sigmoid(m))*trunk
    h = jnp.maximum(x_ref[...] * sa_ref[...] + ba_ref[...], 0.0)
    h = jnp.dot(h, wa_ref[...], preferred_element_type=jnp.float32)
    h = jnp.maximum(h * sb_ref[...] + bb_ref[...], 0.0)
    m = jnp.dot(h, wb_ref[...], preferred_element_type=jnp.float32)
    sig = pl.reciprocal(1.0 + jnp.exp(-m), approx=True)   # divide on the EUP
    o_ref[...] = (1.0 + sig) * t_ref[...]


def _upsample_add1_kernel(m_ref, x_ref, a_ref, o_ref):
    o_ref[...] = (jnp.dot(m_ref[...], x_ref[...],
                          preferred_element_type=jnp.float32) + a_ref[...])


def _upsample_add2_kernel(m_ref, x_ref, a_ref, b_ref, o_ref):
    o_ref[...] = (jnp.dot(m_ref[...], x_ref[...],
                          preferred_element_type=jnp.float32)
                  + a_ref[...] + b_ref[...])


# ----------------------------------------------------------------------------
# pallas_call wrappers
# ----------------------------------------------------------------------------

def _row_split(M):
    # Largest-block policy (tiny tensors => one block per call); 2-way split for
    # the largest M so both v7x TensorCores get work ("parallel" grid).
    if M >= 512 and M % 16 == 0:
        return M // 2
    return M


def _rows_call(kernel, row_ins, full_ins, out_cols):
    """Row-tiled fused matmul/elementwise call.
    row_ins: (M, k_i) arrays tiled along rows; full_ins: weights / scale / bias
    passed whole (constant index_map). Output: (M, out_cols) f32."""
    M = row_ins[0].shape[0]
    tm = _row_split(M)
    in_specs, ops = [], []
    for a in row_ins:
        a = a.astype(jnp.float32)
        in_specs.append(pl.BlockSpec((tm, a.shape[1]), lambda i: (i, 0)))
        ops.append(a)
    for a in full_ins:
        a = a.astype(jnp.float32)
        in_specs.append(pl.BlockSpec(a.shape, lambda i, nd=a.ndim: (0,) * nd))
        ops.append(a)
    return pl.pallas_call(
        kernel,
        out_shape=jax.ShapeDtypeStruct((M, out_cols), jnp.float32),
        grid_spec=pltpu.PrefetchScalarGridSpec(
            num_scalar_prefetch=0,
            grid=(M // tm,),
            in_specs=in_specs,
            out_specs=pl.BlockSpec((tm, out_cols), lambda i: (i, 0)),
        ),
        compiler_params=pltpu.CompilerParams(
            dimension_semantics=("parallel",),
            vmem_limit_bytes=_VMEM_LIMIT),
    )(*ops)


def _single_block_call(kernel, ins, out_rows, out_cols):
    ins = [a.astype(jnp.float32) for a in ins]
    in_specs = [pl.BlockSpec(a.shape, (lambda i, nd=a.ndim: (0,) * nd))
                for a in ins]
    return pl.pallas_call(
        kernel,
        out_shape=jax.ShapeDtypeStruct((out_rows, out_cols), jnp.float32),
        grid_spec=pltpu.PrefetchScalarGridSpec(
            num_scalar_prefetch=0,
            grid=(1,),
            in_specs=in_specs,
            out_specs=pl.BlockSpec((out_rows, out_cols), lambda i: (0, 0)),
        ),
        compiler_params=pltpu.CompilerParams(
            dimension_semantics=("arbitrary",),
            vmem_limit_bytes=_VMEM_LIMIT),
    )(*ins)


def _banded_conv_w(w2, W):
    """w2: (3,3,C,Co) -> banded per-dy weights (3, (W+2)*C, W*Co) such that
    out[h, w*Co+co] = sum_dy (xpad_flat[h+dy, :] @ B[dy])[w*Co+co]."""
    C, Co = w2.shape[2], w2.shape[3]
    eye = jnp.eye(W, dtype=w2.dtype)
    mats = []
    for dy in range(3):
        acc = jnp.zeros(((W + 2) * C, W * Co), w2.dtype)
        for dx in range(3):
            blk = jnp.kron(eye, w2[dy, dx])                     # (W*C, W*Co)
            acc = acc + jnp.pad(blk, ((dx * C, (2 - dx) * C), (0, 0)))
        mats.append(acc)
    return jnp.stack(mats, axis=0)


def conv3x3_bnrelu(a2_flat, w2, s3, b3):
    """a2_flat: (N, H, W*C) = relu(bn2(conv1 out)); returns
    relu(bn3(conv3x3(a2, stride 1, pad 1))) laid out (N, H, W*Cout)."""
    N, H, WC = a2_flat.shape
    C, Co = w2.shape[2], w2.shape[3]
    W = WC // C
    Hp, WpC, WCo = H + 2, (W + 2) * C, W * Co

    # zero-pad *after* activation (matches the reference ordering)
    xp = jnp.pad(a2_flat.astype(jnp.float32), ((0, 0), (1, 1), (C, C)))
    wb = _banded_conv_w(w2.astype(jnp.float32), W)              # (3, WpC, WCo)
    st = jnp.tile(s3.astype(jnp.float32), W).reshape(1, WCo)    # lane-dense
    bt = jnp.tile(b3.astype(jnp.float32), W).reshape(1, WCo)

    return pl.pallas_call(
        _conv3x3_bnrelu_kernel,
        out_shape=jax.ShapeDtypeStruct((N, H, WCo), jnp.float32),
        grid_spec=pltpu.PrefetchScalarGridSpec(
            num_scalar_prefetch=0,
            grid=(N,),
            in_specs=[
                pl.BlockSpec((None, Hp, WpC), lambda n: (n, 0, 0)),
                pl.BlockSpec((3, WpC, WCo), lambda n: (0, 0, 0)),
                pl.BlockSpec((1, WCo), lambda n: (0, 0)),
                pl.BlockSpec((1, WCo), lambda n: (0, 0)),
            ],
            out_specs=pl.BlockSpec((None, H, WCo), lambda n: (n, 0, 0)),
        ),
        compiler_params=pltpu.CompilerParams(
            dimension_semantics=("parallel",),
            vmem_limit_bytes=_VMEM_LIMIT),
    )(xp, wb, st, bt)


def maxpool3x3s2(x_nhwc):
    # MaxPool2d(kernel_size=3, stride=2, padding=1)
    # TODO(synk): tiny window reduction kept in plain JAX (lax.reduce_window).
    return lax.reduce_window(
        x_nhwc, -jnp.inf, lax.max,
        window_dimensions=(1, 3, 3, 1),
        window_strides=(1, 2, 2, 1),
        padding=((0, 0), (1, 1), (1, 1), (0, 0)))


def _interp_matrix_np(n_out, n_in):
    """Bilinear interpolation matrix, align_corners=True (UpsamplingBilinear2d)."""
    A = np.zeros((n_out, n_in), np.float32)
    if n_in == 1 or n_out == 1:
        A[:, 0] = 1.0
        return A
    for i in range(n_out):
        src = i * (n_in - 1) / (n_out - 1)
        i0 = min(int(np.floor(src)), n_in - 1)
        i1 = min(i0 + 1, n_in - 1)
        f = src - i0
        A[i, i0] += 1.0 - f
        A[i, i1] += f
    return A


def upsample_add(x_nhwc, out_hw, addends):
    """UpsamplingBilinear2d(size=out_hw, align_corners=True)(x) + sum(addends)
    as ONE Pallas matmul (kron(Ah, Aw)) with the adds fused in the epilogue."""
    N, H, W, C = x_nhwc.shape
    Ho, Wo = out_hw
    Mup = jnp.asarray(np.kron(_interp_matrix_np(Ho, H), _interp_matrix_np(Wo, W)))

    x_r = jnp.transpose(x_nhwc, (1, 2, 0, 3)).reshape(H * W, N * C)
    adds_r = [jnp.transpose(a, (1, 2, 0, 3)).reshape(Ho * Wo, N * C)
              for a in addends]
    kernel = _upsample_add1_kernel if len(addends) == 1 else _upsample_add2_kernel
    out = _single_block_call(kernel, [Mup, x_r] + adds_r, Ho * Wo, N * C)
    return jnp.transpose(out.reshape(Ho, Wo, N, C), (2, 0, 1, 3))


# ----------------------------------------------------------------------------
# Parameters (deterministic, synthetic)
# ----------------------------------------------------------------------------

def _make_bn(key, c):
    k1, k2, k3, k4 = jax.random.split(key, 4)
    return dict(
        gamma=1.0 + 0.1 * jax.random.normal(k1, (c,), jnp.float32),
        beta=0.1 * jax.random.normal(k2, (c,), jnp.float32),
        mean=0.1 * jax.random.normal(k3, (c,), jnp.float32),
        var=1.0 + 0.1 * jax.random.uniform(k4, (c,), jnp.float32),
    )


def _bn_fold(bn):
    scale = bn['gamma'] / jnp.sqrt(bn['var'] + _BN_EPS)
    bias = bn['beta'] - bn['mean'] * scale
    return scale, bias


def _make_resblock(key, cin, cout):
    mid = cout // 4
    ks = jax.random.split(key, 7)
    p = dict(
        bn1=_make_bn(ks[0], cin),
        w1=0.1 * jax.random.normal(ks[1], (cin, mid), jnp.float32),
        bn2=_make_bn(ks[2], mid),
        w2=0.1 * jax.random.normal(ks[3], (3, 3, mid, mid), jnp.float32),
        bn3=_make_bn(ks[4], mid),
        w3=0.1 * jax.random.normal(ks[5], (mid, cout), jnp.float32),
    )
    if cin != cout:
        p['w4'] = 0.1 * jax.random.normal(ks[6], (cin, cout), jnp.float32)
    return p


def make_params(key, in_channels, out_channels):
    names = ['first', 'trunk0', 'trunk1', 'res1', 'skip1', 'res2', 'skip2',
             'res3_0', 'res3_1', 'res4', 'res5', 'last']
    ks = jax.random.split(key, len(names) + 4)
    params = {n: _make_resblock(ks[i], in_channels, out_channels)
              for i, n in enumerate(names)}
    params['r6_bn_a'] = _make_bn(ks[-4], out_channels)
    params['r6_w_a'] = 0.1 * jax.random.normal(
        ks[-3], (out_channels, out_channels), jnp.float32)
    params['r6_bn_b'] = _make_bn(ks[-2], out_channels)
    params['r6_w_b'] = 0.1 * jax.random.normal(
        ks[-1], (out_channels, out_channels), jnp.float32)
    return params


# ----------------------------------------------------------------------------
# ResidualBlock (3 fused pallas_calls) + AttentionModule_stage1 forward
# ----------------------------------------------------------------------------

def residual_block(x_nhwc, p):
    N, H, W, Cin = x_nhwc.shape
    mid = p['w1'].shape[1]
    cout = p['w3'].shape[1]
    M = N * H * W
    x2 = x_nhwc.reshape(M, Cin)

    s1, b1 = _bn_fold(p['bn1'])
    s2, b2 = _bn_fold(p['bn2'])
    s3, b3 = _bn_fold(p['bn3'])
    s1r, b1r = s1.reshape(1, -1), b1.reshape(1, -1)
    s2r, b2r = s2.reshape(1, -1), b2.reshape(1, -1)

    # (1) a2 = relu(bn2( relu(bn1(x)) @ W1 ))
    a2 = _rows_call(_bnrelu_mm_bnrelu_kernel, [x2],
                    [s1r, b1r, p['w1'], s2r, b2r], mid)

    # (2) b3 = relu(bn3( conv3x3(pad(a2)) ))
    b3_flat = conv3x3_bnrelu(a2.reshape(N, H, W * mid), p['w2'], s3, b3)
    b3_2d = b3_flat.reshape(M, mid)

    # (3) out = b3 @ W3 + residual   (shortcut add fused into the matmul)
    if 'w4' in p:
        res = _rows_call(_bnrelu_mm_kernel, [x2], [s1r, b1r, p['w4']], cout)
    else:
        res = x2
    out = _rows_call(_mm_add_kernel, [b3_2d, res], [p['w3']], cout)
    return out.reshape(N, H, W, cout)


def attention_module_stage1(x_nchw, params, sizes):
    """sizes = (size1, size2, size3); input NCHW (PyTorch convention)."""
    x = jnp.transpose(x_nchw, (0, 2, 3, 1)).astype(jnp.float32)  # -> NHWC

    x = residual_block(x, params['first'])
    out_trunk = residual_block(
        residual_block(x, params['trunk0']), params['trunk1'])

    out_mpool1 = maxpool3x3s2(x)
    out_residual1 = residual_block(out_mpool1, params['res1'])
    out_skip1 = residual_block(out_residual1, params['skip1'])

    out_mpool2 = maxpool3x3s2(out_residual1)
    out_residual2 = residual_block(out_mpool2, params['res2'])
    out_skip2 = residual_block(out_residual2, params['skip2'])

    out_mpool3 = maxpool3x3s2(out_residual2)
    out_residual3 = residual_block(
        residual_block(out_mpool3, params['res3_0']), params['res3_1'])

    # interp3(res3) + res2 + skip2   (both adds fused into the upsample matmul)
    out = upsample_add(out_residual3, sizes[2], [out_residual2, out_skip2])
    out_residual4 = residual_block(out, params['res4'])

    # interp2(res4) + res1 + skip1
    out = upsample_add(out_residual4, sizes[1], [out_residual1, out_skip1])
    out_residual5 = residual_block(out, params['res5'])

    # interp1(res5) + trunk
    out_interp1 = upsample_add(out_residual5, sizes[0], [out_trunk])

    # residual6 head + (1 + sigmoid(mask)) * trunk gate, fully fused (1 call)
    N, H, W, C = out_interp1.shape
    sa, ba = _bn_fold(params['r6_bn_a'])
    sb, bb = _bn_fold(params['r6_bn_b'])
    gated = _rows_call(
        _mask_gate_kernel,
        [out_interp1.reshape(-1, C), out_trunk.reshape(-1, C)],
        [sa.reshape(1, -1), ba.reshape(1, -1), params['r6_w_a'],
         sb.reshape(1, -1), bb.reshape(1, -1), params['r6_w_b']],
        C).reshape(N, H, W, C)

    out_last = residual_block(gated, params['last'])
    return jnp.transpose(out_last, (0, 3, 1, 2))      # back to NCHW


# ----------------------------------------------------------------------------
# Main
# ----------------------------------------------------------------------------

if __name__ == "__main__":
    key = jax.random.PRNGKey(0)
    kx, kp = jax.random.split(key)

    # Small shapes consistent with the module (spatial must equal size1 and
    # halve at each maxpool): N=2, C=16, 16x16 -> sizes (16,16),(8,8),(4,4).
    N, C, H, W = 2, 16, 16, 16
    sizes = ((16, 16), (8, 8), (4, 4))

    x = jax.random.normal(kx, (N, C, H, W), jnp.float32)
    params = make_params(kp, C, C)

    fwd = jax.jit(functools.partial(attention_module_stage1, sizes=sizes))
    out = fwd(x, params)
    out = jax.block_until_ready(out)

    assert out.shape == (N, C, H, W), out.shape
    assert bool(jnp.all(jnp.isfinite(out)))
    print("KERNEL_OK")
</pallas_src>

<mosaic_0001>
module attributes {stable_mosaic.version = 11 : i64} {
  func.func @_bnrelu_mm_bnrelu_kernel(%arg0: i32, %arg1: memref<256x16xf32, #tpu.memory_space<vmem>>, %arg2: memref<1x16xf32, #tpu.memory_space<vmem>>, %arg3: memref<1x16xf32, #tpu.memory_space<vmem>>, %arg4: memref<16x4xf32, #tpu.memory_space<vmem>>, %arg5: memref<1x4xf32, #tpu.memory_space<vmem>>, %arg6: memref<1x4xf32, #tpu.memory_space<vmem>>, %arg7: memref<256x4xf32, #tpu.memory_space<vmem>>) attributes {dimension_semantics = [#tpu.dimension_semantics<parallel>], iteration_bounds = array<i64: 2>, scalar_prefetch = 0 : i64, scratch_operands = 0 : i64, tpu.core_type = #tpu.core_type<tc>, window_params = [{transform_indices = @transform_0, window_bounds = array<i64: 256, 16>}, {pipeline_mode = #tpu.pipeline_mode<synchronous>, transform_indices = @transform_1, window_bounds = array<i64: 1, 16>}, {pipeline_mode = #tpu.pipeline_mode<synchronous>, transform_indices = @transform_2, window_bounds = array<i64: 1, 16>}, {pipeline_mode = #tpu.pipeline_mode<synchronous>, transform_indices = @transform_3, window_bounds = array<i64: 16, 4>}, {pipeline_mode = #tpu.pipeline_mode<synchronous>, transform_indices = @transform_4, window_bounds = array<i64: 1, 4>}, {pipeline_mode = #tpu.pipeline_mode<synchronous>, transform_indices = @transform_5, window_bounds = array<i64: 1, 4>}, {transform_indices = @transform_6, window_bounds = array<i64: 256, 4>}]} {
    %c0 = arith.constant 0 : index
    %c0_0 = arith.constant 0 : index
    %0 = vector.load %arg1[%c0, %c0_0] : memref<256x16xf32, #tpu.memory_space<vmem>>, vector<256x16xf32>
    %c0_1 = arith.constant 0 : index
    %c0_2 = arith.constant 0 : index
    %1 = vector.load %arg2[%c0_1, %c0_2] : memref<1x16xf32, #tpu.memory_space<vmem>>, vector<1x16xf32>
    %2 = vector.broadcast %1 : vector<1x16xf32> to vector<256x16xf32>
    %3 = arith.mulf %0, %2 : vector<256x16xf32>
    %c0_3 = arith.constant 0 : index
    %c0_4 = arith.constant 0 : index
    %4 = vector.load %arg3[%c0_3, %c0_4] : memref<1x16xf32, #tpu.memory_space<vmem>>, vector<1x16xf32>
    %5 = vector.broadcast %4 : vector<1x16xf32> to vector<256x16xf32>
    %6 = arith.addf %3, %5 : vector<256x16xf32>
    %cst = arith.constant 0.000000e+00 : f32
    %7 = vector.broadcast %cst : f32 to vector<256x16xf32>
    %8 = arith.maximumf %6, %7 : vector<256x16xf32>
    %c0_5 = arith.constant 0 : index
    %c0_6 = arith.constant 0 : index
    %9 = vector.load %arg4[%c0_5, %c0_6] : memref<16x4xf32, #tpu.memory_space<vmem>>, vector<16x4xf32>
    %cst_7 = arith.constant dense<0.000000e+00> : vector<256x4xf32>
    %10 = tpu.matmul %8, %9, %cst_7 {dimension_numbers = #tpu.dot_dimension_numbers<[1], [0], [0], [1], [0, 0, 1, 1], [], []>} : vector<256x16xf32>, vector<16x4xf32>, vector<256x4xf32> -> vector<256x4xf32>
    %c0_8 = arith.constant 0 : index
    %c0_9 = arith.constant 0 : index
    %11 = vector.load %arg5[%c0_8, %c0_9] : memref<1x4xf32, #tpu.memory_space<vmem>>, vector<1x4xf32>
    %12 = vector.broadcast %11 : vector<1x4xf32> to vector<256x4xf32>
    %13 = arith.mulf %10, %12 : vector<256x4xf32>
    %c0_10 = arith.constant 0 : index
    %c0_11 = arith.constant 0 : index
    %14 = vector.load %arg6[%c0_10, %c0_11] : memref<1x4xf32, #tpu.memory_space<vmem>>, vector<1x4xf32>
    %15 = vector.broadcast %14 : vector<1x4xf32> to vector<256x4xf32>
    %16 = arith.addf %13, %15 : vector<256x4xf32>
    %cst_12 = arith.constant 0.000000e+00 : f32
    %17 = vector.broadcast %cst_12 : f32 to vector<256x4xf32>
    %18 = arith.maximumf %16, %17 : vector<256x4xf32>
    %c0_13 = arith.constant 0 : index
    %c0_14 = arith.constant 0 : index
    %19 = vector.load %arg7[%c0_13, %c0_14] : memref<256x4xf32, #tpu.memory_space<vmem>>, vector<256x4xf32>
    tpu.vector_store %arg7[%c0_13, %c0_14], %18 {strides = array<i32>} : memref<256x4xf32, #tpu.memory_space<vmem>>, vector<256x4xf32>,
    return
  }
  func.func @transform_0(%arg0: i32) -> (i32, i32) {
    %c0_i32 = arith.constant 0 : i32
    %c0_i32_0 = arith.constant 0 : i32
    return %arg0, %c0_i32 : i32, i32
  }
  func.func @transform_1(%arg0: i32) -> (i32, i32) {
    %c0_i32 = arith.constant 0 : i32
    %c0_i32_0 = arith.constant 0 : i32
    %c0_i32_1 = arith.constant 0 : i32
    return %c0_i32, %c0_i32_0 : i32, i32
  }
  func.func @transform_2(%arg0: i32) -> (i32, i32) {
    %c0_i32 = arith.constant 0 : i32
    %c0_i32_0 = arith.constant 0 : i32
    %c0_i32_1 = arith.constant 0 : i32
    return %c0_i32, %c0_i32_0 : i32, i32
  }
  func.func @transform_3(%arg0: i32) -> (i32, i32) {
    %c0_i32 = arith.constant 0 : i32
    %c0_i32_0 = arith.constant 0 : i32
    %c0_i32_1 = arith.constant 0 : i32
    return %c0_i32, %c0_i32_0 : i32, i32
  }
  func.func @transform_4(%arg0: i32) -> (i32, i32) {
    %c0_i32 = arith.constant 0 : i32
    %c0_i32_0 = arith.constant 0 : i32
    %c0_i32_1 = arith.constant 0 : i32
    return %c0_i32, %c0_i32_0 : i32, i32
  }
  func.func @transform_5(%arg0: i32) -> (i32, i32) {
    %c0_i32 = arith.constant 0 : i32
    %c0_i32_0 = arith.constant 0 : i32
    %c0_i32_1 = arith.constant 0 : i32
    return %c0_i32, %c0_i32_0 : i32, i32
  }
  func.func @transform_6(%arg0: i32) -> (i32, i32) {
    %c0_i32 = arith.constant 0 : i32
    %c0_i32_0 = arith.constant 0 : i32
    return %arg0, %c0_i32 : i32, i32
  }
}

module attributes {stable_mosaic.version = 11 : i64} {
  func.func @_conv3x3_bnrelu_kernel(%arg0: i32, %arg1: memref<1x18x72xf32, #tpu.memory_space<vmem>>, %arg2: memref<3x72x64xf32, #tpu.memory_space<vmem>>, %arg3: memref<1x64xf32, #tpu.memory_space<vmem>>, %arg4: memref<1x64xf32, #tpu.memory_space<vmem>>, %arg5: memref<1x16x64xf32, #tpu.memory_space<vmem>>) attributes {dimension_semantics = [#tpu.dimension_semantics<parallel>], iteration_bounds = array<i64: 2>, scalar_prefetch = 0 : i64, scratch_operands = 0 : i64, tpu.core_type = #tpu.core_type<tc>, window_params = [{transform_indices = @transform_0, window_bounds = array<i64: 1, 18, 72>}, {pipeline_mode = #tpu.pipeline_mode<synchronous>, transform_indices = @transform_1, window_bounds = array<i64: 3, 72, 64>}, {pipeline_mode = #tpu.pipeline_mode<synchronous>, transform_indices = @transform_2, window_bounds = array<i64: 1, 64>}, {pipeline_mode = #tpu.pipeline_mode<synchronous>, transform_indices = @transform_3, window_bounds = array<i64: 1, 64>}, {transform_indices = @transform_4, window_bounds = array<i64: 1, 16, 64>}]} {
    %c0 = arith.constant 0 : index
    %c0_0 = arith.constant 0 : index
    %c0_1 = arith.constant 0 : index
    %0 = vector.load %arg1[%c0, %c0_0, %c0_1] : memref<1x18x72xf32, #tpu.memory_space<vmem>>, vector<1x16x72xf32>
    %1 = vector.shape_cast %0 : vector<1x16x72xf32> to vector<16x72xf32>
    %c0_2 = arith.constant 0 : index
    %c0_3 = arith.constant 0 : index
    %c0_4 = arith.constant 0 : index
    %2 = vector.load %arg2[%c0_2, %c0_3, %c0_4] : memref<3x72x64xf32, #tpu.memory_space<vmem>>, vector<1x72x64xf32>
    %3 = vector.shape_cast %2 : vector<1x72x64xf32> to vector<72x64xf32>
    %cst = arith.constant dense<0.000000e+00> : vector<16x64xf32>
    %4 = tpu.matmul %1, %3, %cst {dimension_numbers = #tpu.dot_dimension_numbers<[1], [0], [0], [1], [0, 0, 1, 1], [], []>} : vector<16x72xf32>, vector<72x64xf32>, vector<16x64xf32> -> vector<16x64xf32>
    %c0_5 = arith.constant 0 : index
    %c1 = arith.constant 1 : index
    %c0_6 = arith.constant 0 : index
    %5 = vector.load %arg1[%c0_5, %c1, %c0_6] : memref<1x18x72xf32, #tpu.memory_space<vmem>>, vector<1x16x72xf32>
    %6 = vector.shape_cast %5 : vector<1x16x72xf32> to vector<16x72xf32>
    %c1_7 = arith.constant 1 : index
    %c0_8 = arith.constant 0 : index
    %c0_9 = arith.constant 0 : index
    %7 = vector.load %arg2[%c1_7, %c0_8, %c0_9] : memref<3x72x64xf32, #tpu.memory_space<vmem>>, vector<1x72x64xf32>
    %8 = vector.shape_cast %7 : vector<1x72x64xf32> to vector<72x64xf32>
    %cst_10 = arith.constant dense<0.000000e+00> : vector<16x64xf32>
    %9 = tpu.matmul %6, %8, %cst_10 {dimension_numbers = #tpu.dot_dimension_numbers<[1], [0], [0], [1], [0, 0, 1, 1], [], []>} : vector<16x72xf32>, vector<72x64xf32>, vector<16x64xf32> -> vector<16x64xf32>
    %10 = arith.addf %4, %9 : vector<16x64xf32>
    %c0_11 = arith.constant 0 : index
    %c2 = arith.constant 2 : index
    %c0_12 = arith.constant 0 : index
    %11 = vector.load %arg1[%c0_11, %c2, %c0_12] : memref<1x18x72xf32, #tpu.memory_space<vmem>>, vector<1x16x72xf32>
    %12 = vector.shape_cast %11 : vector<1x16x72xf32> to vector<16x72xf32>
    %c2_13 = arith.constant 2 : index
    %c0_14 = arith.constant 0 : index
    %c0_15 = arith.constant 0 : index
    %13 = vector.load %arg2[%c2_13, %c0_14, %c0_15] : memref<3x72x64xf32, #tpu.memory_space<vmem>>, vector<1x72x64xf32>
    %14 = vector.shape_cast %13 : vector<1x72x64xf32> to vector<72x64xf32>
    %cst_16 = arith.constant dense<0.000000e+00> : vector<16x64xf32>
    %15 = tpu.matmul %12, %14, %cst_16 {dimension_numbers = #tpu.dot_dimension_numbers<[1], [0], [0], [1], [0, 0, 1, 1], [], []>} : vector<16x72xf32>, vector<72x64xf32>, vector<16x64xf32> -> vector<16x64xf32>
    %16 = arith.addf %10, %15 : vector<16x64xf32>
    %c0_17 = arith.constant 0 : index
    %c0_18 = arith.constant 0 : index
    %17 = vector.load %arg3[%c0_17, %c0_18] : memref<1x64xf32, #tpu.memory_space<vmem>>, vector<1x64xf32>
    %18 = vector.broadcast %17 : vector<1x64xf32> to vector<16x64xf32>
    %19 = arith.mulf %16, %18 : vector<16x64xf32>
    %c0_19 = arith.constant 0 : index
    %c0_20 = arith.constant 0 : index
    %20 = vector.load %arg4[%c0_19, %c0_20] : memref<1x64xf32, #tpu.memory_space<vmem>>, vector<1x64xf32>
    %21 = vector.broadcast %20 : vector<1x64xf32> to vector<16x64xf32>
    %22 = arith.addf %19, %21 : vector<16x64xf32>
    %cst_21 = arith.constant 0.000000e+00 : f32
    %23 = vector.broadcast %cst_21 : f32 to vector<16x64xf32>
    %24 = arith.maximumf %22, %23 : vector<16x64xf32>
    %c0_22 = arith.constant 0 : index
    %c0_23 = arith.constant 0 : index
    %c0_24 = arith.constant 0 : index
    %25 = vector.load %arg5[%c0_22, %c0_23, %c0_24] : memref<1x16x64xf32, #tpu.memory_space<vmem>>, vector<1x16x64xf32>
    %26 = vector.shape_cast %25 : vector<1x16x64xf32> to vector<16x64xf32>
    %27 = vector.shape_cast %24 : vector<16x64xf32> to vector<1x16x64xf32>
    tpu.vector_store %arg5[%c0_22, %c0_23, %c0_24], %27 {strides = array<i32>} : memref<1x16x64xf32, #tpu.memory_space<vmem>>, vector<1x16x64xf32>,
    return
  }
  func.func @transform_0(%arg0: i32) -> (i32, i32, i32) {
    %c0_i32 = arith.constant 0 : i32
    %c0_i32_0 = arith.constant 0 : i32
    %c0_i32_1 = arith.constant 0 : i32
    return %arg0, %c0_i32, %c0_i32_0 : i32, i32, i32
  }
  func.func @transform_1(%arg0: i32) -> (i32, i32, i32) {
    %c0_i32 = arith.constant 0 : i32
    %c0_i32_0 = arith.constant 0 : i32
    %c0_i32_1 = arith.constant 0 : i32
    %c0_i32_2 = arith.constant 0 : i32
    return %c0_i32, %c0_i32_0, %c0_i32_1 : i32, i32, i32
  }
  func.func @transform_2(%arg0: i32) -> (i32, i32) {
    %c0_i32 = arith.constant 0 : i32
    %c0_i32_0 = arith.constant 0 : i32
    %c0_i32_1 = arith.constant 0 : i32
    return %c0_i32, %c0_i32_0 : i32, i32
  }
  func.func @transform_3(%arg0: i32) -> (i32, i32) {
    %c0_i32 = arith.constant 0 : i32
    %c0_i32_0 = arith.constant 0 : i32
    %c0_i32_1 = arith.constant 0 : i32
    return %c0_i32, %c0_i32_0 : i32, i32
  }
  func.func @transform_4(%arg0: i32) -> (i32, i32, i32) {
    %c0_i32 = arith.constant 0 : i32
    %c0_i32_0 = arith.constant 0 : i32
    %c0_i32_1 = arith.constant 0 : i32
    return %arg0, %c0_i32, %c0_i32_0 : i32, i32, i32
  }
}

module attributes {stable_mosaic.version = 11 : i64} {
  func.func @_mm_add_kernel(%arg0: i32, %arg1: memref<256x4xf32, #tpu.memory_space<vmem>>, %arg2: memref<256x16xf32, #tpu.memory_space<vmem>>, %arg3: memref<4x16xf32, #tpu.memory_space<vmem>>, %arg4: memref<256x16xf32, #tpu.memory_space<vmem>>) attributes {dimension_semantics = [#tpu.dimension_semantics<parallel>], iteration_bounds = array<i64: 2>, scalar_prefetch = 0 : i64, scratch_operands = 0 : i64, tpu.core_type = #tpu.core_type<tc>, window_params = [{transform_indices = @transform_0, window_bounds = array<i64: 256, 4>}, {transform_indices = @transform_1, window_bounds = array<i64: 256, 16>}, {pipeline_mode = #tpu.pipeline_mode<synchronous>, transform_indices = @transform_2, window_bounds = array<i64: 4, 16>}, {transform_indices = @transform_3, window_bounds = array<i64: 256, 16>}]} {
    %c0 = arith.constant 0 : index
    %c0_0 = arith.constant 0 : index
    %0 = vector.load %arg1[%c0, %c0_0] : memref<256x4xf32, #tpu.memory_space<vmem>>, vector<256x4xf32>
    %c0_1 = arith.constant 0 : index
    %c0_2 = arith.constant 0 : index
    %1 = vector.load %arg3[%c0_1, %c0_2] : memref<4x16xf32, #tpu.memory_space<vmem>>, vector<4x16xf32>
    %cst = arith.constant dense<0.000000e+00> : vector<256x16xf32>
    %2 = tpu.matmul %0, %1, %cst {dimension_numbers = #tpu.dot_dimension_numbers<[1], [0], [0], [1], [0, 0, 1, 1], [], []>} : vector<256x4xf32>, vector<4x16xf32>, vector<256x16xf32> -> vector<256x16xf32>
    %c0_3 = arith.constant 0 : index
    %c0_4 = arith.constant 0 : index
    %3 = vector.load %arg2[%c0_3, %c0_4] : memref<256x16xf32, #tpu.memory_space<vmem>>, vector<256x16xf32>
    %4 = arith.addf %2, %3 : vector<256x16xf32>
    %c0_5 = arith.constant 0 : index
    %c0_6 = arith.constant 0 : index
    %5 = vector.load %arg4[%c0_5, %c0_6] : memref<256x16xf32, #tpu.memory_space<vmem>>, vector<256x16xf32>
    tpu.vector_store %arg4[%c0_5, %c0_6], %4 {strides = array<i32>} : memref<256x16xf32, #tpu.memory_space<vmem>>, vector<256x16xf32>,
    return
  }
  func.func @transform_0(%arg0: i32) -> (i32, i32) {
    %c0_i32 = arith.constant 0 : i32
    %c0_i32_0 = arith.constant 0 : i32
    return %arg0, %c0_i32 : i32, i32
  }
  func.func @transform_1(%arg0: i32) -> (i32, i32) {
    %c0_i32 = arith.constant 0 : i32
    %c0_i32_0 = arith.constant 0 : i32
    return %arg0, %c0_i32 : i32, i32
  }
  func.func @transform_2(%arg0: i32) -> (i32, i32) {
    %c0_i32 = arith.constant 0 : i32
    %c0_i32_0 = arith.constant 0 : i32
    %c0_i32_1 = arith.constant 0 : i32
    return %c0_i32, %c0_i32_0 : i32, i32
  }
  func.func @transform_3(%arg0: i32) -> (i32, i32) {
    %c0_i32 = arith.constant 0 : i32
    %c0_i32_0 = arith.constant 0 : i32
    return %arg0, %c0_i32 : i32, i32
  }
}

module attributes {stable_mosaic.version = 11 : i64} {
  func.func @_bnrelu_mm_bnrelu_kernel(%arg0: i32, %arg1: memref<128x16xf32, #tpu.memory_space<vmem>>, %arg2: memref<1x16xf32, #tpu.memory_space<vmem>>, %arg3: memref<1x16xf32, #tpu.memory_space<vmem>>, %arg4: memref<16x4xf32, #tpu.memory_space<vmem>>, %arg5: memref<1x4xf32, #tpu.memory_space<vmem>>, %arg6: memref<1x4xf32, #tpu.memory_space<vmem>>, %arg7: memref<128x4xf32, #tpu.memory_space<vmem>>) attributes {dimension_semantics = [#tpu.dimension_semantics<parallel>], iteration_bounds = array<i64: 1>, scalar_prefetch = 0 : i64, scratch_operands = 0 : i64, tpu.core_type = #tpu.core_type<tc>, window_params = [{transform_indices = @transform_0, window_bounds = array<i64: 128, 16>}, {pipeline_mode = #tpu.pipeline_mode<synchronous>, transform_indices = @transform_1, window_bounds = array<i64: 1, 16>}, {pipeline_mode = #tpu.pipeline_mode<synchronous>, transform_indices = @transform_2, window_bounds = array<i64: 1, 16>}, {pipeline_mode = #tpu.pipeline_mode<synchronous>, transform_indices = @transform_3, window_bounds = array<i64: 16, 4>}, {pipeline_mode = #tpu.pipeline_mode<synchronous>, transform_indices = @transform_4, window_bounds = array<i64: 1, 4>}, {pipeline_mode = #tpu.pipeline_mode<synchronous>, transform_indices = @transform_5, window_bounds = array<i64: 1, 4>}, {transform_indices = @transform_6, window_bounds = array<i64: 128, 4>}]} {
    %c0 = arith.constant 0 : index
    %c0_0 = arith.constant 0 : index
    %0 = vector.load %arg1[%c0, %c0_0] : memref<128x16xf32, #tpu.memory_space<vmem>>, vector<128x16xf32>
    %c0_1 = arith.constant 0 : index
    %c0_2 = arith.constant 0 : index
    %1 = vector.load %arg2[%c0_1, %c0_2] : memref<1x16xf32, #tpu.memory_space<vmem>>, vector<1x16xf32>
    %2 = vector.broadcast %1 : vector<1x16xf32> to vector<128x16xf32>
    %3 = arith.mulf %0, %2 : vector<128x16xf32>
    %c0_3 = arith.constant 0 : index
    %c0_4 = arith.constant 0 : index
    %4 = vector.load %arg3[%c0_3, %c0_4] : memref<1x16xf32, #tpu.memory_space<vmem>>, vector<1x16xf32>
    %5 = vector.broadcast %4 : vector<1x16xf32> to vector<128x16xf32>
    %6 = arith.addf %3, %5 : vector<128x16xf32>
    %cst = arith.constant 0.000000e+00 : f32
    %7 = vector.broadcast %cst : f32 to vector<128x16xf32>
    %8 = arith.maximumf %6, %7 : vector<128x16xf32>
    %c0_5 = arith.constant 0 : index
    %c0_6 = arith.constant 0 : index
    %9 = vector.load %arg4[%c0_5, %c0_6] : memref<16x4xf32, #tpu.memory_space<vmem>>, vector<16x4xf32>
    %cst_7 = arith.constant dense<0.000000e+00> : vector<128x4xf32>
    %10 = tpu.matmul %8, %9, %cst_7 {dimension_numbers = #tpu.dot_dimension_numbers<[1], [0], [0], [1], [0, 0, 1, 1], [], []>} : vector<128x16xf32>, vector<16x4xf32>, vector<128x4xf32> -> vector<128x4xf32>
    %c0_8 = arith.constant 0 : index
    %c0_9 = arith.constant 0 : index
    %11 = vector.load %arg5[%c0_8, %c0_9] : memref<1x4xf32, #tpu.memory_space<vmem>>, vector<1x4xf32>
    %12 = vector.broadcast %11 : vector<1x4xf32> to vector<128x4xf32>
    %13 = arith.mulf %10, %12 : vector<128x4xf32>
    %c0_10 = arith.constant 0 : index
    %c0_11 = arith.constant 0 : index
    %14 = vector.load %arg6[%c0_10, %c0_11] : memref<1x4xf32, #tpu.memory_space<vmem>>, vector<1x4xf32>
    %15 = vector.broadcast %14 : vector<1x4xf32> to vector<128x4xf32>
    %16 = arith.addf %13, %15 : vector<128x4xf32>
    %cst_12 = arith.constant 0.000000e+00 : f32
    %17 = vector.broadcast %cst_12 : f32 to vector<128x4xf32>
    %18 = arith.maximumf %16, %17 : vector<128x4xf32>
    %c0_13 = arith.constant 0 : index
    %c0_14 = arith.constant 0 : index
    %19 = vector.load %arg7[%c0_13, %c0_14] : memref<128x4xf32, #tpu.memory_space<vmem>>, vector<128x4xf32>
    tpu.vector_store %arg7[%c0_13, %c0_14], %18 {strides = array<i32>} : memref<128x4xf32, #tpu.memory_space<vmem>>, vector<128x4xf32>,
    return
  }
  func.func @transform_0(%arg0: i32) -> (i32, i32) {
    %c0_i32 = arith.constant 0 : i32
    %c0_i32_0 = arith.constant 0 : i32
    return %arg0, %c0_i32 : i32, i32
  }
  func.func @transform_1(%arg0: i32) -> (i32, i32) {
    %c0_i32 = arith.constant 0 : i32
    %c0_i32_0 = arith.constant 0 : i32
    %c0_i32_1 = arith.constant 0 : i32
    return %c0_i32, %c0_i32_0 : i32, i32
  }
  func.func @transform_2(%arg0: i32) -> (i32, i32) {
    %c0_i32 = arith.constant 0 : i32
    %c0_i32_0 = arith.constant 0 : i32
    %c0_i32_1 = arith.constant 0 : i32
    return %c0_i32, %c0_i32_0 : i32, i32
  }
  func.func @transform_3(%arg0: i32) -> (i32, i32) {
    %c0_i32 = arith.constant 0 : i32
    %c0_i32_0 = arith.constant 0 : i32
    %c0_i32_1 = arith.constant 0 : i32
    return %c0_i32, %c0_i32_0 : i32, i32
  }
  func.func @transform_4(%arg0: i32) -> (i32, i32) {
    %c0_i32 = arith.constant 0 : i32
    %c0_i32_0 = arith.constant 0 : i32
    %c0_i32_1 = arith.constant 0 : i32
    return %c0_i32, %c0_i32_0 : i32, i32
  }
  func.func @transform_5(%arg0: i32) -> (i32, i32) {
    %c0_i32 = arith.constant 0 : i32
    %c0_i32_0 = arith.constant 0 : i32
    %c0_i32_1 = arith.constant 0 : i32
    return %c0_i32, %c0_i32_0 : i32, i32
  }
  func.func @transform_6(%arg0: i32) -> (i32, i32) {
    %c0_i32 = arith.constant 0 : i32
    %c0_i32_0 = arith.constant 0 : i32
    return %arg0, %c0_i32 : i32, i32
  }
}

module attributes {stable_mosaic.version = 11 : i64} {
  func.func @_conv3x3_bnrelu_kernel(%arg0: i32, %arg1: memref<1x10x40xf32, #tpu.memory_space<vmem>>, %arg2: memref<3x40x32xf32, #tpu.memory_space<vmem>>, %arg3: memref<1x32xf32, #tpu.memory_space<vmem>>, %arg4: memref<1x32xf32, #tpu.memory_space<vmem>>, %arg5: memref<1x8x32xf32, #tpu.memory_space<vmem>>) attributes {dimension_semantics = [#tpu.dimension_semantics<parallel>], iteration_bounds = array<i64: 2>, scalar_prefetch = 0 : i64, scratch_operands = 0 : i64, tpu.core_type = #tpu.core_type<tc>, window_params = [{transform_indices = @transform_0, window_bounds = array<i64: 1, 10, 40>}, {pipeline_mode = #tpu.pipeline_mode<synchronous>, transform_indices = @transform_1, window_bounds = array<i64: 3, 40, 32>}, {pipeline_mode = #tpu.pipeline_mode<synchronous>, transform_indices = @transform_2, window_bounds = array<i64: 1, 32>}, {pipeline_mode = #tpu.pipeline_mode<synchronous>, transform_indices = @transform_3, window_bounds = array<i64: 1, 32>}, {transform_indices = @transform_4, window_bounds = array<i64: 1, 8, 32>}]} {
    %c0 = arith.constant 0 : index
    %c0_0 = arith.constant 0 : index
    %c0_1 = arith.constant 0 : index
    %0 = vector.load %arg1[%c0, %c0_0, %c0_1] : memref<1x10x40xf32, #tpu.memory_space<vmem>>, vector<1x8x40xf32>
    %1 = vector.shape_cast %0 : vector<1x8x40xf32> to vector<8x40xf32>
    %c0_2 = arith.constant 0 : index
    %c0_3 = arith.constant 0 : index
    %c0_4 = arith.constant 0 : index
    %2 = vector.load %arg2[%c0_2, %c0_3, %c0_4] : memref<3x40x32xf32, #tpu.memory_space<vmem>>, vector<1x40x32xf32>
    %3 = vector.shape_cast %2 : vector<1x40x32xf32> to vector<40x32xf32>
    %cst = arith.constant dense<0.000000e+00> : vector<8x32xf32>
    %4 = tpu.matmul %1, %3, %cst {dimension_numbers = #tpu.dot_dimension_numbers<[1], [0], [0], [1], [0, 0, 1, 1], [], []>} : vector<8x40xf32>, vector<40x32xf32>, vector<8x32xf32> -> vector<8x32xf32>
    %c0_5 = arith.constant 0 : index
    %c1 = arith.constant 1 : index
    %c0_6 = arith.constant 0 : index
    %5 = vector.load %arg1[%c0_5, %c1, %c0_6] : memref<1x10x40xf32, #tpu.memory_space<vmem>>, vector<1x8x40xf32>
    %6 = vector.shape_cast %5 : vector<1x8x40xf32> to vector<8x40xf32>
    %c1_7 = arith.constant 1 : index
    %c0_8 = arith.constant 0 : index
    %c0_9 = arith.constant 0 : index
    %7 = vector.load %arg2[%c1_7, %c0_8, %c0_9] : memref<3x40x32xf32, #tpu.memory_space<vmem>>, vector<1x40x32xf32>
    %8 = vector.shape_cast %7 : vector<1x40x32xf32> to vector<40x32xf32>
    %cst_10 = arith.constant dense<0.000000e+00> : vector<8x32xf32>
    %9 = tpu.matmul %6, %8, %cst_10 {dimension_numbers = #tpu.dot_dimension_numbers<[1], [0], [0], [1], [0, 0, 1, 1], [], []>} : vector<8x40xf32>, vector<40x32xf32>, vector<8x32xf32> -> vector<8x32xf32>
    %10 = arith.addf %4, %9 : vector<8x32xf32>
    %c0_11 = arith.constant 0 : index
    %c2 = arith.constant 2 : index
    %c0_12 = arith.constant 0 : index
    %11 = vector.load %arg1[%c0_11, %c2, %c0_12] : memref<1x10x40xf32, #tpu.memory_space<vmem>>, vector<1x8x40xf32>
    %12 = vector.shape_cast %11 : vector<1x8x40xf32> to vector<8x40xf32>
    %c2_13 = arith.constant 2 : index
    %c0_14 = arith.constant 0 : index
    %c0_15 = arith.constant 0 : index
    %13 = vector.load %arg2[%c2_13, %c0_14, %c0_15] : memref<3x40x32xf32, #tpu.memory_space<vmem>>, vector<1x40x32xf32>
    %14 = vector.shape_cast %13 : vector<1x40x32xf32> to vector<40x32xf32>
    %cst_16 = arith.constant dense<0.000000e+00> : vector<8x32xf32>
    %15 = tpu.matmul %12, %14, %cst_16 {dimension_numbers = #tpu.dot_dimension_numbers<[1], [0], [0], [1], [0, 0, 1, 1], [], []>} : vector<8x40xf32>, vector<40x32xf32>, vector<8x32xf32> -> vector<8x32xf32>
    %16 = arith.addf %10, %15 : vector<8x32xf32>
    %c0_17 = arith.constant 0 : index
    %c0_18 = arith.constant 0 : index
    %17 = vector.load %arg3[%c0_17, %c0_18] : memref<1x32xf32, #tpu.memory_space<vmem>>, vector<1x32xf32>
    %18 = vector.broadcast %17 : vector<1x32xf32> to vector<8x32xf32>
    %19 = arith.mulf %16, %18 : vector<8x32xf32>
    %c0_19 = arith.constant 0 : index
    %c0_20 = arith.constant 0 : index
    %20 = vector.load %arg4[%c0_19, %c0_20] : memref<1x32xf32, #tpu.memory_space<vmem>>, vector<1x32xf32>
    %21 = vector.broadcast %20 : vector<1x32xf32> to vector<8x32xf32>
    %22 = arith.addf %19, %21 : vector<8x32xf32>
    %cst_21 = arith.constant 0.000000e+00 : f32
    %23 = vector.broadcast %cst_21 : f32 to vector<8x32xf32>
    %24 = arith.maximumf %22, %23 : vector<8x32xf32>
    %c0_22 = arith.constant 0 : index
    %c0_23 = arith.constant 0 : index
    %c0_24 = arith.constant 0 : index
    %25 = vector.load %arg5[%c0_22, %c0_23, %c0_24] : memref<1x8x32xf32, #tpu.memory_space<vmem>>, vector<1x8x32xf32>
    %26 = vector.shape_cast %25 : vector<1x8x32xf32> to vector<8x32xf32>
    %27 = vector.shape_cast %24 : vector<8x32xf32> to vector<1x8x32xf32>
    tpu.vector_store %arg5[%c0_22, %c0_23, %c0_24], %27 {strides = array<i32>} : memref<1x8x32xf32, #tpu.memory_space<vmem>>, vector<1x8x32xf32>,
    return
  }
  func.func @transform_0(%arg0: i32) -> (i32, i32, i32) {
    %c0_i32 = arith.constant 0 : i32
    %c0_i32_0 = arith.constant 0 : i32
    %c0_i32_1 = arith.constant 0 : i32
    return %arg0, %c0_i32, %c0_i32_0 : i32, i32, i32
  }
  func.func @transform_1(%arg0: i32) -> (i32, i32, i32) {
    %c0_i32 = arith.constant 0 : i32
    %c0_i32_0 = arith.constant 0 : i32
    %c0_i32_1 = arith.constant 0 : i32
    %c0_i32_2 = arith.constant 0 : i32
    return %c0_i32, %c0_i32_0, %c0_i32_1 : i32, i32, i32
  }
  func.func @transform_2(%arg0: i32) -> (i32, i32) {
    %c0_i32 = arith.constant 0 : i32
    %c0_i32_0 = arith.constant 0 : i32
    %c0_i32_1 = arith.constant 0 : i32
    return %c0_i32, %c0_i32_0 : i32, i32
  }
  func.func @transform_3(%arg0: i32) -> (i32, i32) {
    %c0_i32 = arith.constant 0 : i32
    %c0_i32_0 = arith.constant 0 : i32
    %c0_i32_1 = arith.constant 0 : i32
    return %c0_i32, %c0_i32_0 : i32, i32
  }
  func.func @transform_4(%arg0: i32) -> (i32, i32, i32) {
    %c0_i32 = arith.constant 0 : i32
    %c0_i32_0 = arith.constant 0 : i32
    %c0_i32_1 = arith.constant 0 : i32
    return %arg0, %c0_i32, %c0_i32_0 : i32, i32, i32
  }
}

module attributes {stable_mosaic.version = 11 : i64} {
  func.func @_mm_add_kernel(%arg0: i32, %arg1: memref<128x4xf32, #tpu.memory_space<vmem>>, %arg2: memref<128x16xf32, #tpu.memory_space<vmem>>, %arg3: memref<4x16xf32, #tpu.memory_space<vmem>>, %arg4: memref<128x16xf32, #tpu.memory_space<vmem>>) attributes {dimension_semantics = [#tpu.dimension_semantics<parallel>], iteration_bounds = array<i64: 1>, scalar_prefetch = 0 : i64, scratch_operands = 0 : i64, tpu.core_type = #tpu.core_type<tc>, window_params = [{transform_indices = @transform_0, window_bounds = array<i64: 128, 4>}, {transform_indices = @transform_1, window_bounds = array<i64: 128, 16>}, {pipeline_mode = #tpu.pipeline_mode<synchronous>, transform_indices = @transform_2, window_bounds = array<i64: 4, 16>}, {transform_indices = @transform_3, window_bounds = array<i64: 128, 16>}]} {
    %c0 = arith.constant 0 : index
    %c0_0 = arith.constant 0 : index
    %0 = vector.load %arg1[%c0, %c0_0] : memref<128x4xf32, #tpu.memory_space<vmem>>, vector<128x4xf32>
    %c0_1 = arith.constant 0 : index
    %c0_2 = arith.constant 0 : index
    %1 = vector.load %arg3[%c0_1, %c0_2] : memref<4x16xf32, #tpu.memory_space<vmem>>, vector<4x16xf32>
    %cst = arith.constant dense<0.000000e+00> : vector<128x16xf32>
    %2 = tpu.matmul %0, %1, %cst {dimension_numbers = #tpu.dot_dimension_numbers<[1], [0], [0], [1], [0, 0, 1, 1], [], []>} : vector<128x4xf32>, vector<4x16xf32>, vector<128x16xf32> -> vector<128x16xf32>
    %c0_3 = arith.constant 0 : index
    %c0_4 = arith.constant 0 : index
    %3 = vector.load %arg2[%c0_3, %c0_4] : memref<128x16xf32, #tpu.memory_space<vmem>>, vector<128x16xf32>
    %4 = arith.addf %2, %3 : vector<128x16xf32>
    %c0_5 = arith.constant 0 : index
    %c0_6 = arith.constant 0 : index
    %5 = vector.load %arg4[%c0_5, %c0_6] : memref<128x16xf32, #tpu.memory_space<vmem>>, vector<128x16xf32>
    tpu.vector_store %arg4[%c0_5, %c0_6], %4 {strides = array<i32>} : memref<128x16xf32, #tpu.memory_space<vmem>>, vector<128x16xf32>,
    return
  }
  func.func @transform_0(%arg0: i32) -> (i32, i32) {
    %c0_i32 = arith.constant 0 : i32
    %c0_i32_0 = arith.constant 0 : i32
    return %arg0, %c0_i32 : i32, i32
  }
  func.func @transform_1(%arg0: i32) -> (i32, i32) {
    %c0_i32 = arith.constant 0 : i32
    %c0_i32_0 = arith.constant 0 : i32
    return %arg0, %c0_i32 : i32, i32
  }
  func.func @transform_2(%arg0: i32) -> (i32, i32) {
    %c0_i32 = arith.constant 0 : i32
    %c0_i32_0 = arith.constant 0 : i32
    %c0_i32_1 = arith.constant 0 : i32
    return %c0_i32, %c0_i32_0 : i32, i32
  }
  func.func @transform_3(%arg0: i32) -> (i32, i32) {
    %c0_i32 = arith.constant 0 : i32
    %c0_i32_0 = arith.constant 0 : i32
    return %arg0, %c0_i32 : i32, i32
  }
}

module attributes {stable_mosaic.version = 11 : i64} {
  func.func @_bnrelu_mm_bnrelu_kernel(%arg0: i32, %arg1: memref<32x16xf32, #tpu.memory_space<vmem>>, %arg2: memref<1x16xf32, #tpu.memory_space<vmem>>, %arg3: memref<1x16xf32, #tpu.memory_space<vmem>>, %arg4: memref<16x4xf32, #tpu.memory_space<vmem>>, %arg5: memref<1x4xf32, #tpu.memory_space<vmem>>, %arg6: memref<1x4xf32, #tpu.memory_space<vmem>>, %arg7: memref<32x4xf32, #tpu.memory_space<vmem>>) attributes {dimension_semantics = [#tpu.dimension_semantics<parallel>], iteration_bounds = array<i64: 1>, scalar_prefetch = 0 : i64, scratch_operands = 0 : i64, tpu.core_type = #tpu.core_type<tc>, window_params = [{transform_indices = @transform_0, window_bounds = array<i64: 32, 16>}, {pipeline_mode = #tpu.pipeline_mode<synchronous>, transform_indices = @transform_1, window_bounds = array<i64: 1, 16>}, {pipeline_mode = #tpu.pipeline_mode<synchronous>, transform_indices = @transform_2, window_bounds = array<i64: 1, 16>}, {pipeline_mode = #tpu.pipeline_mode<synchronous>, transform_indices = @transform_3, window_bounds = array<i64: 16, 4>}, {pipeline_mode = #tpu.pipeline_mode<synchronous>, transform_indices = @transform_4, window_bounds = array<i64: 1, 4>}, {pipeline_mode = #tpu.pipeline_mode<synchronous>, transform_indices = @transform_5, window_bounds = array<i64: 1, 4>}, {transform_indices = @transform_6, window_bounds = array<i64: 32, 4>}]} {
    %c0 = arith.constant 0 : index
    %c0_0 = arith.constant 0 : index
    %0 = vector.load %arg1[%c0, %c0_0] : memref<32x16xf32, #tpu.memory_space<vmem>>, vector<32x16xf32>
    %c0_1 = arith.constant 0 : index
    %c0_2 = arith.constant 0 : index
    %1 = vector.load %arg2[%c0_1, %c0_2] : memref<1x16xf32, #tpu.memory_space<vmem>>, vector<1x16xf32>
    %2 = vector.broadcast %1 : vector<1x16xf32> to vector<32x16xf32>
    %3 = arith.mulf %0, %2 : vector<32x16xf32>
    %c0_3 = arith.constant 0 : index
    %c0_4 = arith.constant 0 : index
    %4 = vector.load %arg3[%c0_3, %c0_4] : memref<1x16xf32, #tpu.memory_space<vmem>>, vector<1x16xf32>
    %5 = vector.broadcast %4 : vector<1x16xf32> to vector<32x16xf32>
    %6 = arith.addf %3, %5 : vector<32x16xf32>
    %cst = arith.constant 0.000000e+00 : f32
    %7 = vector.broadcast %cst : f32 to vector<32x16xf32>
    %8 = arith.maximumf %6, %7 : vector<32x16xf32>
    %c0_5 = arith.constant 0 : index
    %c0_6 = arith.constant 0 : index
    %9 = vector.load %arg4[%c0_5, %c0_6] : memref<16x4xf32, #tpu.memory_space<vmem>>, vector<16x4xf32>
    %cst_7 = arith.constant dense<0.000000e+00> : vector<32x4xf32>
    %10 = tpu.matmul %8, %9, %cst_7 {dimension_numbers = #tpu.dot_dimension_numbers<[1], [0], [0], [1], [0, 0, 1, 1], [], []>} : vector<32x16xf32>, vector<16x4xf32>, vector<32x4xf32> -> vector<32x4xf32>
    %c0_8 = arith.constant 0 : index
    %c0_9 = arith.constant 0 : index
    %11 = vector.load %arg5[%c0_8, %c0_9] : memref<1x4xf32, #tpu.memory_space<vmem>>, vector<1x4xf32>
    %12 = vector.broadcast %11 : vector<1x4xf32> to vector<32x4xf32>
    %13 = arith.mulf %10, %12 : vector<32x4xf32>
    %c0_10 = arith.constant 0 : index
    %c0_11 = arith.constant 0 : index
    %14 = vector.load %arg6[%c0_10, %c0_11] : memref<1x4xf32, #tpu.memory_space<vmem>>, vector<1x4xf32>
    %15 = vector.broadcast %14 : vector<1x4xf32> to vector<32x4xf32>
    %16 = arith.addf %13, %15 : vector<32x4xf32>
    %cst_12 = arith.constant 0.000000e+00 : f32
    %17 = vector.broadcast %cst_12 : f32 to vector<32x4xf32>
    %18 = arith.maximumf %16, %17 : vector<32x4xf32>
    %c0_13 = arith.constant 0 : index
    %c0_14 = arith.constant 0 : index
    %19 = vector.load %arg7[%c0_13, %c0_14] : memref<32x4xf32, #tpu.memory_space<vmem>>, vector<32x4xf32>
    tpu.vector_store %arg7[%c0_13, %c0_14], %18 {strides = array<i32>} : memref<32x4xf32, #tpu.memory_space<vmem>>, vector<32x4xf32>,
    return
  }
  func.func @transform_0(%arg0: i32) -> (i32, i32) {
    %c0_i32 = arith.constant 0 : i32
    %c0_i32_0 = arith.constant 0 : i32
    return %arg0, %c0_i32 : i32, i32
  }
  func.func @transform_1(%arg0: i32) -> (i32, i32) {
    %c0_i32 = arith.constant 0 : i32
    %c0_i32_0 = arith.constant 0 : i32
    %c0_i32_1 = arith.constant 0 : i32
    return %c0_i32, %c0_i32_0 : i32, i32
  }
  func.func @transform_2(%arg0: i32) -> (i32, i32) {
    %c0_i32 = arith.constant 0 : i32
    %c0_i32_0 = arith.constant 0 : i32
    %c0_i32_1 = arith.constant 0 : i32
    return %c0_i32, %c0_i32_0 : i32, i32
  }
  func.func @transform_3(%arg0: i32) -> (i32, i32) {
    %c0_i32 = arith.constant 0 : i32
    %c0_i32_0 = arith.constant 0 : i32
    %c0_i32_1 = arith.constant 0 : i32
    return %c0_i32, %c0_i32_0 : i32, i32
  }
  func.func @transform_4(%arg0: i32) -> (i32, i32) {
    %c0_i32 = arith.constant 0 : i32
    %c0_i32_0 = arith.constant 0 : i32
    %c0_i32_1 = arith.constant 0 : i32
    return %c0_i32, %c0_i32_0 : i32, i32
  }
  func.func @transform_5(%arg0: i32) -> (i32, i32) {
    %c0_i32 = arith.constant 0 : i32
    %c0_i32_0 = arith.constant 0 : i32
    %c0_i32_1 = arith.constant 0 : i32
    return %c0_i32, %c0_i32_0 : i32, i32
  }
  func.func @transform_6(%arg0: i32) -> (i32, i32) {
    %c0_i32 = arith.constant 0 : i32
    %c0_i32_0 = arith.constant 0 : i32
    return %arg0, %c0_i32 : i32, i32
  }
}

module attributes {stable_mosaic.version = 11 : i64} {
  func.func @_conv3x3_bnrelu_kernel(%arg0: i32, %arg1: memref<1x6x24xf32, #tpu.memory_space<vmem>>, %arg2: memref<3x24x16xf32, #tpu.memory_space<vmem>>, %arg3: memref<1x16xf32, #tpu.memory_space<vmem>>, %arg4: memref<1x16xf32, #tpu.memory_space<vmem>>, %arg5: memref<1x4x16xf32, #tpu.memory_space<vmem>>) attributes {dimension_semantics = [#tpu.dimension_semantics<parallel>], iteration_bounds = array<i64: 2>, scalar_prefetch = 0 : i64, scratch_operands = 0 : i64, tpu.core_type = #tpu.core_type<tc>, window_params = [{transform_indices = @transform_0, window_bounds = array<i64: 1, 6, 24>}, {pipeline_mode = #tpu.pipeline_mode<synchronous>, transform_indices = @transform_1, window_bounds = array<i64: 3, 24, 16>}, {pipeline_mode = #tpu.pipeline_mode<synchronous>, transform_indices = @transform_2, window_bounds = array<i64: 1, 16>}, {pipeline_mode = #tpu.pipeline_mode<synchronous>, transform_indices = @transform_3, window_bounds = array<i64: 1, 16>}, {transform_indices = @transform_4, window_bounds = array<i64: 1, 4, 16>}]} {
    %c0 = arith.constant 0 : index
    %c0_0 = arith.constant 0 : index
    %c0_1 = arith.constant 0 : index
    %0 = vector.load %arg1[%c0, %c0_0, %c0_1] : memref<1x6x24xf32, #tpu.memory_space<vmem>>, vector<1x4x24xf32>
    %1 = vector.shape_cast %0 : vector<1x4x24xf32> to vector<4x24xf32>
    %c0_2 = arith.constant 0 : index
    %c0_3 = arith.constant 0 : index
    %c0_4 = arith.constant 0 : index
    %2 = vector.load %arg2[%c0_2, %c0_3, %c0_4] : memref<3x24x16xf32, #tpu.memory_space<vmem>>, vector<1x24x16xf32>
    %3 = vector.shape_cast %2 : vector<1x24x16xf32> to vector<24x16xf32>
    %cst = arith.constant dense<0.000000e+00> : vector<4x16xf32>
    %4 = tpu.matmul %1, %3, %cst {dimension_numbers = #tpu.dot_dimension_numbers<[1], [0], [0], [1], [0, 0, 1, 1], [], []>} : vector<4x24xf32>, vector<24x16xf32>, vector<4x16xf32> -> vector<4x16xf32>
    %c0_5 = arith.constant 0 : index
    %c1 = arith.constant 1 : index
    %c0_6 = arith.constant 0 : index
    %5 = vector.load %arg1[%c0_5, %c1, %c0_6] : memref<1x6x24xf32, #tpu.memory_space<vmem>>, vector<1x4x24xf32>
    %6 = vector.shape_cast %5 : vector<1x4x24xf32> to vector<4x24xf32>
    %c1_7 = arith.constant 1 : index
    %c0_8 = arith.constant 0 : index
    %c0_9 = arith.constant 0 : index
    %7 = vector.load %arg2[%c1_7, %c0_8, %c0_9] : memref<3x24x16xf32, #tpu.memory_space<vmem>>, vector<1x24x16xf32>
    %8 = vector.shape_cast %7 : vector<1x24x16xf32> to vector<24x16xf32>
    %cst_10 = arith.constant dense<0.000000e+00> : vector<4x16xf32>
    %9 = tpu.matmul %6, %8, %cst_10 {dimension_numbers = #tpu.dot_dimension_numbers<[1], [0], [0], [1], [0, 0, 1, 1], [], []>} : vector<4x24xf32>, vector<24x16xf32>, vector<4x16xf32> -> vector<4x16xf32>
    %10 = arith.addf %4, %9 : vector<4x16xf32>
    %c0_11 = arith.constant 0 : index
    %c2 = arith.constant 2 : index
    %c0_12 = arith.constant 0 : index
    %11 = vector.load %arg1[%c0_11, %c2, %c0_12] : memref<1x6x24xf32, #tpu.memory_space<vmem>>, vector<1x4x24xf32>
    %12 = vector.shape_cast %11 : vector<1x4x24xf32> to vector<4x24xf32>
    %c2_13 = arith.constant 2 : index
    %c0_14 = arith.constant 0 : index
    %c0_15 = arith.constant 0 : index
    %13 = vector.load %arg2[%c2_13, %c0_14, %c0_15] : memref<3x24x16xf32, #tpu.memory_space<vmem>>, vector<1x24x16xf32>
    %14 = vector.shape_cast %13 : vector<1x24x16xf32> to vector<24x16xf32>
    %cst_16 = arith.constant dense<0.000000e+00> : vector<4x16xf32>
    %15 = tpu.matmul %12, %14, %cst_16 {dimension_numbers = #tpu.dot_dimension_numbers<[1], [0], [0], [1], [0, 0, 1, 1], [], []>} : vector<4x24xf32>, vector<24x16xf32>, vector<4x16xf32> -> vector<4x16xf32>
    %16 = arith.addf %10, %15 : vector<4x16xf32>
    %c0_17 = arith.constant 0 : index
    %c0_18 = arith.constant 0 : index
    %17 = vector.load %arg3[%c0_17, %c0_18] : memref<1x16xf32, #tpu.memory_space<vmem>>, vector<1x16xf32>
    %18 = vector.broadcast %17 : vector<1x16xf32> to vector<4x16xf32>
    %19 = arith.mulf %16, %18 : vector<4x16xf32>
    %c0_19 = arith.constant 0 : index
    %c0_20 = arith.constant 0 : index
    %20 = vector.load %arg4[%c0_19, %c0_20] : memref<1x16xf32, #tpu.memory_space<vmem>>, vector<1x16xf32>
    %21 = vector.broadcast %20 : vector<1x16xf32> to vector<4x16xf32>
    %22 = arith.addf %19, %21 : vector<4x16xf32>
    %cst_21 = arith.constant 0.000000e+00 : f32
    %23 = vector.broadcast %cst_21 : f32 to vector<4x16xf32>
    %24 = arith.maximumf %22, %23 : vector<4x16xf32>
    %c0_22 = arith.constant 0 : index
    %c0_23 = arith.constant 0 : index
    %c0_24 = arith.constant 0 : index
    %25 = vector.load %arg5[%c0_22, %c0_23, %c0_24] : memref<1x4x16xf32, #tpu.memory_space<vmem>>, vector<1x4x16xf32>
    %26 = vector.shape_cast %25 : vector<1x4x16xf32> to vector<4x16xf32>
    %27 = vector.shape_cast %24 : vector<4x16xf32> to vector<1x4x16xf32>
    tpu.vector_store %arg5[%c0_22, %c0_23, %c0_24], %27 {strides = array<i32>} : memref<1x4x16xf32, #tpu.memory_space<vmem>>, vector<1x4x16xf32>,
    return
  }
  func.func @transform_0(%arg0: i32) -> (i32, i32, i32) {
    %c0_i32 = arith.constant 0 : i32
    %c0_i32_0 = arith.constant 0 : i32
    %c0_i32_1 = arith.constant 0 : i32
    return %arg0, %c0_i32, %c0_i32_0 : i32, i32, i32
  }
  func.func @transform_1(%arg0: i32) -> (i32, i32, i32) {
    %c0_i32 = arith.constant 0 : i32
    %c0_i32_0 = arith.constant 0 : i32
    %c0_i32_1 = arith.constant 0 : i32
    %c0_i32_2 = arith.constant 0 : i32
    return %c0_i32, %c0_i32_0, %c0_i32_1 : i32, i32, i32
  }
  func.func @transform_2(%arg0: i32) -> (i32, i32) {
    %c0_i32 = arith.constant 0 : i32
    %c0_i32_0 = arith.constant 0 : i32
    %c0_i32_1 = arith.constant 0 : i32
    return %c0_i32, %c0_i32_0 : i32, i32
  }
  func.func @transform_3(%arg0: i32) -> (i32, i32) {
    %c0_i32 = arith.constant 0 : i32
    %c0_i32_0 = arith.constant 0 : i32
    %c0_i32_1 = arith.constant 0 : i32
    return %c0_i32, %c0_i32_0 : i32, i32
  }
  func.func @transform_4(%arg0: i32) -> (i32, i32, i32) {
    %c0_i32 = arith.constant 0 : i32
    %c0_i32_0 = arith.constant 0 : i32
    %c0_i32_1 = arith.constant 0 : i32
    return %arg0, %c0_i32, %c0_i32_0 : i32, i32, i32
  }
}

module attributes {stable_mosaic.version = 11 : i64} {
  func.func @_mm_add_kernel(%arg0: i32, %arg1: memref<32x4xf32, #tpu.memory_space<vmem>>, %arg2: memref<32x16xf32, #tpu.memory_space<vmem>>, %arg3: memref<4x16xf32, #tpu.memory_space<vmem>>, %arg4: memref<32x16xf32, #tpu.memory_space<vmem>>) attributes {dimension_semantics = [#tpu.dimension_semantics<parallel>], iteration_bounds = array<i64: 1>, scalar_prefetch = 0 : i64, scratch_operands = 0 : i64, tpu.core_type = #tpu.core_type<tc>, window_params = [{transform_indices = @transform_0, window_bounds = array<i64: 32, 4>}, {transform_indices = @transform_1, window_bounds = array<i64: 32, 16>}, {pipeline_mode = #tpu.pipeline_mode<synchronous>, transform_indices = @transform_2, window_bounds = array<i64: 4, 16>}, {transform_indices = @transform_3, window_bounds = array<i64: 32, 16>}]} {
    %c0 = arith.constant 0 : index
    %c0_0 = arith.constant 0 : index
    %0 = vector.load %arg1[%c0, %c0_0] : memref<32x4xf32, #tpu.memory_space<vmem>>, vector<32x4xf32>
    %c0_1 = arith.constant 0 : index
    %c0_2 = arith.constant 0 : index
    %1 = vector.load %arg3[%c0_1, %c0_2] : memref<4x16xf32, #tpu.memory_space<vmem>>, vector<4x16xf32>
    %cst = arith.constant dense<0.000000e+00> : vector<32x16xf32>
    %2 = tpu.matmul %0, %1, %cst {dimension_numbers = #tpu.dot_dimension_numbers<[1], [0], [0], [1], [0, 0, 1, 1], [], []>} : vector<32x4xf32>, vector<4x16xf32>, vector<32x16xf32> -> vector<32x16xf32>
    %c0_3 = arith.constant 0 : index
    %c0_4 = arith.constant 0 : index
    %3 = vector.load %arg2[%c0_3, %c0_4] : memref<32x16xf32, #tpu.memory_space<vmem>>, vector<32x16xf32>
    %4 = arith.addf %2, %3 : vector<32x16xf32>
    %c0_5 = arith.constant 0 : index
    %c0_6 = arith.constant 0 : index
    %5 = vector.load %arg4[%c0_5, %c0_6] : memref<32x16xf32, #tpu.memory_space<vmem>>, vector<32x16xf32>
    tpu.vector_store %arg4[%c0_5, %c0_6], %4 {strides = array<i32>} : memref<32x16xf32, #tpu.memory_space<vmem>>, vector<32x16xf32>,
    return
  }
  func.func @transform_0(%arg0: i32) -> (i32, i32) {
    %c0_i32 = arith.constant 0 : i32
    %c0_i32_0 = arith.constant 0 : i32
    return %arg0, %c0_i32 : i32, i32
  }
  func.func @transform_1(%arg0: i32) -> (i32, i32) {
    %c0_i32 = arith.constant 0 : i32
    %c0_i32_0 = arith.constant 0 : i32
    return %arg0, %c0_i32 : i32, i32
  }
  func.func @transform_2(%arg0: i32) -> (i32, i32) {
    %c0_i32 = arith.constant 0 : i32
    %c0_i32_0 = arith.constant 0 : i32
    %c0_i32_1 = arith.constant 0 : i32
    return %c0_i32, %c0_i32_0 : i32, i32
  }
  func.func @transform_3(%arg0: i32) -> (i32, i32) {
    %c0_i32 = arith.constant 0 : i32
    %c0_i32_0 = arith.constant 0 : i32
    return %arg0, %c0_i32 : i32, i32
  }
}

module attributes {stable_mosaic.version = 11 : i64} {
  func.func @_bnrelu_mm_bnrelu_kernel(%arg0: i32, %arg1: memref<8x16xf32, #tpu.memory_space<vmem>>, %arg2: memref<1x16xf32, #tpu.memory_space<vmem>>, %arg3: memref<1x16xf32, #tpu.memory_space<vmem>>, %arg4: memref<16x4xf32, #tpu.memory_space<vmem>>, %arg5: memref<1x4xf32, #tpu.memory_space<vmem>>, %arg6: memref<1x4xf32, #tpu.memory_space<vmem>>, %arg7: memref<8x4xf32, #tpu.memory_space<vmem>>) attributes {dimension_semantics = [#tpu.dimension_semantics<parallel>], iteration_bounds = array<i64: 1>, scalar_prefetch = 0 : i64, scratch_operands = 0 : i64, tpu.core_type = #tpu.core_type<tc>, window_params = [{transform_indices = @transform_0, window_bounds = array<i64: 8, 16>}, {pipeline_mode = #tpu.pipeline_mode<synchronous>, transform_indices = @transform_1, window_bounds = array<i64: 1, 16>}, {pipeline_mode = #tpu.pipeline_mode<synchronous>, transform_indices = @transform_2, window_bounds = array<i64: 1, 16>}, {pipeline_mode = #tpu.pipeline_mode<synchronous>, transform_indices = @transform_3, window_bounds = array<i64: 16, 4>}, {pipeline_mode = #tpu.pipeline_mode<synchronous>, transform_indices = @transform_4, window_bounds = array<i64: 1, 4>}, {pipeline_mode = #tpu.pipeline_mode<synchronous>, transform_indices = @transform_5, window_bounds = array<i64: 1, 4>}, {transform_indices = @transform_6, window_bounds = array<i64: 8, 4>}]} {
    %c0 = arith.constant 0 : index
    %c0_0 = arith.constant 0 : index
    %0 = vector.load %arg1[%c0, %c0_0] : memref<8x16xf32, #tpu.memory_space<vmem>>, vector<8x16xf32>
    %c0_1 = arith.constant 0 : index
    %c0_2 = arith.constant 0 : index
    %1 = vector.load %arg2[%c0_1, %c0_2] : memref<1x16xf32, #tpu.memory_space<vmem>>, vector<1x16xf32>
    %2 = vector.broadcast %1 : vector<1x16xf32> to vector<8x16xf32>
    %3 = arith.mulf %0, %2 : vector<8x16xf32>
    %c0_3 = arith.constant 0 : index
    %c0_4 = arith.constant 0 : index
    %4 = vector.load %arg3[%c0_3, %c0_4] : memref<1x16xf32, #tpu.memory_space<vmem>>, vector<1x16xf32>
    %5 = vector.broadcast %4 : vector<1x16xf32> to vector<8x16xf32>
    %6 = arith.addf %3, %5 : vector<8x16xf32>
    %cst = arith.constant 0.000000e+00 : f32
    %7 = vector.broadcast %cst : f32 to vector<8x16xf32>
    %8 = arith.maximumf %6, %7 : vector<8x16xf32>
    %c0_5 = arith.constant 0 : index
    %c0_6 = arith.constant 0 : index
    %9 = vector.load %arg4[%c0_5, %c0_6] : memref<16x4xf32, #tpu.memory_space<vmem>>, vector<16x4xf32>
    %cst_7 = arith.constant dense<0.000000e+00> : vector<8x4xf32>
    %10 = tpu.matmul %8, %9, %cst_7 {dimension_numbers = #tpu.dot_dimension_numbers<[1], [0], [0], [1], [0, 0, 1, 1], [], []>} : vector<8x16xf32>, vector<16x4xf32>, vector<8x4xf32> -> vector<8x4xf32>
    %c0_8 = arith.constant 0 : index
    %c0_9 = arith.constant 0 : index
    %11 = vector.load %arg5[%c0_8, %c0_9] : memref<1x4xf32, #tpu.memory_space<vmem>>, vector<1x4xf32>
    %12 = vector.broadcast %11 : vector<1x4xf32> to vector<8x4xf32>
    %13 = arith.mulf %10, %12 : vector<8x4xf32>
    %c0_10 = arith.constant 0 : index
    %c0_11 = arith.constant 0 : index
    %14 = vector.load %arg6[%c0_10, %c0_11] : memref<1x4xf32, #tpu.memory_space<vmem>>, vector<1x4xf32>
    %15 = vector.broadcast %14 : vector<1x4xf32> to vector<8x4xf32>
    %16 = arith.addf %13, %15 : vector<8x4xf32>
    %cst_12 = arith.constant 0.000000e+00 : f32
    %17 = vector.broadcast %cst_12 : f32 to vector<8x4xf32>
    %18 = arith.maximumf %16, %17 : vector<8x4xf32>
    %c0_13 = arith.constant 0 : index
    %c0_14 = arith.constant 0 : index
    %19 = vector.load %arg7[%c0_13, %c0_14] : memref<8x4xf32, #tpu.memory_space<vmem>>, vector<8x4xf32>
    tpu.vector_store %arg7[%c0_13, %c0_14], %18 {strides = array<i32>} : memref<8x4xf32, #tpu.memory_space<vmem>>, vector<8x4xf32>,
    return
  }
  func.func @transform_0(%arg0: i32) -> (i32, i32) {
    %c0_i32 = arith.constant 0 : i32
    %c0_i32_0 = arith.constant 0 : i32
    return %arg0, %c0_i32 : i32, i32
  }
  func.func @transform_1(%arg0: i32) -> (i32, i32) {
    %c0_i32 = arith.constant 0 : i32
    %c0_i32_0 = arith.constant 0 : i32
    %c0_i32_1 = arith.constant 0 : i32
    return %c0_i32, %c0_i32_0 : i32, i32
  }
  func.func @transform_2(%arg0: i32) -> (i32, i32) {
    %c0_i32 = arith.constant 0 : i32
    %c0_i32_0 = arith.constant 0 : i32
    %c0_i32_1 = arith.constant 0 : i32
    return %c0_i32, %c0_i32_0 : i32, i32
  }
  func.func @transform_3(%arg0: i32) -> (i32, i32) {
    %c0_i32 = arith.constant 0 : i32
    %c0_i32_0 = arith.constant 0 : i32
    %c0_i32_1 = arith.constant 0 : i32
    return %c0_i32, %c0_i32_0 : i32, i32
  }
  func.func @transform_4(%arg0: i32) -> (i32, i32) {
    %c0_i32 = arith.constant 0 : i32
    %c0_i32_0 = arith.constant 0 : i32
    %c0_i32_1 = arith.constant 0 : i32
    return %c0_i32, %c0_i32_0 : i32, i32
  }
  func.func @transform_5(%arg0: i32) -> (i32, i32) {
    %c0_i32 = arith.constant 0 : i32
    %c0_i32_0 = arith.constant 0 : i32
    %c0_i32_1 = arith.constant 0 : i32
    return %c0_i32, %c0_i32_0 : i32, i32
  }
  func.func @transform_6(%arg0: i32) -> (i32, i32) {
    %c0_i32 = arith.constant 0 : i32
    %c0_i32_0 = arith.constant 0 : i32
    return %arg0, %c0_i32 : i32, i32
  }
}

module attributes {stable_mosaic.version = 11 : i64} {
  func.func @_conv3x3_bnrelu_kernel(%arg0: i32, %arg1: memref<1x4x16xf32, #tpu.memory_space<vmem>>, %arg2: memref<3x16x8xf32, #tpu.memory_space<vmem>>, %arg3: memref<1x8xf32, #tpu.memory_space<vmem>>, %arg4: memref<1x8xf32, #tpu.memory_space<vmem>>, %arg5: memref<1x2x8xf32, #tpu.memory_space<vmem>>) attributes {dimension_semantics = [#tpu.dimension_semantics<parallel>], iteration_bounds = array<i64: 2>, scalar_prefetch = 0 : i64, scratch_operands = 0 : i64, tpu.core_type = #tpu.core_type<tc>, window_params = [{transform_indices = @transform_0, window_bounds = array<i64: 1, 4, 16>}, {pipeline_mode = #tpu.pipeline_mode<synchronous>, transform_indices = @transform_1, window_bounds = array<i64: 3, 16, 8>}, {pipeline_mode = #tpu.pipeline_mode<synchronous>, transform_indices = @transform_2, window_bounds = array<i64: 1, 8>}, {pipeline_mode = #tpu.pipeline_mode<synchronous>, transform_indices = @transform_3, window_bounds = array<i64: 1, 8>}, {transform_indices = @transform_4, window_bounds = array<i64: 1, 2, 8>}]} {
    %c0 = arith.constant 0 : index
    %c0_0 = arith.constant 0 : index
    %c0_1 = arith.constant 0 : index
    %0 = vector.load %arg1[%c0, %c0_0, %c0_1] : memref<1x4x16xf32, #tpu.memory_space<vmem>>, vector<1x2x16xf32>
    %1 = vector.shape_cast %0 : vector<1x2x16xf32> to vector<2x16xf32>
    %c0_2 = arith.constant 0 : index
    %c0_3 = arith.constant 0 : index
    %c0_4 = arith.constant 0 : index
    %2 = vector.load %arg2[%c0_2, %c0_3, %c0_4] : memref<3x16x8xf32, #tpu.memory_space<vmem>>, vector<1x16x8xf32>
    %3 = vector.shape_cast %2 : vector<1x16x8xf32> to vector<16x8xf32>
    %cst = arith.constant dense<0.000000e+00> : vector<2x8xf32>
    %4 = tpu.matmul %1, %3, %cst {dimension_numbers = #tpu.dot_dimension_numbers<[1], [0], [0], [1], [0, 0, 1, 1], [], []>} : vector<2x16xf32>, vector<16x8xf32>, vector<2x8xf32> -> vector<2x8xf32>
    %c0_5 = arith.constant 0 : index
    %c1 = arith.constant 1 : index
    %c0_6 = arith.constant 0 : index
    %5 = vector.load %arg1[%c0_5, %c1, %c0_6] : memref<1x4x16xf32, #tpu.memory_space<vmem>>, vector<1x2x16xf32>
    %6 = vector.shape_cast %5 : vector<1x2x16xf32> to vector<2x16xf32>
    %c1_7 = arith.constant 1 : index
    %c0_8 = arith.constant 0 : index
    %c0_9 = arith.constant 0 : index
    %7 = vector.load %arg2[%c1_7, %c0_8, %c0_9] : memref<3x16x8xf32, #tpu.memory_space<vmem>>, vector<1x16x8xf32>
    %8 = vector.shape_cast %7 : vector<1x16x8xf32> to vector<16x8xf32>
    %cst_10 = arith.constant dense<0.000000e+00> : vector<2x8xf32>
    %9 = tpu.matmul %6, %8, %cst_10 {dimension_numbers = #tpu.dot_dimension_numbers<[1], [0], [0], [1], [0, 0, 1, 1], [], []>} : vector<2x16xf32>, vector<16x8xf32>, vector<2x8xf32> -> vector<2x8xf32>
    %10 = arith.addf %4, %9 : vector<2x8xf32>
    %c0_11 = arith.constant 0 : index
    %c2 = arith.constant 2 : index
    %c0_12 = arith.constant 0 : index
    %11 = vector.load %arg1[%c0_11, %c2, %c0_12] : memref<1x4x16xf32, #tpu.memory_space<vmem>>, vector<1x2x16xf32>
    %12 = vector.shape_cast %11 : vector<1x2x16xf32> to vector<2x16xf32>
    %c2_13 = arith.constant 2 : index
    %c0_14 = arith.constant 0 : index
    %c0_15 = arith.constant 0 : index
    %13 = vector.load %arg2[%c2_13, %c0_14, %c0_15] : memref<3x16x8xf32, #tpu.memory_space<vmem>>, vector<1x16x8xf32>
    %14 = vector.shape_cast %13 : vector<1x16x8xf32> to vector<16x8xf32>
    %cst_16 = arith.constant dense<0.000000e+00> : vector<2x8xf32>
    %15 = tpu.matmul %12, %14, %cst_16 {dimension_numbers = #tpu.dot_dimension_numbers<[1], [0], [0], [1], [0, 0, 1, 1], [], []>} : vector<2x16xf32>, vector<16x8xf32>, vector<2x8xf32> -> vector<2x8xf32>
    %16 = arith.addf %10, %15 : vector<2x8xf32>
    %c0_17 = arith.constant 0 : index
    %c0_18 = arith.constant 0 : index
    %17 = vector.load %arg3[%c0_17, %c0_18] : memref<1x8xf32, #tpu.memory_space<vmem>>, vector<1x8xf32>
    %18 = vector.broadcast %17 : vector<1x8xf32> to vector<2x8xf32>
    %19 = arith.mulf %16, %18 : vector<2x8xf32>
    %c0_19 = arith.constant 0 : index
    %c0_20 = arith.constant 0 : index
    %20 = vector.load %arg4[%c0_19, %c0_20] : memref<1x8xf32, #tpu.memory_space<vmem>>, vector<1x8xf32>
    %21 = vector.broadcast %20 : vector<1x8xf32> to vector<2x8xf32>
    %22 = arith.addf %19, %21 : vector<2x8xf32>
    %cst_21 = arith.constant 0.000000e+00 : f32
    %23 = vector.broadcast %cst_21 : f32 to vector<2x8xf32>
    %24 = arith.maximumf %22, %23 : vector<2x8xf32>
    %c0_22 = arith.constant 0 : index
    %c0_23 = arith.constant 0 : index
    %c0_24 = arith.constant 0 : index
    %25 = vector.load %arg5[%c0_22, %c0_23, %c0_24] : memref<1x2x8xf32, #tpu.memory_space<vmem>>, vector<1x2x8xf32>
    %26 = vector.shape_cast %25 : vector<1x2x8xf32> to vector<2x8xf32>
    %27 = vector.shape_cast %24 : vector<2x8xf32> to vector<1x2x8xf32>
    tpu.vector_store %arg5[%c0_22, %c0_23, %c0_24], %27 {strides = array<i32>} : memref<1x2x8xf32, #tpu.memory_space<vmem>>, vector<1x2x8xf32>,
    return
  }
  func.func @transform_0(%arg0: i32) -> (i32, i32, i32) {
    %c0_i32 = arith.constant 0 : i32
    %c0_i32_0 = arith.constant 0 : i32
    %c0_i32_1 = arith.constant 0 : i32
    return %arg0, %c0_i32, %c0_i32_0 : i32, i32, i32
  }
  func.func @transform_1(%arg0: i32) -> (i32, i32, i32) {
    %c0_i32 = arith.constant 0 : i32
    %c0_i32_0 = arith.constant 0 : i32
    %c0_i32_1 = arith.constant 0 : i32
    %c0_i32_2 = arith.constant 0 : i32
    return %c0_i32, %c0_i32_0, %c0_i32_1 : i32, i32, i32
  }
  func.func @transform_2(%arg0: i32) -> (i32, i32) {
    %c0_i32 = arith.constant 0 : i32
    %c0_i32_0 = arith.constant 0 : i32
    %c0_i32_1 = arith.constant 0 : i32
    return %c0_i32, %c0_i32_0 : i32, i32
  }
  func.func @transform_3(%arg0: i32) -> (i32, i32) {
    %c0_i32 = arith.constant 0 : i32
    %c0_i32_0 = arith.constant 0 : i32
    %c0_i32_1 = arith.constant 0 : i32
    return %c0_i32, %c0_i32_0 : i32, i32
  }
  func.func @transform_4(%arg0: i32) -> (i32, i32, i32) {
    %c0_i32 = arith.constant 0 : i32
    %c0_i32_0 = arith.constant 0 : i32
    %c0_i32_1 = arith.constant 0 : i32
    return %arg0, %c0_i32, %c0_i32_0 : i32, i32, i32
  }
}

module attributes {stable_mosaic.version = 11 : i64} {
  func.func @_mm_add_kernel(%arg0: i32, %arg1: memref<8x4xf32, #tpu.memory_space<vmem>>, %arg2: memref<8x16xf32, #tpu.memory_space<vmem>>, %arg3: memref<4x16xf32, #tpu.memory_space<vmem>>, %arg4: memref<8x16xf32, #tpu.memory_space<vmem>>) attributes {dimension_semantics = [#tpu.dimension_semantics<parallel>], iteration_bounds = array<i64: 1>, scalar_prefetch = 0 : i64, scratch_operands = 0 : i64, tpu.core_type = #tpu.core_type<tc>, window_params = [{transform_indices = @transform_0, window_bounds = array<i64: 8, 4>}, {transform_indices = @transform_1, window_bounds = array<i64: 8, 16>}, {pipeline_mode = #tpu.pipeline_mode<synchronous>, transform_indices = @transform_2, window_bounds = array<i64: 4, 16>}, {transform_indices = @transform_3, window_bounds = array<i64: 8, 16>}]} {
    %c0 = arith.constant 0 : index
    %c0_0 = arith.constant 0 : index
    %0 = vector.load %arg1[%c0, %c0_0] : memref<8x4xf32, #tpu.memory_space<vmem>>, vector<8x4xf32>
    %c0_1 = arith.constant 0 : index
    %c0_2 = arith.constant 0 : index
    %1 = vector.load %arg3[%c0_1, %c0_2] : memref<4x16xf32, #tpu.memory_space<vmem>>, vector<4x16xf32>
    %cst = arith.constant dense<0.000000e+00> : vector<8x16xf32>
    %2 = tpu.matmul %0, %1, %cst {dimension_numbers = #tpu.dot_dimension_numbers<[1], [0], [0], [1], [0, 0, 1, 1], [], []>} : vector<8x4xf32>, vector<4x16xf32>, vector<8x16xf32> -> vector<8x16xf32>
    %c0_3 = arith.constant 0 : index
    %c0_4 = arith.constant 0 : index
    %3 = vector.load %arg2[%c0_3, %c0_4] : memref<8x16xf32, #tpu.memory_space<vmem>>, vector<8x16xf32>
    %4 = arith.addf %2, %3 : vector<8x16xf32>
    %c0_5 = arith.constant 0 : index
    %c0_6 = arith.constant 0 : index
    %5 = vector.load %arg4[%c0_5, %c0_6] : memref<8x16xf32, #tpu.memory_space<vmem>>, vector<8x16xf32>
    tpu.vector_store %arg4[%c0_5, %c0_6], %4 {strides = array<i32>} : memref<8x16xf32, #tpu.memory_space<vmem>>, vector<8x16xf32>,
    return
  }
  func.func @transform_0(%arg0: i32) -> (i32, i32) {
    %c0_i32 = arith.constant 0 : i32
    %c0_i32_0 = arith.constant 0 : i32
    return %arg0, %c0_i32 : i32, i32
  }
  func.func @transform_1(%arg0: i32) -> (i32, i32) {
    %c0_i32 = arith.constant 0 : i32
    %c0_i32_0 = arith.constant 0 : i32
    return %arg0, %c0_i32 : i32, i32
  }
  func.func @transform_2(%arg0: i32) -> (i32, i32) {
    %c0_i32 = arith.constant 0 : i32
    %c0_i32_0 = arith.constant 0 : i32
    %c0_i32_1 = arith.constant 0 : i32
    return %c0_i32, %c0_i32_0 : i32, i32
  }
  func.func @transform_3(%arg0: i32) -> (i32, i32) {
    %c0_i32 = arith.constant 0 : i32
    %c0_i32_0 = arith.constant 0 : i32
    return %arg0, %c0_i32 : i32, i32
  }
}

module attributes {stable_mosaic.version = 11 : i64} {
  func.func @_upsample_add2_kernel(%arg0: i32, %arg1: memref<16x4xf32, #tpu.memory_space<vmem>>, %arg2: memref<4x32xf32, #tpu.memory_space<vmem>>, %arg3: memref<16x32xf32, #tpu.memory_space<vmem>>, %arg4: memref<16x32xf32, #tpu.memory_space<vmem>>, %arg5: memref<16x32xf32, #tpu.memory_space<vmem>>) attributes {dimension_semantics = [#tpu.dimension_semantics<arbitrary>], iteration_bounds = array<i64: 1>, scalar_prefetch = 0 : i64, scratch_operands = 0 : i64, tpu.core_type = #tpu.core_type<tc>, window_params = [{pipeline_mode = #tpu.pipeline_mode<synchronous>, transform_indices = @transform_0, window_bounds = array<i64: 16, 4>}, {pipeline_mode = #tpu.pipeline_mode<synchronous>, transform_indices = @transform_1, window_bounds = array<i64: 4, 32>}, {pipeline_mode = #tpu.pipeline_mode<synchronous>, transform_indices = @transform_2, window_bounds = array<i64: 16, 32>}, {pipeline_mode = #tpu.pipeline_mode<synchronous>, transform_indices = @transform_3, window_bounds = array<i64: 16, 32>}, {pipeline_mode = #tpu.pipeline_mode<synchronous>, transform_indices = @transform_4, window_bounds = array<i64: 16, 32>}]} {
    %c0 = arith.constant 0 : index
    %c0_0 = arith.constant 0 : index
    %0 = vector.load %arg1[%c0, %c0_0] : memref<16x4xf32, #tpu.memory_space<vmem>>, vector<16x4xf32>
    %c0_1 = arith.constant 0 : index
    %c0_2 = arith.constant 0 : index
    %1 = vector.load %arg2[%c0_1, %c0_2] : memref<4x32xf32, #tpu.memory_space<vmem>>, vector<4x32xf32>
    %cst = arith.constant dense<0.000000e+00> : vector<16x32xf32>
    %2 = tpu.matmul %0, %1, %cst {dimension_numbers = #tpu.dot_dimension_numbers<[1], [0], [0], [1], [0, 0, 1, 1], [], []>} : vector<16x4xf32>, vector<4x32xf32>, vector<16x32xf32> -> vector<16x32xf32>
    %c0_3 = arith.constant 0 : index
    %c0_4 = arith.constant 0 : index
    %3 = vector.load %arg3[%c0_3, %c0_4] : memref<16x32xf32, #tpu.memory_space<vmem>>, vector<16x32xf32>
    %4 = arith.addf %2, %3 : vector<16x32xf32>
    %c0_5 = arith.constant 0 : index
    %c0_6 = arith.constant 0 : index
    %5 = vector.load %arg4[%c0_5, %c0_6] : memref<16x32xf32, #tpu.memory_space<vmem>>, vector<16x32xf32>
    %6 = arith.addf %4, %5 : vector<16x32xf32>
    %c0_7 = arith.constant 0 : index
    %c0_8 = arith.constant 0 : index
    %7 = vector.load %arg5[%c0_7, %c0_8] : memref<16x32xf32, #tpu.memory_space<vmem>>, vector<16x32xf32>
    tpu.vector_store %arg5[%c0_7, %c0_8], %6 {strides = array<i32>} : memref<16x32xf32, #tpu.memory_space<vmem>>, vector<16x32xf32>,
    return
  }
  func.func @transform_0(%arg0: i32) -> (i32, i32) {
    %c0_i32 = arith.constant 0 : i32
    %c0_i32_0 = arith.constant 0 : i32
    %c0_i32_1 = arith.constant 0 : i32
    return %c0_i32, %c0_i32_0 : i32, i32
  }
  func.func @transform_1(%arg0: i32) -> (i32, i32) {
    %c0_i32 = arith.constant 0 : i32
    %c0_i32_0 = arith.constant 0 : i32
    %c0_i32_1 = arith.constant 0 : i32
    return %c0_i32, %c0_i32_0 : i32, i32
  }
  func.func @transform_2(%arg0: i32) -> (i32, i32) {
    %c0_i32 = arith.constant 0 : i32
    %c0_i32_0 = arith.constant 0 : i32
    %c0_i32_1 = arith.constant 0 : i32
    return %c0_i32, %c0_i32_0 : i32, i32
  }
  func.func @transform_3(%arg0: i32) -> (i32, i32) {
    %c0_i32 = arith.constant 0 : i32
    %c0_i32_0 = arith.constant 0 : i32
    %c0_i32_1 = arith.constant 0 : i32
    return %c0_i32, %c0_i32_0 : i32, i32
  }
  func.func @transform_4(%arg0: i32) -> (i32, i32) {
    %c0_i32 = arith.constant 0 : i32
    %c0_i32_0 = arith.constant 0 : i32
    %c0_i32_1 = arith.constant 0 : i32
    return %c0_i32, %c0_i32_0 : i32, i32
  }
}

module attributes {stable_mosaic.version = 11 : i64} {
  func.func @_upsample_add2_kernel(%arg0: i32, %arg1: memref<64x16xf32, #tpu.memory_space<vmem>>, %arg2: memref<16x32xf32, #tpu.memory_space<vmem>>, %arg3: memref<64x32xf32, #tpu.memory_space<vmem>>, %arg4: memref<64x32xf32, #tpu.memory_space<vmem>>, %arg5: memref<64x32xf32, #tpu.memory_space<vmem>>) attributes {dimension_semantics = [#tpu.dimension_semantics<arbitrary>], iteration_bounds = array<i64: 1>, scalar_prefetch = 0 : i64, scratch_operands = 0 : i64, tpu.core_type = #tpu.core_type<tc>, window_params = [{pipeline_mode = #tpu.pipeline_mode<synchronous>, transform_indices = @transform_0, window_bounds = array<i64: 64, 16>}, {pipeline_mode = #tpu.pipeline_mode<synchronous>, transform_indices = @transform_1, window_bounds = array<i64: 16, 32>}, {pipeline_mode = #tpu.pipeline_mode<synchronous>, transform_indices = @transform_2, window_bounds = array<i64: 64, 32>}, {pipeline_mode = #tpu.pipeline_mode<synchronous>, transform_indices = @transform_3, window_bounds = array<i64: 64, 32>}, {pipeline_mode = #tpu.pipeline_mode<synchronous>, transform_indices = @transform_4, window_bounds = array<i64: 64, 32>}]} {
    %c0 = arith.constant 0 : index
    %c0_0 = arith.constant 0 : index
    %0 = vector.load %arg1[%c0, %c0_0] : memref<64x16xf32, #tpu.memory_space<vmem>>, vector<64x16xf32>
    %c0_1 = arith.constant 0 : index
    %c0_2 = arith.constant 0 : index
    %1 = vector.load %arg2[%c0_1, %c0_2] : memref<16x32xf32, #tpu.memory_space<vmem>>, vector<16x32xf32>
    %cst = arith.constant dense<0.000000e+00> : vector<64x32xf32>
    %2 = tpu.matmul %0, %1, %cst {dimension_numbers = #tpu.dot_dimension_numbers<[1], [0], [0], [1], [0, 0, 1, 1], [], []>} : vector<64x16xf32>, vector<16x32xf32>, vector<64x32xf32> -> vector<64x32xf32>
    %c0_3 = arith.constant 0 : index
    %c0_4 = arith.constant 0 : index
    %3 = vector.load %arg3[%c0_3, %c0_4] : memref<64x32xf32, #tpu.memory_space<vmem>>, vector<64x32xf32>
    %4 = arith.addf %2, %3 : vector<64x32xf32>
    %c0_5 = arith.constant 0 : index
    %c0_6 = arith.constant 0 : index
    %5 = vector.load %arg4[%c0_5, %c0_6] : memref<64x32xf32, #tpu.memory_space<vmem>>, vector<64x32xf32>
    %6 = arith.addf %4, %5 : vector<64x32xf32>
    %c0_7 = arith.constant 0 : index
    %c0_8 = arith.constant 0 : index
    %7 = vector.load %arg5[%c0_7, %c0_8] : memref<64x32xf32, #tpu.memory_space<vmem>>, vector<64x32xf32>
    tpu.vector_store %arg5[%c0_7, %c0_8], %6 {strides = array<i32>} : memref<64x32xf32, #tpu.memory_space<vmem>>, vector<64x32xf32>,
    return
  }
  func.func @transform_0(%arg0: i32) -> (i32, i32) {
    %c0_i32 = arith.constant 0 : i32
    %c0_i32_0 = arith.constant 0 : i32
    %c0_i32_1 = arith.constant 0 : i32
    return %c0_i32, %c0_i32_0 : i32, i32
  }
  func.func @transform_1(%arg0: i32) -> (i32, i32) {
    %c0_i32 = arith.constant 0 : i32
    %c0_i32_0 = arith.constant 0 : i32
    %c0_i32_1 = arith.constant 0 : i32
    return %c0_i32, %c0_i32_0 : i32, i32
  }
  func.func @transform_2(%arg0: i32) -> (i32, i32) {
    %c0_i32 = arith.constant 0 : i32
    %c0_i32_0 = arith.constant 0 : i32
    %c0_i32_1 = arith.constant 0 : i32
    return %c0_i32, %c0_i32_0 : i32, i32
  }
  func.func @transform_3(%arg0: i32) -> (i32, i32) {
    %c0_i32 = arith.constant 0 : i32
    %c0_i32_0 = arith.constant 0 : i32
    %c0_i32_1 = arith.constant 0 : i32
    return %c0_i32, %c0_i32_0 : i32, i32
  }
  func.func @transform_4(%arg0: i32) -> (i32, i32) {
    %c0_i32 = arith.constant 0 : i32
    %c0_i32_0 = arith.constant 0 : i32
    %c0_i32_1 = arith.constant 0 : i32
    return %c0_i32, %c0_i32_0 : i32, i32
  }
}

module attributes {stable_mosaic.version = 11 : i64} {
  func.func @_upsample_add1_kernel(%arg0: i32, %arg1: memref<256x64xf32, #tpu.memory_space<vmem>>, %arg2: memref<64x32xf32, #tpu.memory_space<vmem>>, %arg3: memref<256x32xf32, #tpu.memory_space<vmem>>, %arg4: memref<256x32xf32, #tpu.memory_space<vmem>>) attributes {dimension_semantics = [#tpu.dimension_semantics<arbitrary>], iteration_bounds = array<i64: 1>, scalar_prefetch = 0 : i64, scratch_operands = 0 : i64, tpu.core_type = #tpu.core_type<tc>, window_params = [{pipeline_mode = #tpu.pipeline_mode<synchronous>, transform_indices = @transform_0, window_bounds = array<i64: 256, 64>}, {pipeline_mode = #tpu.pipeline_mode<synchronous>, transform_indices = @transform_1, window_bounds = array<i64: 64, 32>}, {pipeline_mode = #tpu.pipeline_mode<synchronous>, transform_indices = @transform_2, window_bounds = array<i64: 256, 32>}, {pipeline_mode = #tpu.pipeline_mode<synchronous>, transform_indices = @transform_3, window_bounds = array<i64: 256, 32>}]} {
    %c0 = arith.constant 0 : index
    %c0_0 = arith.constant 0 : index
    %0 = vector.load %arg1[%c0, %c0_0] : memref<256x64xf32, #tpu.memory_space<vmem>>, vector<256x64xf32>
    %c0_1 = arith.constant 0 : index
    %c0_2 = arith.constant 0 : index
    %1 = vector.load %arg2[%c0_1, %c0_2] : memref<64x32xf32, #tpu.memory_space<vmem>>, vector<64x32xf32>
    %cst = arith.constant dense<0.000000e+00> : vector<256x32xf32>
    %2 = tpu.matmul %0, %1, %cst {dimension_numbers = #tpu.dot_dimension_numbers<[1], [0], [0], [1], [0, 0, 1, 1], [], []>} : vector<256x64xf32>, vector<64x32xf32>, vector<256x32xf32> -> vector<256x32xf32>
    %c0_3 = arith.constant 0 : index
    %c0_4 = arith.constant 0 : index
    %3 = vector.load %arg3[%c0_3, %c0_4] : memref<256x32xf32, #tpu.memory_space<vmem>>, vector<256x32xf32>
    %4 = arith.addf %2, %3 : vector<256x32xf32>
    %c0_5 = arith.constant 0 : index
    %c0_6 = arith.constant 0 : index
    %5 = vector.load %arg4[%c0_5, %c0_6] : memref<256x32xf32, #tpu.memory_space<vmem>>, vector<256x32xf32>
    tpu.vector_store %arg4[%c0_5, %c0_6], %4 {strides = array<i32>} : memref<256x32xf32, #tpu.memory_space<vmem>>, vector<256x32xf32>,
    return
  }
  func.func @transform_0(%arg0: i32) -> (i32, i32) {
    %c0_i32 = arith.constant 0 : i32
    %c0_i32_0 = arith.constant 0 : i32
    %c0_i32_1 = arith.constant 0 : i32
    return %c0_i32, %c0_i32_0 : i32, i32
  }
  func.func @transform_1(%arg0: i32) -> (i32, i32) {
    %c0_i32 = arith.constant 0 : i32
    %c0_i32_0 = arith.constant 0 : i32
    %c0_i32_1 = arith.constant 0 : i32
    return %c0_i32, %c0_i32_0 : i32, i32
  }
  func.func @transform_2(%arg0: i32) -> (i32, i32) {
    %c0_i32 = arith.constant 0 : i32
    %c0_i32_0 = arith.constant 0 : i32
    %c0_i32_1 = arith.constant 0 : i32
    return %c0_i32, %c0_i32_0 : i32, i32
  }
  func.func @transform_3(%arg0: i32) -> (i32, i32) {
    %c0_i32 = arith.constant 0 : i32
    %c0_i32_0 = arith.constant 0 : i32
    %c0_i32_1 = arith.constant 0 : i32
    return %c0_i32, %c0_i32_0 : i32, i32
  }
}

module attributes {stable_mosaic.version = 11 : i64} {
  func.func @_mask_gate_kernel(%arg0: i32, %arg1: memref<256x16xf32, #tpu.memory_space<vmem>>, %arg2: memref<256x16xf32, #tpu.memory_space<vmem>>, %arg3: memref<1x16xf32, #tpu.memory_space<vmem>>, %arg4: memref<1x16xf32, #tpu.memory_space<vmem>>, %arg5: memref<16x16xf32, #tpu.memory_space<vmem>>, %arg6: memref<1x16xf32, #tpu.memory_space<vmem>>, %arg7: memref<1x16xf32, #tpu.memory_space<vmem>>, %arg8: memref<16x16xf32, #tpu.memory_space<vmem>>, %arg9: memref<256x16xf32, #tpu.memory_space<vmem>>) attributes {dimension_semantics = [#tpu.dimension_semantics<parallel>], iteration_bounds = array<i64: 2>, scalar_prefetch = 0 : i64, scratch_operands = 0 : i64, tpu.core_type = #tpu.core_type<tc>, window_params = [{transform_indices = @transform_0, window_bounds = array<i64: 256, 16>}, {transform_indices = @transform_1, window_bounds = array<i64: 256, 16>}, {pipeline_mode = #tpu.pipeline_mode<synchronous>, transform_indices = @transform_2, window_bounds = array<i64: 1, 16>}, {pipeline_mode = #tpu.pipeline_mode<synchronous>, transform_indices = @transform_3, window_bounds = array<i64: 1, 16>}, {pipeline_mode = #tpu.pipeline_mode<synchronous>, transform_indices = @transform_4, window_bounds = array<i64: 16, 16>}, {pipeline_mode = #tpu.pipeline_mode<synchronous>, transform_indices = @transform_5, window_bounds = array<i64: 1, 16>}, {pipeline_mode = #tpu.pipeline_mode<synchronous>, transform_indices = @transform_6, window_bounds = array<i64: 1, 16>}, {pipeline_mode = #tpu.pipeline_mode<synchronous>, transform_indices = @transform_7, window_bounds = array<i64: 16, 16>}, {transform_indices = @transform_8, window_bounds = array<i64: 256, 16>}]} {
    %c0 = arith.constant 0 : index
    %c0_0 = arith.constant 0 : index
    %0 = vector.load %arg1[%c0, %c0_0] : memref<256x16xf32, #tpu.memory_space<vmem>>, vector<256x16xf32>
    %c0_1 = arith.constant 0 : index
    %c0_2 = arith.constant 0 : index
    %1 = vector.load %arg3[%c0_1, %c0_2] : memref<1x16xf32, #tpu.memory_space<vmem>>, vector<1x16xf32>
    %2 = vector.broadcast %1 : vector<1x16xf32> to vector<256x16xf32>
    %3 = arith.mulf %0, %2 : vector<256x16xf32>
    %c0_3 = arith.constant 0 : index
    %c0_4 = arith.constant 0 : index
    %4 = vector.load %arg4[%c0_3, %c0_4] : memref<1x16xf32, #tpu.memory_space<vmem>>, vector<1x16xf32>
    %5 = vector.broadcast %4 : vector<1x16xf32> to vector<256x16xf32>
    %6 = arith.addf %3, %5 : vector<256x16xf32>
    %cst = arith.constant 0.000000e+00 : f32
    %7 = vector.broadcast %cst : f32 to vector<256x16xf32>
    %8 = arith.maximumf %6, %7 : vector<256x16xf32>
    %c0_5 = arith.constant 0 : index
    %c0_6 = arith.constant 0 : index
    %9 = vector.load %arg5[%c0_5, %c0_6] : memref<16x16xf32, #tpu.memory_space<vmem>>, vector<16x16xf32>
    %cst_7 = arith.constant dense<0.000000e+00> : vector<256x16xf32>
    %10 = tpu.matmul %8, %9, %cst_7 {dimension_numbers = #tpu.dot_dimension_numbers<[1], [0], [0], [1], [0, 0, 1, 1], [], []>} : vector<256x16xf32>, vector<16x16xf32>, vector<256x16xf32> -> vector<256x16xf32>
    %c0_8 = arith.constant 0 : index
    %c0_9 = arith.constant 0 : index
    %11 = vector.load %arg6[%c0_8, %c0_9] : memref<1x16xf32, #tpu.memory_space<vmem>>, vector<1x16xf32>
    %12 = vector.broadcast %11 : vector<1x16xf32> to vector<256x16xf32>
    %13 = arith.mulf %10, %12 : vector<256x16xf32>
    %c0_10 = arith.constant 0 : index
    %c0_11 = arith.constant 0 : index
    %14 = vector.load %arg7[%c0_10, %c0_11] : memref<1x16xf32, #tpu.memory_space<vmem>>, vector<1x16xf32>
    %15 = vector.broadcast %14 : vector<1x16xf32> to vector<256x16xf32>
    %16 = arith.addf %13, %15 : vector<256x16xf32>
    %cst_12 = arith.constant 0.000000e+00 : f32
    %17 = vector.broadcast %cst_12 : f32 to vector<256x16xf32>
    %18 = arith.maximumf %16, %17 : vector<256x16xf32>
    %c0_13 = arith.constant 0 : index
    %c0_14 = arith.constant 0 : index
    %19 = vector.load %arg8[%c0_13, %c0_14] : memref<16x16xf32, #tpu.memory_space<vmem>>, vector<16x16xf32>
    %cst_15 = arith.constant dense<0.000000e+00> : vector<256x16xf32>
    %20 = tpu.matmul %18, %19, %cst_15 {dimension_numbers = #tpu.dot_dimension_numbers<[1], [0], [0], [1], [0, 0, 1, 1], [], []>} : vector<256x16xf32>, vector<16x16xf32>, vector<256x16xf32> -> vector<256x16xf32>
    %cst_16 = arith.constant 0.000000e+00 : f32
    %21 = vector.broadcast %cst_16 : f32 to vector<256x16xf32>
    %22 = arith.subf %21, %20 : vector<256x16xf32>
    %23 = math.exp %22 : vector<256x16xf32>
    %cst_17 = arith.constant 1.000000e+00 : f32
    %24 = vector.broadcast %cst_17 : f32 to vector<256x16xf32>
    %25 = arith.addf %24, %23 : vector<256x16xf32>
    %26 = tpu.reciprocal %25 {approx = true} : vector<256x16xf32> -> vector<256x16xf32>
    %cst_18 = arith.constant 1.000000e+00 : f32
    %27 = vector.broadcast %cst_18 : f32 to vector<256x16xf32>
    %28 = arith.addf %27, %26 : vector<256x16xf32>
    %c0_19 = arith.constant 0 : index
    %c0_20 = arith.constant 0 : index
    %29 = vector.load %arg2[%c0_19, %c0_20] : memref<256x16xf32, #tpu.memory_space<vmem>>, vector<256x16xf32>
    %30 = arith.mulf %28, %29 : vector<256x16xf32>
    %c0_21 = arith.constant 0 : index
    %c0_22 = arith.constant 0 : index
    %31 = vector.load %arg9[%c0_21, %c0_22] : memref<256x16xf32, #tpu.memory_space<vmem>>, vector<256x16xf32>
    tpu.vector_store %arg9[%c0_21, %c0_22], %30 {strides = array<i32>} : memref<256x16xf32, #tpu.memory_space<vmem>>, vector<256x16xf32>,
    return
  }
  func.func @transform_0(%arg0: i32) -> (i32, i32) {
    %c0_i32 = arith.constant 0 : i32
    %c0_i32_0 = arith.constant 0 : i32
    return %arg0, %c0_i32 : i32, i32
  }
  func.func @transform_1(%arg0: i32) -> (i32, i32) {
    %c0_i32 = arith.constant 0 : i32
    %c0_i32_0 = arith.constant 0 : i32
    return %arg0, %c0_i32 : i32, i32
  }
  func.func @transform_2(%arg0: i32) -> (i32, i32) {
    %c0_i32 = arith.constant 0 : i32
    %c0_i32_0 = arith.constant 0 : i32
    %c0_i32_1 = arith.constant 0 : i32
    return %c0_i32, %c0_i32_0 : i32, i32
  }
  func.func @transform_3(%arg0: i32) -> (i32, i32) {
    %c0_i32 = arith.constant 0 : i32
    %c0_i32_0 = arith.constant 0 : i32
    %c0_i32_1 = arith.constant 0 : i32
    return %c0_i32, %c0_i32_0 : i32, i32
  }
  func.func @transform_4(%arg0: i32) -> (i32, i32) {
    %c0_i32 = arith.constant 0 : i32
    %c0_i32_0 = arith.constant 0 : i32
    %c0_i32_1 = arith.constant 0 : i32
    return %c0_i32, %c0_i32_0 : i32, i32
  }
  func.func @transform_5(%arg0: i32) -> (i32, i32) {
    %c0_i32 = arith.constant 0 : i32
    %c0_i32_0 = arith.constant 0 : i32
    %c0_i32_1 = arith.constant 0 : i32
    return %c0_i32, %c0_i32_0 : i32, i32
  }
  func.func @transform_6(%arg0: i32) -> (i32, i32) {
    %c0_i32 = arith.constant 0 : i32
    %c0_i32_0 = arith.constant 0 : i32
    %c0_i32_1 = arith.constant 0 : i32
    return %c0_i32, %c0_i32_0 : i32, i32
  }
  func.func @transform_7(%arg0: i32) -> (i32, i32) {
    %c0_i32 = arith.constant 0 : i32
    %c0_i32_0 = arith.constant 0 : i32
    %c0_i32_1 = arith.constant 0 : i32
    return %c0_i32, %c0_i32_0 : i32, i32
  }
  func.func @transform_8(%arg0: i32) -> (i32, i32) {
    %c0_i32 = arith.constant 0 : i32
    %c0_i32_0 = arith.constant 0 : i32
    return %arg0, %c0_i32 : i32, i32
  }
}

</mosaic_0001>

<bundles_post_ra>
// kernel: tile.198
= control target key start
LH: loop header
LB: loop body
LE: loop exit
PB: predicated region body
PF: predicated region fallthrough
CT: control target
= control target key end

     0   :  { %s22_s0 = inlined_call_operand.vmem [shape: f32[4], index: 0, kind: input, shape index: {}]   ;;  %s23_s1 = inlined_call_operand.vmem [shape: f32[2,4], index: 1, kind: output, shape index: {}]  }
   0x1   :  { %v4_v0 = vld [vmem:[%s22_s0] ss:$0 sm:$0xff] }
   0x2   :  { %5 = vst [vmem:[%s23_s1] sm:$0x3] %v4_v0 }

// kernel: tile.188
= control target key start
LH: loop header
LB: loop body
LE: loop exit
PB: predicated region body
PF: predicated region fallthrough
CT: control target
= control target key end

     0   :  { %s22_s0 = inlined_call_operand.vmem [shape: f32[4], index: 0, kind: input, shape index: {}]   ;;  %s23_s1 = inlined_call_operand.vmem [shape: f32[4,4], index: 1, kind: output, shape index: {}]  }
   0x1   :  { %v4_v0 = vld [vmem:[%s22_s0] ss:$0 sm:$0xff] }
   0x2   :  { %5 = vst [vmem:[%s23_s1] sm:$0xf] %v4_v0 }

// kernel: tile.199
= control target key start
LH: loop header
LB: loop body
LE: loop exit
PB: predicated region body
PF: predicated region fallthrough
CT: control target
= control target key end

     0   :  { %vm8_vm0 = vcmask 31744   ;;  %vm14_vm1 = vcmask 64544   ;;  %s42_s0 = inlined_call_operand.vmem [shape: f32[2,4], index: 0, kind: input, shape index: {}]   ;;  %s43_s1 = inlined_call_operand.vmem [shape: f32[1,8], index: 1, kind: output, shape index: {}]  }
   0x1   :  { %v5_v0 = vld [vmem:[%s42_s0] sm:$0x3]  ;;  %s25_s0 = smov 4  }
   0x2   :  { %6 = vst [vmem:[#allocation1] sm:$0x3] %v5_v0 }
   0x9   :  { %v11_v1 = vld [vmem:[#allocation1 + $0x1] sm:$0x1]   ;;  %v7_v2 = vld [vmem:[#allocation1] sm:$0x1]  }
   0xa   :  { %12 = vrot.lane.b32.xlu0 %v11_v1, %s25_s0  ;;  %9 = vst.msk [vmem:[#allocation0] sm:$0x1] %vm8_vm0, %v7_v2  }
  0x7c   :  { %v13_v3 = vpop.permute.xlu0 %12  }
  0x7d   :  { %15 = vst.msk [vmem:[#allocation0] sm:$0x1] %vm14_vm1, %v13_v3  }
  0x84   :  { %v20_v4 = vld [vmem:[#allocation0] sm:$0x1] }
  0x85   :  { %23 = vst [vmem:[%s43_s1] sm:$0x1] %v20_v4 }

// kernel: tile.189
= control target key start
LH: loop header
LB: loop body
LE: loop exit
PB: predicated region body
PF: predicated region fallthrough
CT: control target
= control target key end

     0   :  { %vm8_vm0 = vcmask 31744   ;;  %s40_s8 = smov 4   ;;  %s41_s9 = smov 8   ;;  %vm14_vm1 = vcmask 130144   ;;  %vm20_vm2 = vcmask 97344   ;;  %vm26_vm3 = vcmask 64544   ;;  %s58_s0 = inlined_call_operand.vmem [shape: f32[4,4], index: 0, kind: input, shape index: {}]   ;;  %s59_s1 = inlined_call_operand.vmem [shape: f32[1,16], index: 1, kind: output, shape index: {}]  }
   0x1   :  { %v5_v0 = vld [vmem:[%s58_s0] sm:$0xf]  ;;  %s39_s0 = smov 12  }
   0x2   :  { %6 = vst [vmem:[#allocation1] sm:$0xf] %v5_v0 }
   0x9   :  { %v11_v1 = vld [vmem:[#allocation1 + $0x3] sm:$0x1]   ;;  %v23_v2 = vld [vmem:[#allocation1 + $0x1] sm:$0x1]   ;;  %v7_v3 = vld [vmem:[#allocation1] sm:$0x1]  }
   0xa   :  { %12 = vrot.lane.b32.xlu0 %v11_v1, %s39_s0  ;;  %24 = vrot.lane.b32.xlu1 %v23_v2, %s40_s8  ;;  %v17_v4 = vld [vmem:[#allocation1 + $0x2] sm:$0x1]   ;;  %9 = vst.msk [vmem:[#allocation0] sm:$0x1] %vm8_vm0, %v7_v3  }
   0xe   :  { %18 = vrot.lane.b32.xlu0 %v17_v4, %s41_s9 }
  0x7c   :  { %v13_v5 = vpop.permute.xlu0 %12   ;;  %v25_v6 = vpop.permute.xlu1 %24  }
  0x7d   :  { %15 = vst.msk [vmem:[#allocation0] sm:$0x1] %vm14_vm1, %v13_v5  }
  0x80   :  { %v19_v7 = vpop.permute.xlu0 %18  }
  0x81   :  { %21 = vst.msk [vmem:[#allocation0] sm:$0x1] %vm20_vm2, %v19_v7  }
  0x82   :  { %27 = vst.msk [vmem:[#allocation0] sm:$0x1] %vm26_vm3, %v25_v6  }
  0x89   :  { %v32_v8 = vld [vmem:[#allocation0] sm:$0x1] }
  0x8a   :  { %35 = vst [vmem:[%s59_s1] sm:$0x1] %v32_v8 }

// kernel: tile.168
= control target key start
LH: loop header
LB: loop body
LE: loop exit
PB: predicated region body
PF: predicated region fallthrough
CT: control target
= control target key end

     0   :  { %s22_s0 = inlined_call_operand.vmem [shape: f32[4], index: 0, kind: input, shape index: {}]   ;;  %s23_s1 = inlined_call_operand.vmem [shape: f32[8,4], index: 1, kind: output, shape index: {}]  }
   0x1   :  { %v4_v0 = vld [vmem:[%s22_s0] ss:$0 sm:$0xff] }
   0x2   :  { %5 = vst [vmem:[%s23_s1] sm:$0xff] %v4_v0 }

// kernel: tile.169
= control target key start
LH: loop header
LB: loop body
LE: loop exit
PB: predicated region body
PF: predicated region fallthrough
CT: control target
= control target key end

     0   :  { %s69_s10 = smov 28   ;;  %s70_s11 = smov 20   ;;  %vm3_vm0 = vcmask 31744   ;;  %vm9_vm1 = vcmask 261344   ;;  %vm15_vm2 = vcmask 228544   ;;  %vm21_vm3 = vcmask 195744   ;;  %s113_s0 = inlined_call_operand.vmem [shape: f32[8,4], index: 0, kind: input, shape index: {}]   ;;  %s114_s1 = inlined_call_operand.vmem [shape: f32[1,32], index: 1, kind: output, shape index: {}]  }
   0x1   :  { %v55_v0 = vld [vmem:[%s113_s0 + $0x7] sm:$0x1]   ;;  %v57_v1 = vld [vmem:[%s113_s0 + $0x5] sm:$0x1]   ;;  %v56_v2 = vld [vmem:[%s113_s0 + $0x6] sm:$0x1]  }
   0x2   :  { %7 = vrot.lane.b32.xlu0 %v55_v0, %s69_s10  ;;  %19 = vrot.lane.b32.xlu1 %v57_v1, %s70_s11  ;;  %v58_v3 = vld [vmem:[%s113_s0 + $0x4] sm:$0x1]   ;;  %v2_v4 = vld [vmem:[%s113_s0] sm:$0x1]   ;;  %s71_s18 = smov 24   ;;  %s72_s19 = smov 16  }
   0x3   :  { %4 = vst.msk [vmem:[#allocation0] sm:$0x1] %vm3_vm0, %v2_v4   ;;  %v59_v5 = vld [vmem:[%s113_s0 + $0x3] sm:$0x1]   ;;  %v60_v6 = vld [vmem:[%s113_s0 + $0x2] sm:$0x1]  }
   0x4   :  { %s73_s24 = smov 12   ;;  %s74_s25 = smov 8   ;;  %v61_v7 = vld [vmem:[%s113_s0 + $0x1] sm:$0x1]   ;;  %vm27_vm4 = vcmask 162944   ;;  %vm33_vm5 = vcmask 130144  }
   0x5   :  { %s75_s0 = smov 4   ;;  %vm39_vm6 = vcmask 97344   ;;  %vm45_vm7 = vcmask 64544  }
   0x6   :  { %13 = vrot.lane.b32.xlu0 %v56_v2, %s71_s18  ;;  %25 = vrot.lane.b32.xlu1 %v58_v3, %s72_s19 }
   0xa   :  { %31 = vrot.lane.b32.xlu0 %v59_v5, %s73_s24  ;;  %37 = vrot.lane.b32.xlu1 %v60_v6, %s74_s25 }
   0xe   :  { %43 = vrot.lane.b32.xlu0 %v61_v7, %s75_s0 }
  0x74   :  { %v8_v8 = vpop.permute.xlu0 %7   ;;  %v20_v9 = vpop.permute.xlu1 %19  }
  0x75   :  { %10 = vst.msk [vmem:[#allocation0] sm:$0x1] %vm9_vm1, %v8_v8  }
  0x78   :  { %v14_v10 = vpop.permute.xlu0 %13   ;;  %v26_v11 = vpop.permute.xlu1 %25  }
  0x79   :  { %16 = vst.msk [vmem:[#allocation0] sm:$0x1] %vm15_vm2, %v14_v10  }
  0x7a   :  { %22 = vst.msk [vmem:[#allocation0] sm:$0x1] %vm21_vm3, %v20_v9  }
  0x7b   :  { %28 = vst.msk [vmem:[#allocation0] sm:$0x1] %vm27_vm4, %v26_v11  }
  0x7c   :  { %v32_v12 = vpop.permute.xlu0 %31   ;;  %v38_v13 = vpop.permute.xlu1 %37  }
  0x7d   :  { %34 = vst.msk [vmem:[#allocation0] sm:$0x1] %vm33_vm5, %v32_v12  }
  0x7e   :  { %40 = vst.msk [vmem:[#allocation0] sm:$0x1] %vm39_vm6, %v38_v13  }
  0x80   :  { %v44_v14 = vpop.permute.xlu0 %43  }
  0x81   :  { %46 = vst.msk [vmem:[#allocation0] sm:$0x1] %vm45_vm7, %v44_v14  }
  0x88   :  { %v51_v15 = vld [vmem:[#allocation0] sm:$0x1] }
  0x89   :  { %54 = vst [vmem:[%s114_s1] sm:$0x1] %v51_v15 }

// kernel: tile.148
= control target key start
LH: loop header
LB: loop body
LE: loop exit
PB: predicated region body
PF: predicated region fallthrough
CT: control target
= control target key end

     0   :  { %s28_s0 = inlined_call_operand.vmem [shape: f32[4], index: 0, kind: input, shape index: {}]   ;;  %s29_s1 = inlined_call_operand.vmem [shape: f32[16,4], index: 1, kind: output, shape index: {}]  }
   0x1   :  { %v4_v0 = vld [vmem:[%s28_s0] ss:$0 sm:$0xff] }
   0x2   :  { %5 = vst [vmem:[%s29_s1] sm:$0xff] %v4_v0  ;;  %8 = vst [vmem:[%s29_s1 + $0x8] sm:$0xff] %v4_v0 }

// kernel: tile.149
= control target key start
LH: loop header
LB: loop body
LE: loop exit
PB: predicated region body
PF: predicated region fallthrough
CT: control target
= control target key end

     0   :  { %s133_s10 = smov 60   ;;  %s134_s11 = smov 52   ;;  %vm3_vm0 = vcmask 31744   ;;  %vm9_vm1 = vcmask 523744   ;;  %vm15_vm2 = vcmask 490944   ;;  %vm21_vm3 = vcmask 458144   ;;  %s209_s0 = inlined_call_operand.vmem [shape: f32[16,4], index: 0, kind: input, shape index: {}]   ;;  %s210_s1 = inlined_call_operand.vmem [shape: f32[1,64], index: 1, kind: output, shape index: {}]  }
   0x1   :  { %v103_v0 = vld [vmem:[%s209_s0 + $0xf] sm:$0x1]   ;;  %v105_v1 = vld [vmem:[%s209_s0 + $0xd] sm:$0x1]   ;;  %v104_v2 = vld [vmem:[%s209_s0 + $0xe] sm:$0x1]  }
   0x2   :  { %7 = vrot.lane.b32.xlu0 %v103_v0, %s133_s10  ;;  %19 = vrot.lane.b32.xlu1 %v105_v1, %s134_s11  ;;  %v106_v3 = vld [vmem:[%s209_s0 + $0xc] sm:$0x1]   ;;  %s135_s16 = smov 56   ;;  %s136_s17 = smov 48   ;;  %v107_v4 = vld [vmem:[%s209_s0 + $0xb] sm:$0x1]  }
   0x3   :  { %v108_v5 = vld [vmem:[%s209_s0 + $0xa] sm:$0x1]   ;;  %v2_v6 = vld [vmem:[%s209_s0] sm:$0x1]   ;;  %s137_s24 = smov 44   ;;  %s138_s25 = smov 40  }
   0x4   :  { %4 = vst.msk [vmem:[#allocation0] sm:$0x1] %vm3_vm0, %v2_v6   ;;  %v109_v7 = vld [vmem:[%s209_s0 + $0x9] sm:$0x1]   ;;  %v110_v8 = vld [vmem:[%s209_s0 + $0x8] sm:$0x1]  }
   0x5   :  { %s139_s30 = smov 36   ;;  %s140_s2 = smov 32   ;;  %v111_v9 = vld [vmem:[%s209_s0 + $0x7] sm:$0x1]   ;;  %v112_v10 = vld [vmem:[%s209_s0 + $0x6] sm:$0x1]  }
   0x6   :  { %13 = vrot.lane.b32.xlu0 %v104_v2, %s135_s16  ;;  %25 = vrot.lane.b32.xlu1 %v106_v3, %s136_s17  ;;  %s141_s7 = smov 28   ;;  %s142_s8 = smov 24   ;;  %v113_v11 = vld [vmem:[%s209_s0 + $0x5] sm:$0x1]   ;;  %v114_v12 = vld [vmem:[%s209_s0 + $0x4] sm:$0x1]  }
   0x7   :  { %s143_s13 = smov 20   ;;  %s144_s14 = smov 16   ;;  %v115_v13 = vld [vmem:[%s209_s0 + $0x3] sm:$0x1]   ;;  %v116_v14 = vld [vmem:[%s209_s0 + $0x2] sm:$0x1]  }
   0x8   :  { %s145_s19 = smov 12   ;;  %s146_s20 = smov 8   ;;  %v117_v15 = vld [vmem:[%s209_s0 + $0x1] sm:$0x1]   ;;  %vm27_vm4 = vcmask 425344   ;;  %vm33_vm5 = vcmask 392544  }
   0x9   :  { %s147_s0 = smov 4   ;;  %vm39_vm6 = vcmask 359744   ;;  %vm45_vm7 = vcmask 326944   ;;  %vm51_vm8 = vcmask 294144   ;;  %vm57_vm9 = vcmask 261344  }
   0xa   :  { %31 = vrot.lane.b32.xlu0 %v107_v4, %s137_s24  ;;  %37 = vrot.lane.b32.xlu1 %v108_v5, %s138_s25  ;;  %vm63_vm10 = vcmask 228544   ;;  %vm69_vm11 = vcmask 195744   ;;  %vm75_vm12 = vcmask 162944   ;;  %vm81_vm13 = vcmask 130144  }
   0xb   :  { %vm87_vm14 = vcmask 97344   ;;  %vm93_vm15 = vcmask 64544  }
   0xe   :  { %43 = vrot.lane.b32.xlu0 %v109_v7, %s139_s30  ;;  %49 = vrot.lane.b32.xlu1 %v110_v8, %s140_s2 }
  0x12   :  { %55 = vrot.lane.b32.xlu0 %v111_v9, %s141_s7  ;;  %61 = vrot.lane.b32.xlu1 %v112_v10, %s142_s8 }
  0x16   :  { %67 = vrot.lane.b32.xlu0 %v113_v11, %s143_s13  ;;  %73 = vrot.lane.b32.xlu1 %v114_v12, %s144_s14 }
  0x1a   :  { %79 = vrot.lane.b32.xlu0 %v115_v13, %s145_s19  ;;  %85 = vrot.lane.b32.xlu1 %v116_v14, %s146_s20 }
  0x1e   :  { %91 = vrot.lane.b32.xlu0 %v117_v15, %s147_s0 }
  0x74   :  { %v8_v16 = vpop.permute.xlu0 %7   ;;  %v20_v17 = vpop.permute.xlu1 %19  }
  0x75   :  { %10 = vst.msk [vmem:[#allocation0] sm:$0x1] %vm9_vm1, %v8_v16  }
  0x78   :  { %v14_v18 = vpop.permute.xlu0 %13   ;;  %v26_v19 = vpop.permute.xlu1 %25  }
  0x79   :  { %16 = vst.msk [vmem:[#allocation0] sm:$0x1] %vm15_vm2, %v14_v18  }
  0x7a   :  { %22 = vst.msk [vmem:[#allocation0] sm:$0x1] %vm21_vm3, %v20_v17  }
  0x7b   :  { %28 = vst.msk [vmem:[#allocation0] sm:$0x1] %vm27_vm4, %v26_v19  }
  0x7c   :  { %v32_v20 = vpop.permute.xlu0 %31   ;;  %v38_v21 = vpop.permute.xlu1 %37  }
  0x7d   :  { %34 = vst.msk [vmem:[#allocation0] sm:$0x1] %vm33_vm5, %v32_v20  }
  0x7e   :  { %40 = vst.msk [vmem:[#allocation0] sm:$0x1] %vm39_vm6, %v38_v21  }
  0x80   :  { %v44_v22 = vpop.permute.xlu0 %43   ;;  %v50_v23 = vpop.permute.xlu1 %49  }
  0x81   :  { %46 = vst.msk [vmem:[#allocation0] sm:$0x1] %vm45_vm7, %v44_v22  }
  0x82   :  { %52 = vst.msk [vmem:[#allocation0] sm:$0x1] %vm51_vm8, %v50_v23  }
  0x84   :  { %v56_v24 = vpop.permute.xlu0 %55   ;;  %v62_v25 = vpop.permute.xlu1 %61  }
  0x85   :  { %58 = vst.msk [vmem:[#allocation0] sm:$0x1] %vm57_vm9, %v56_v24  }
  0x86   :  { %64 = vst.msk [vmem:[#allocation0] sm:$0x1] %vm63_vm10, %v62_v25  }
  0x88   :  { %v68_v26 = vpop.permute.xlu0 %67   ;;  %v74_v27 = vpop.permute.xlu1 %73  }
  0x89   :  { %70 = vst.msk [vmem:[#allocation0] sm:$0x1] %vm69_vm11, %v68_v26  }
  0x8a   :  { %76 = vst.msk [vmem:[#allocation0] sm:$0x1] %vm75_vm12, %v74_v27  }
  0x8c   :  { %v80_v28 = vpop.permute.xlu0 %79   ;;  %v86_v29 = vpop.permute.xlu1 %85  }
  0x8d   :  { %82 = vst.msk [vmem:[#allocation0] sm:$0x1] %vm81_vm13, %v80_v28  }
  0x8e   :  { %88 = vst.msk [vmem:[#allocation0] sm:$0x1] %vm87_vm14, %v86_v29  }
  0x90   :  { %v92_v30 = vpop.permute.xlu0 %91  }
  0x91   :  { %94 = vst.msk [vmem:[#allocation0] sm:$0x1] %vm93_vm15, %v92_v30  }
  0x98   :  { %v99_v31 = vld [vmem:[#allocation0] sm:$0x1] }
  0x99   :  { %102 = vst [vmem:[%s210_s1] sm:$0x1] %v99_v31 }

// kernel: attention_module_stage1.40
= control target key start
LH: loop header
LB: loop body
LE: loop exit
PB: predicated region body
PF: predicated region fallthrough
CT: control target
= control target key end

     0   :  { %s1108_s21 = smov 0   ;;  %s1418_s0 = inlined_call_operand.vmem [shape: f32[512,16], index: 0, kind: input, shape index: {}]   ;;  %s1419_s1 = inlined_call_operand.vmem [shape: f32[1,16], index: 1, kind: input, shape index: {}]   ;;  %s1420_s2 = inlined_call_operand.vmem [shape: f32[1,16], index: 2, kind: input, shape index: {}]   ;;  %s1421_s3 = inlined_call_operand.vmem [shape: f32[16,4], index: 3, kind: input, shape index: {}]   ;;  %s1422_s4 = inlined_call_operand.vmem [shape: f32[1,4], index: 4, kind: input, shape index: {}]   ;;  %s1423_s5 = inlined_call_operand.vmem [shape: f32[1,4], index: 5, kind: input, shape index: {}]   ;;  %s1424_s6 = inlined_call_operand.vmem [shape: f32[512,4], index: 6, kind: output, shape index: {}]  }
   0x1 LB: > { %s920_s22 = sadd.s32 4294967295, %s1071_s21   ;;  %p924_p0 = scmp.ge.s32.totalorder %s1071_s21, 1  ;;  %s1071_s21 = sphi %s1108_s21, %s16_s21  }
   0x2   : > { %p213_p1 = scmp.lt.s32.totalorder %s1071_s21, 3 }
   0x4   : > { %p214_p2 = pnand %p924_p0, %p213_p1 }
   0x5   : > { %s925_s27 = sshll.u32 (!%p214_p2), %s920_s22, 5 }
   0x6   : > { %217 = sbr.rel (%p214_p2) target bundleno = 253 (0xfd), region = 44  ;;  %p244_p3 = scmp.lt.s32.totalorder (!%p214_p2), %s925_s27, 63 }
   0xb   : > { %v398_v0 = vld [vmem:[%s1421_s3 + $0x8] sm:$0xff]  ;;  %v397_v1 = vld [vmem:[%s1421_s3] sm:$0xff]  ;;  %s1426_s27 = smov (!%p244_p3, %s925_s27), 63  ;;  %vm399_vm0 = vcmask 130048   ;;  %vm831_vm1 = vcmask 31744  }
   0xc   : > { %1001 = vmatprep.subr.mxu0 %v398_v0  ;;  %1053 = vmatprep.subr.mxu1 %v398_v0  ;;  %s926_s28 = sshll.u32 %s1426_s27, 3  ;;  %v1128_v2 = vld [vmem:[%s1419_s1] ss:$0 sm:$0xff] }
   0xd   : > { %1002 = vmatpush3.msra.mxu0 %v398_v0  ;;  %1055 = vmatpush3.msra.mxu1 %v398_v0  ;;  %s1135_s9 = scalar_lea.vmem %s1418_s0, %s926_s28  ;;  %v1140_v3 = vld [vmem:[%s1420_s2] ss:$0 sm:$0xff]  ;;  %s1291_s18 = scalar_lea.vmem %s1424_s6, %s926_s28 }
   0xe   : > { %1003 = vmatprep.subr.mxu0 %v397_v1  ;;  %1054 = vmatprep.subr.mxu1 %v397_v1  ;;  %v255_v4 = vld [vmem:[%s1135_s9] sm:$0xff]  ;;  %v256_v6 = vld [vmem:[%s1135_s9 + $0x8] sm:$0xff]  ;;  %v257_v11 = vld [vmem:[%s1135_s9 + $0x10] sm:$0xff] }
   0xf   : > { %1004 = vmatpush3.msra.mxu0 %v397_v1  ;;  %1056 = vmatpush3.msra.mxu1 %v397_v1  ;;  %v271_v5 = vld [vmem:[%s1135_s9 + $0x80] sm:$0xff]  ;;  %v294_v7 = vmul.f32 %v1128_v2, %v255_v4  ;;  %v295_v9 = vmul.f32 %v1128_v2, %v256_v6  ;;  %v272_v10 = vld [vmem:[%s1135_s9 + $0x88] sm:$0xff]  ;;  %v273_v12 = vld [vmem:[%s1135_s9 + $0x90] sm:$0xff]  ;;  %v296_v14 = vmul.f32 %v1128_v2, %v257_v11 }
  0x10   : > { %v310_v8 = vmul.f32 %v1128_v2, %v271_v5  ;;  %v311_v13 = vmul.f32 %v1128_v2, %v272_v10  ;;  %v312_v15 = vmul.f32 %v1128_v2, %v273_v12  ;;  %v258_v16 = vld [vmem:[%s1135_s9 + $0x18] sm:$0xff]  ;;  %v259_v26 = vld [vmem:[%s1135_s9 + $0x20] sm:$0xff]  ;;  %v260_v28 = vld [vmem:[%s1135_s9 + $0x28] sm:$0xff] }
  0x11   : > { %v274_v17 = vld [vmem:[%s1135_s9 + $0x98] sm:$0xff]  ;;  %v333_v18 = vadd.f32 %v1140_v3, %v294_v7  ;;  %v334_v20 = vadd.f32 %v1140_v3, %v295_v9  ;;  %v297_v21 = vmul.f32 %v1128_v2, %v258_v16  ;;  %v335_v23 = vadd.f32 %v1140_v3, %v296_v14  ;;  %v275_v27 = vld [vmem:[%s1135_s9 + $0xa0] sm:$0xff]  ;;  %v276_v33 = vld [vmem:[%s1135_s9 + $0xa8] sm:$0xff] }
  0x12   : > { %v349_v19 = vadd.f32 %v1140_v3, %v310_v8  ;;  %v350_v22 = vadd.f32 %v1140_v3, %v311_v13  ;;  %v351_v24 = vadd.f32 %v1140_v3, %v312_v15  ;;  %v313_v25 = vmul.f32 %v1128_v2, %v274_v17  ;;  %v261_v34 = vld [vmem:[%s1135_s9 + $0x30] sm:$0xff]  ;;  %v262_v44 = vld [vmem:[%s1135_s9 + $0x38] sm:$0xff]  ;;  %v263_v57 = vld [vmem:[%s1135_s9 + $0x40] sm:$0xff] }
  0x13   : > { %v365_v29 = vmax.f32 %v333_v18, 0.0  ;;  %v366_v31 = vmax.f32 %v334_v20, 0.0  ;;  %v336_v32 = vadd.f32 %v1140_v3, %v297_v21  ;;  %v277_v35 = vld [vmem:[%s1135_s9 + $0xb0] sm:$0xff]  ;;  %v367_v37 = vmax.f32 %v335_v23, 0.0  ;;  %v278_v49 = vld [vmem:[%s1135_s9 + $0xb8] sm:$0xff]  ;;  %v279_v58 = vld [vmem:[%s1135_s9 + $0xc0] sm:$0xff] }
  0x14   : > { %v381_v30 = vmax.f32 %v349_v19, 0.0  ;;  %v382_v36 = vmax.f32 %v350_v22, 0.0  ;;  %v383_v38 = vmax.f32 %v351_v24, 0.0  ;;  %v352_v39 = vadd.f32 %v1140_v3, %v313_v25  ;;  %v264_v62 = vld [vmem:[%s1135_s9 + $0x48] sm:$0xff]  ;;  %v265_v0 = vld [vmem:[%s1135_s9 + $0x50] sm:$0xff]  ;;  %v266_v15 = vld [vmem:[%s1135_s9 + $0x58] sm:$0xff] }
  0x15   : > { %1005 = vmatprep.mubr.msk.f32.mxu0 %vm399_vm0, %v365_v29  ;;  %v368_v40 = vmax.f32 %v336_v32, 0.0  ;;  %v298_v41 = vmul.f32 %v1128_v2, %v259_v26  ;;  %v314_v42 = vmul.f32 %v1128_v2, %v275_v27  ;;  %v299_v43 = vmul.f32 %v1128_v2, %v260_v28  ;;  %v280_v63 = vld [vmem:[%s1135_s9 + $0xc8] sm:$0xff]  ;;  %v281_v7 = vld [vmem:[%s1135_s9 + $0xd0] sm:$0xff]  ;;  %v282_v20 = vld [vmem:[%s1135_s9 + $0xd8] sm:$0xff] }
  0x16   : > { %1029 = vmatprep.mubr.msk.f32.mxu1 %vm399_vm0, %v381_v30  ;;  %1006 = vmatmul.mubr.msk.f32.vlgmr.msra.gmra.mxu0 %vm399_vm0, %v366_v31  ;;  %v384_v45 = vmax.f32 %v352_v39, 0.0  ;;  %v315_v46 = vmul.f32 %v1128_v2, %v276_v33  ;;  %v300_v47 = vmul.f32 %v1128_v2, %v261_v34  ;;  %v316_v48 = vmul.f32 %v1128_v2, %v277_v35  ;;  %v267_v25 = vld [vmem:[%s1135_s9 + $0x60] sm:$0xff]  ;;  %v268_v31 = vld [vmem:[%s1135_s9 + $0x68] sm:$0xff]  ;;  %v269_v35 = vld [vmem:[%s1135_s9 + $0x70] sm:$0xff] }
  0x17   : > { %1030 = vmatmul.mubr.msk.f32.vlgmr.msra.gmra.mxu1 %vm399_vm0, %v382_v36  ;;  %1008 = vmatprep.mubr.msk.f32.mxu0 %vm399_vm0, %v367_v37  ;;  %v337_v50 = vadd.f32 %v1140_v3, %v298_v41  ;;  %v353_v51 = vadd.f32 %v1140_v3, %v314_v42  ;;  %v338_v52 = vadd.f32 %v1140_v3, %v299_v43  ;;  %v283_v26 = vld [vmem:[%s1135_s9 + $0xe0] sm:$0xff]  ;;  %v284_v32 = vld [vmem:[%s1135_s9 + $0xe8] sm:$0xff] }
  0x18   : > { %1032 = vmatprep.mubr.msk.f32.mxu1 %vm399_vm0, %v383_v38  ;;  %v354_v53 = vadd.f32 %v1140_v3, %v315_v46  ;;  %v339_v54 = vadd.f32 %v1140_v3, %v300_v47  ;;  %v355_v55 = vadd.f32 %v1140_v3, %v316_v48  ;;  %v301_v56 = vmul.f32 %v1128_v2, %v262_v44 }
  0x19   : > { %v369_v59 = vmax.f32 %v337_v50, 0.0  ;;  %v385_v60 = vmax.f32 %v353_v51, 0.0  ;;  %v317_v61 = vmul.f32 %v1128_v2, %v278_v49  ;;  %v370_v1 = vmax.f32 %v338_v52, 0.0  ;;  %v270_v49 = vld [vmem:[%s1135_s9 + $0x78] sm:$0xff] }
  0x1a   : > { %1009 = vmatmul.mubr.msk.f32.gmra.mxu0 %vm399_vm0, %v368_v40  ;;  %v386_v4 = vmax.f32 %v354_v53, 0.0  ;;  %v371_v5 = vmax.f32 %v339_v54, 0.0  ;;  %v340_v6 = vadd.f32 %v1140_v3, %v301_v56  ;;  %v387_v8 = vmax.f32 %v355_v55, 0.0  ;;  %v285_v40 = vld [vmem:[%s1135_s9 + $0xf0] sm:$0xff]  ;;  %v286_v50 = vld [vmem:[%s1135_s9 + $0xf8] sm:$0xff] }
  0x1b   : > { %1033 = vmatmul.mubr.msk.f32.gmra.mxu1 %vm399_vm0, %v384_v45  ;;  %1011 = vmatprep.mubr.msk.f32.mxu0 %vm399_vm0, %v369_v59  ;;  %v356_v9 = vadd.f32 %v1140_v3, %v317_v61  ;;  %v302_v10 = vmul.f32 %v1128_v2, %v263_v57  ;;  %v318_v11 = vmul.f32 %v1128_v2, %v279_v58 }
  0x1c   : > { %1035 = vmatprep.mubr.msk.f32.mxu1 %vm399_vm0, %v385_v60  ;;  %v303_v12 = vmul.f32 %v1128_v2, %v264_v62  ;;  %v319_v13 = vmul.f32 %v1128_v2, %v280_v63  ;;  %v304_v14 = vmul.f32 %v1128_v2, %v265_v0  ;;  %v372_v16 = vmax.f32 %v340_v6, 0.0 }
  0x1d   : > { %v341_v17 = vadd.f32 %v1140_v3, %v302_v10  ;;  %v357_v18 = vadd.f32 %v1140_v3, %v318_v11  ;;  %v320_v19 = vmul.f32 %v1128_v2, %v281_v7  ;;  %v388_v21 = vmax.f32 %v356_v9, 0.0 }
  0x1e   : > { %1012 = vmatmul.mubr.msk.f32.gmra.mxu0 %vm399_vm0, %v370_v1  ;;  %v342_v22 = vadd.f32 %v1140_v3, %v303_v12  ;;  %v358_v23 = vadd.f32 %v1140_v3, %v319_v13  ;;  %v343_v24 = vadd.f32 %v1140_v3, %v304_v14  ;;  %v305_v30 = vmul.f32 %v1128_v2, %v266_v15 }
  0x1f   : > { %1036 = vmatmul.mubr.msk.f32.gmra.mxu1 %vm399_vm0, %v386_v4  ;;  %1014 = vmatprep.mubr.msk.f32.mxu0 %vm399_vm0, %v371_v5  ;;  %v373_v27 = vmax.f32 %v341_v17, 0.0  ;;  %v389_v28 = vmax.f32 %v357_v18, 0.0  ;;  %v359_v29 = vadd.f32 %v1140_v3, %v320_v19  ;;  %v321_v34 = vmul.f32 %v1128_v2, %v282_v20 }
  0x20   : > { %1038 = vmatprep.mubr.msk.f32.mxu1 %vm399_vm0, %v387_v8  ;;  %v374_v33 = vmax.f32 %v342_v22, 0.0  ;;  %v390_v36 = vmax.f32 %v358_v23, 0.0  ;;  %v344_v37 = vadd.f32 %v1140_v3, %v305_v30  ;;  %v306_v38 = vmul.f32 %v1128_v2, %v267_v25  ;;  %v1278_v8 = vld [vmem:[%s1423_s5] ss:$0 sm:$0xff] }
  0x21   : > { %v322_v39 = vmul.f32 %v1128_v2, %v283_v26  ;;  %v375_v41 = vmax.f32 %v343_v24, 0.0  ;;  %v360_v42 = vadd.f32 %v1140_v3, %v321_v34  ;;  %v307_v43 = vmul.f32 %v1128_v2, %v268_v31 }
  0x22   : > { %1015 = vmatmul.mubr.msk.f32.gmra.mxu0 %vm399_vm0, %v372_v16  ;;  %v323_v44 = vmul.f32 %v1128_v2, %v284_v32  ;;  %v391_v45 = vmax.f32 %v359_v29, 0.0  ;;  %v345_v46 = vadd.f32 %v1140_v3, %v306_v38  ;;  %v308_v48 = vmul.f32 %v1128_v2, %v269_v35 }
  0x23   : > { %1039 = vmatmul.mubr.msk.f32.gmra.mxu1 %vm399_vm0, %v388_v21  ;;  %1017 = vmatprep.mubr.msk.f32.mxu0 %vm399_vm0, %v373_v27  ;;  %v361_v47 = vadd.f32 %v1140_v3, %v322_v39  ;;  %v324_v51 = vmul.f32 %v1128_v2, %v285_v40  ;;  %v376_v52 = vmax.f32 %v344_v37, 0.0  ;;  %v346_v53 = vadd.f32 %v1140_v3, %v307_v43 }
  0x24   : > { %1041 = vmatprep.mubr.msk.f32.mxu1 %vm399_vm0, %v389_v28  ;;  %v392_v54 = vmax.f32 %v360_v42, 0.0  ;;  %v362_v55 = vadd.f32 %v1140_v3, %v323_v44  ;;  %v309_v56 = vmul.f32 %v1128_v2, %v270_v49  ;;  %v325_v57 = vmul.f32 %v1128_v2, %v286_v50 }
  0x25   : > { %v377_v58 = vmax.f32 %v345_v46, 0.0  ;;  %v393_v59 = vmax.f32 %v361_v47, 0.0  ;;  %v347_v60 = vadd.f32 %v1140_v3, %v308_v48  ;;  %v363_v61 = vadd.f32 %v1140_v3, %v324_v51 }
  0x26   : > { %1018 = vmatmul.mubr.msk.f32.gmra.mxu0 %vm399_vm0, %v374_v33  ;;  %v378_v62 = vmax.f32 %v346_v53, 0.0  ;;  %v394_v63 = vmax.f32 %v362_v55, 0.0  ;;  %v348_v0 = vadd.f32 %v1140_v3, %v309_v56  ;;  %v364_v2 = vadd.f32 %v1140_v3, %v325_v57  ;;  %v1273_v3 = vld [vmem:[%s1422_s4] ss:$0 sm:$0xff] }
  0x27   : > { %1042 = vmatmul.mubr.msk.f32.gmra.mxu1 %vm399_vm0, %v390_v36  ;;  %1020 = vmatprep.mubr.msk.f32.mxu0 %vm399_vm0, %v375_v41  ;;  %v379_v1 = vmax.f32 %v347_v60, 0.0  ;;  %v395_v4 = vmax.f32 %v363_v61, 0.0 }
  0x28   : > { %1044 = vmatprep.mubr.msk.f32.mxu1 %vm399_vm0, %v391_v45  ;;  %v380_v5 = vmax.f32 %v348_v0, 0.0  ;;  %v396_v6 = vmax.f32 %v364_v2, 0.0 }
  0x2a   : > { %1021 = vmatmul.mubr.msk.f32.gmra.mxu0 %vm399_vm0, %v376_v52 }
  0x2b   : > { %1045 = vmatmul.mubr.msk.f32.gmra.mxu1 %vm399_vm0, %v392_v54  ;;  %1023 = vmatprep.mubr.msk.f32.mxu0 %vm399_vm0, %v377_v58 }
  0x2c   : > { %1047 = vmatprep.mubr.msk.f32.mxu1 %vm399_vm0, %v393_v59 }
  0x2e   : > { %1024 = vmatmul.mubr.msk.f32.gmra.mxu0 %vm399_vm0, %v378_v62 }
  0x2f   : > { %1048 = vmatmul.mubr.msk.f32.gmra.mxu1 %vm399_vm0, %v394_v63  ;;  %1026 = vmatprep.mubr.msk.f32.mxu0 %vm399_vm0, %v379_v1 }
  0x30   : > { %1050 = vmatprep.mubr.msk.f32.mxu1 %vm399_vm0, %v395_v4 }
  0x32   : > { %1027 = vmatmul.mubr.msk.f32.gmra.mxu0 %vm399_vm0, %v380_v5 }
  0x33   : > { %1051 = vmatmul.mubr.msk.f32.gmra.mxu1 %vm399_vm0, %v396_v6 }
  0xd6   : > { %v1007_v7 = vpop.f32.mrf.mxu0 }
  0xd7   : > { %v1031_v9 = vpop.f32.mrf.mxu1  ;;  %v729_v10 = vmul.f32 %v1007_v7, %v1273_v3 }
  0xd8   : > { %v745_v11 = vmul.f32 %v1031_v9, %v1273_v3  ;;  %v562_v12 = vpop.f32.mrf.mxu0 }
  0xd9   : > { %v642_v13 = vpop.f32.mrf.mxu1  ;;  %v768_v14 = vadd.f32 %v1278_v8, %v729_v10  ;;  %v728_v16 = vmul.f32 %v1273_v3, %v562_v12 }
  0xda   : > { %v784_v15 = vadd.f32 %v1278_v8, %v745_v11  ;;  %v744_v17 = vmul.f32 %v1273_v3, %v642_v13  ;;  %v1010_v18 = vpop.f32.mrf.mxu0 }
  0xdb   : > { %v1034_v19 = vpop.f32.mrf.mxu1  ;;  %v800_v20 = vmax.f32 %v768_v14, 0.0  ;;  %v767_v22 = vadd.f32 %v1278_v8, %v728_v16  ;;  %v731_v24 = vmul.f32 %v1010_v18, %v1273_v3 }
  0xdc   : > { %v816_v21 = vmax.f32 %v784_v15, 0.0  ;;  %v783_v23 = vadd.f32 %v1278_v8, %v744_v17  ;;  %v747_v25 = vmul.f32 %v1034_v19, %v1273_v3  ;;  %v572_v26 = vpop.f32.mrf.mxu0 }
  0xdd   : > { %v652_v27 = vpop.f32.mrf.mxu1  ;;  %833 = vst.msk [vmem:[%s1291_s18 + $0x8] sm:$0xff] %vm831_vm1, %v800_v20  ;;  %v799_v28 = vmax.f32 %v767_v22, 0.0  ;;  %v730_v30 = vmul.f32 %v1273_v3, %v572_v26  ;;  %v770_v32 = vadd.f32 %v1278_v8, %v731_v24 }
  0xde   : > { %849 = vst.msk [vmem:[%s1291_s18 + $0x88] sm:$0xff] %vm831_vm1, %v816_v21  ;;  %v815_v29 = vmax.f32 %v783_v23, 0.0  ;;  %v746_v31 = vmul.f32 %v1273_v3, %v652_v27  ;;  %v786_v33 = vadd.f32 %v1278_v8, %v747_v25  ;;  %v1013_v34 = vpop.f32.mrf.mxu0 }
  0xdf   : > { %v1037_v35 = vpop.f32.mrf.mxu1  ;;  %832 = vst.msk [vmem:[%s1291_s18] sm:$0xff] %vm831_vm1, %v799_v28  ;;  %v769_v36 = vadd.f32 %v1278_v8, %v730_v30  ;;  %v733_v38 = vmul.f32 %v1013_v34, %v1273_v3  ;;  %v802_v40 = vmax.f32 %v770_v32, 0.0 }
  0xe0   : > { %848 = vst.msk [vmem:[%s1291_s18 + $0x80] sm:$0xff] %vm831_vm1, %v815_v29  ;;  %v785_v37 = vadd.f32 %v1278_v8, %v746_v31  ;;  %v749_v39 = vmul.f32 %v1037_v35, %v1273_v3  ;;  %v818_v41 = vmax.f32 %v786_v33, 0.0  ;;  %v582_v42 = vpop.f32.mrf.mxu0 }
  0xe1   : > { %v662_v43 = vpop.f32.mrf.mxu1  ;;  %v801_v44 = vmax.f32 %v769_v36, 0.0  ;;  %v772_v46 = vadd.f32 %v1278_v8, %v733_v38  ;;  %835 = vst.msk [vmem:[%s1291_s18 + $0x18] sm:$0xff] %vm831_vm1, %v802_v40  ;;  %v732_v48 = vmul.f32 %v1273_v3, %v582_v42 }
  0xe2   : > { %v817_v45 = vmax.f32 %v785_v37, 0.0  ;;  %v788_v47 = vadd.f32 %v1278_v8, %v749_v39  ;;  %851 = vst.msk [vmem:[%s1291_s18 + $0x98] sm:$0xff] %vm831_vm1, %v818_v41  ;;  %v748_v49 = vmul.f32 %v1273_v3, %v662_v43  ;;  %v1016_v50 = vpop.f32.mrf.mxu0 }
  0xe3   : > { %v1040_v51 = vpop.f32.mrf.mxu1  ;;  %834 = vst.msk [vmem:[%s1291_s18 + $0x10] sm:$0xff] %vm831_vm1, %v801_v44  ;;  %v804_v52 = vmax.f32 %v772_v46, 0.0  ;;  %v735_v54 = vmul.f32 %v1016_v50, %v1273_v3  ;;  %v771_v56 = vadd.f32 %v1278_v8, %v732_v48 }
  0xe4   : > { %850 = vst.msk [vmem:[%s1291_s18 + $0x90] sm:$0xff] %vm831_vm1, %v817_v45  ;;  %v820_v53 = vmax.f32 %v788_v47, 0.0  ;;  %v751_v55 = vmul.f32 %v1040_v51, %v1273_v3  ;;  %v787_v57 = vadd.f32 %v1278_v8, %v748_v49  ;;  %v592_v58 = vpop.f32.mrf.mxu0 }
  0xe5   : > { %v672_v59 = vpop.f32.mrf.mxu1  ;;  %837 = vst.msk [vmem:[%s1291_s18 + $0x28] sm:$0xff] %vm831_vm1, %v804_v52  ;;  %v774_v60 = vadd.f32 %v1278_v8, %v735_v54  ;;  %v734_v62 = vmul.f32 %v1273_v3, %v592_v58  ;;  %v803_v0 = vmax.f32 %v771_v56, 0.0 }
  0xe6   : > { %853 = vst.msk [vmem:[%s1291_s18 + $0xa8] sm:$0xff] %vm831_vm1, %v820_v53  ;;  %v790_v61 = vadd.f32 %v1278_v8, %v751_v55  ;;  %v750_v63 = vmul.f32 %v1273_v3, %v672_v59  ;;  %v819_v2 = vmax.f32 %v787_v57, 0.0  ;;  %v1019_v1 = vpop.f32.mrf.mxu0 }
  0xe7   : > { %v1043_v4 = vpop.f32.mrf.mxu1  ;;  %v806_v5 = vmax.f32 %v774_v60, 0.0  ;;  %v773_v7 = vadd.f32 %v1278_v8, %v734_v62  ;;  %836 = vst.msk [vmem:[%s1291_s18 + $0x20] sm:$0xff] %vm831_vm1, %v803_v0  ;;  %v737_v10 = vmul.f32 %v1019_v1, %v1273_v3 }
  0xe8   : > { %v822_v6 = vmax.f32 %v790_v61, 0.0  ;;  %v789_v9 = vadd.f32 %v1278_v8, %v750_v63  ;;  %852 = vst.msk [vmem:[%s1291_s18 + $0xa0] sm:$0xff] %vm831_vm1, %v819_v2  ;;  %v753_v11 = vmul.f32 %v1043_v4, %v1273_v3  ;;  %v602_v12 = vpop.f32.mrf.mxu0 }
  0xe9   : > { %v682_v13 = vpop.f32.mrf.mxu1  ;;  %839 = vst.msk [vmem:[%s1291_s18 + $0x38] sm:$0xff] %vm831_vm1, %v806_v5  ;;  %v805_v14 = vmax.f32 %v773_v7, 0.0  ;;  %v736_v16 = vmul.f32 %v1273_v3, %v602_v12  ;;  %v776_v18 = vadd.f32 %v1278_v8, %v737_v10 }
  0xea   : > { %855 = vst.msk [vmem:[%s1291_s18 + $0xb8] sm:$0xff] %vm831_vm1, %v822_v6  ;;  %v821_v15 = vmax.f32 %v789_v9, 0.0  ;;  %v752_v17 = vmul.f32 %v1273_v3, %v682_v13  ;;  %v792_v19 = vadd.f32 %v1278_v8, %v753_v11  ;;  %v1022_v20 = vpop.f32.mrf.mxu0 }
  0xeb   : > { %v1046_v21 = vpop.f32.mrf.mxu1  ;;  %838 = vst.msk [vmem:[%s1291_s18 + $0x30] sm:$0xff] %vm831_vm1, %v805_v14  ;;  %v775_v22 = vadd.f32 %v1278_v8, %v736_v16  ;;  %v739_v24 = vmul.f32 %v1022_v20, %v1273_v3  ;;  %v808_v26 = vmax.f32 %v776_v18, 0.0 }
  0xec   : > { %854 = vst.msk [vmem:[%s1291_s18 + $0xb0] sm:$0xff] %vm831_vm1, %v821_v15  ;;  %v791_v23 = vadd.f32 %v1278_v8, %v752_v17  ;;  %v755_v25 = vmul.f32 %v1046_v21, %v1273_v3  ;;  %v824_v27 = vmax.f32 %v792_v19, 0.0  ;;  %v612_v28 = vpop.f32.mrf.mxu0 }
  0xed   : > { %v692_v29 = vpop.f32.mrf.mxu1  ;;  %v807_v30 = vmax.f32 %v775_v22, 0.0  ;;  %v778_v32 = vadd.f32 %v1278_v8, %v739_v24  ;;  %841 = vst.msk [vmem:[%s1291_s18 + $0x48] sm:$0xff] %vm831_vm1, %v808_v26  ;;  %v738_v34 = vmul.f32 %v1273_v3, %v612_v28 }
  0xee   : > { %v823_v31 = vmax.f32 %v791_v23, 0.0  ;;  %v794_v33 = vadd.f32 %v1278_v8, %v755_v25  ;;  %857 = vst.msk [vmem:[%s1291_s18 + $0xc8] sm:$0xff] %vm831_vm1, %v824_v27  ;;  %v754_v35 = vmul.f32 %v1273_v3, %v692_v29  ;;  %v1025_v36 = vpop.f32.mrf.mxu0 }
  0xef   : > { %v1049_v37 = vpop.f32.mrf.mxu1  ;;  %840 = vst.msk [vmem:[%s1291_s18 + $0x40] sm:$0xff] %vm831_vm1, %v807_v30  ;;  %v810_v38 = vmax.f32 %v778_v32, 0.0  ;;  %v741_v40 = vmul.f32 %v1025_v36, %v1273_v3  ;;  %v777_v42 = vadd.f32 %v1278_v8, %v738_v34 }
  0xf0   : > { %856 = vst.msk [vmem:[%s1291_s18 + $0xc0] sm:$0xff] %vm831_vm1, %v823_v31  ;;  %v826_v39 = vmax.f32 %v794_v33, 0.0  ;;  %v757_v41 = vmul.f32 %v1049_v37, %v1273_v3  ;;  %v793_v43 = vadd.f32 %v1278_v8, %v754_v35  ;;  %v622_v44 = vpop.f32.mrf.mxu0 }
  0xf1   : > { %v702_v45 = vpop.f32.mrf.mxu1  ;;  %843 = vst.msk [vmem:[%s1291_s18 + $0x58] sm:$0xff] %vm831_vm1, %v810_v38  ;;  %v780_v46 = vadd.f32 %v1278_v8, %v741_v40  ;;  %v740_v48 = vmul.f32 %v1273_v3, %v622_v44  ;;  %v809_v50 = vmax.f32 %v777_v42, 0.0 }
  0xf2   : > { %859 = vst.msk [vmem:[%s1291_s18 + $0xd8] sm:$0xff] %vm831_vm1, %v826_v39  ;;  %v796_v47 = vadd.f32 %v1278_v8, %v757_v41  ;;  %v756_v49 = vmul.f32 %v1273_v3, %v702_v45  ;;  %v825_v51 = vmax.f32 %v793_v43, 0.0  ;;  %v1028_v52 = vpop.f32.mrf.mxu0 }
  0xf3   : > { %v1052_v53 = vpop.f32.mrf.mxu1  ;;  %v812_v54 = vmax.f32 %v780_v46, 0.0  ;;  %v779_v56 = vadd.f32 %v1278_v8, %v740_v48  ;;  %842 = vst.msk [vmem:[%s1291_s18 + $0x50] sm:$0xff] %vm831_vm1, %v809_v50  ;;  %v743_v58 = vmul.f32 %v1028_v52, %v1273_v3 }
  0xf4   : > { %v828_v55 = vmax.f32 %v796_v47, 0.0  ;;  %v795_v57 = vadd.f32 %v1278_v8, %v756_v49  ;;  %858 = vst.msk [vmem:[%s1291_s18 + $0xd0] sm:$0xff] %vm831_vm1, %v825_v51  ;;  %v759_v59 = vmul.f32 %v1052_v53, %v1273_v3  ;;  %v632_v60 = vpop.f32.mrf.mxu0 }
  0xf5   : > { %v712_v61 = vpop.f32.mrf.mxu1  ;;  %845 = vst.msk [vmem:[%s1291_s18 + $0x68] sm:$0xff] %vm831_vm1, %v812_v54  ;;  %v811_v62 = vmax.f32 %v779_v56, 0.0  ;;  %v742_v0 = vmul.f32 %v1273_v3, %v632_v60  ;;  %v782_v1 = vadd.f32 %v1278_v8, %v743_v58 }
  0xf6   : > { %861 = vst.msk [vmem:[%s1291_s18 + $0xe8] sm:$0xff] %vm831_vm1, %v828_v55  ;;  %v827_v63 = vmax.f32 %v795_v57, 0.0  ;;  %v758_v2 = vmul.f32 %v1273_v3, %v712_v61  ;;  %v798_v4 = vadd.f32 %v1278_v8, %v759_v59 }
  0xf7   : > { %844 = vst.msk [vmem:[%s1291_s18 + $0x60] sm:$0xff] %vm831_vm1, %v811_v62  ;;  %v781_v5 = vadd.f32 %v1278_v8, %v742_v0  ;;  %v814_v7 = vmax.f32 %v782_v1, 0.0 }
  0xf8   : > { %860 = vst.msk [vmem:[%s1291_s18 + $0xe0] sm:$0xff] %vm831_vm1, %v827_v63  ;;  %v797_v6 = vadd.f32 %v1278_v8, %v758_v2  ;;  %v830_v9 = vmax.f32 %v798_v4, 0.0 }
  0xf9   : > { %v813_v10 = vmax.f32 %v781_v5, 0.0  ;;  %847 = vst.msk [vmem:[%s1291_s18 + $0x78] sm:$0xff] %vm831_vm1, %v814_v7 }
  0xfa   : > { %v829_v11 = vmax.f32 %v797_v6, 0.0  ;;  %863 = vst.msk [vmem:[%s1291_s18 + $0xf8] sm:$0xff] %vm831_vm1, %v830_v9 }
  0xfb   : > { %846 = vst.msk [vmem:[%s1291_s18 + $0x70] sm:$0xff] %vm831_vm1, %v813_v10 }
  0xfc   : > { %862 = vst.msk [vmem:[%s1291_s18 + $0xf0] sm:$0xff] %vm831_vm1, %v829_v11 }
  0xfd PF: > { %s16_s21 = sadd.s32 1, %s1071_s21  }
  0xfe   : > { %p13_p4 = scmp.ge.s32.totalorder %s16_s21, 4  }
 0x100   :  { %15 = sbr.rel (!%p13_p4) target bundleno = 1 (0x1), region = 74 }

// kernel: attention_module_stage1.41
= control target key start
LH: loop header
LB: loop body
LE: loop exit
PB: predicated region body
PF: predicated region fallthrough
CT: control target
= control target key end

     0   :  { %s732_s15 = smov 0   ;;  %s860_s0 = inlined_call_operand.vmem [shape: f32[2,18,72], index: 0, kind: input, shape index: {}]   ;;  %s861_s1 = inlined_call_operand.vmem [shape: f32[3,72,64], index: 1, kind: input, shape index: {}]   ;;  %s862_s2 = inlined_call_operand.vmem [shape: f32[1,64], index: 2, kind: input, shape index: {}]   ;;  %s863_s3 = inlined_call_operand.vmem [shape: f32[1,64], index: 3, kind: input, shape index: {}]   ;;  %s864_s4 = inlined_call_operand.vmem [shape: f32[2,16,64], index: 4, kind: output, shape index: {}]  }
   0x1 LB: > { %s557_s16 = sadd.s32 4294967295, %s705_s15   ;;  %p561_p0 = scmp.ge.s32.totalorder %s705_s15, 1  ;;  %s705_s15 = sphi %s732_s15, %s14_s15  }
   0x2   : > { %p162_p1 = scmp.lt.s32.totalorder %s705_s15, 3 }
   0x4   : > { %p163_p2 = pnand %p561_p0, %p162_p1 }
   0x5   : > { %p749_p3 = scmp.lt.s32.totalorder (!%p163_p2), %s557_s16, 1 }
   0x6   : > { %166 = sbr.rel (%p163_p2) target bundleno = 254 (0xfe), region = 36 }
   0xb   : > { %v573_v0 = vld [vmem:[%s861_s1 + $0x88] sm:$0xff]  ;;  %v208_v1 = vld [vmem:[%s861_s1 + $0x40] sm:$0xff]  ;;  %v207_v3 = vld [vmem:[%s861_s1 + $0x38] sm:$0xff]  ;;  %s867_s16 = smov (!%p749_p3, %s557_s16), 1  ;;  %vm221_vm0 = vcmask 588800   ;;  %vm499_vm1 = vcmask 523264  }
   0xc   : > { %v572_v2 = vld [vmem:[%s861_s1 + $0x80] sm:$0xff]  ;;  %627 = vmatprep.subr.mxu0 %v573_v0  ;;  %648 = vmatprep.subr.mxu1 %v208_v1  ;;  %v571_v4 = vld [vmem:[%s861_s1 + $0x78] sm:$0xff]  ;;  %v206_v5 = vld [vmem:[%s861_s1 + $0x30] sm:$0xff]  ;;  %s690_s18 = smul.u32 24, %s867_s16 }
   0xd   : > { %628 = vmatpush3.msra.mxu0 %v573_v0  ;;  %649 = vmatpush3.msra.mxu1 %v208_v1  ;;  %v570_v6 = vld [vmem:[%s861_s1 + $0x70] sm:$0xff]  ;;  %v205_v7 = vld [vmem:[%s861_s1 + $0x28] sm:$0xff]  ;;  %v204_v9 = vld [vmem:[%s861_s1 + $0x20] sm:$0xff] }
   0xe   : > { %629 = vmatprep.subr.mxu0 %v572_v2  ;;  %650 = vmatprep.subr.mxu1 %v207_v3  ;;  %v569_v8 = vld [vmem:[%s861_s1 + $0x68] sm:$0xff]  ;;  %v568_v10 = vld [vmem:[%s861_s1 + $0x60] sm:$0xff]  ;;  %v203_v11 = vld [vmem:[%s861_s1 + $0x18] sm:$0xff]  ;;  %s800_s29 = scalar_lea.vmem %s860_s0, %s690_s18 }
   0xf   : > { %630 = vmatpush3.msra.mxu0 %v572_v2  ;;  %651 = vmatpush3.msra.mxu1 %v207_v3  ;;  %v567_v12 = vld [vmem:[%s861_s1 + $0x58] sm:$0xff]  ;;  %v202_v13 = vld [vmem:[%s861_s1 + $0x10] sm:$0xff]  ;;  %v201_v15 = vld [vmem:[%s861_s1 + $0x8] sm:$0xff] }
  0x10   : > { %631 = vmatprep.subr.mxu0 %v571_v4  ;;  %652 = vmatprep.subr.mxu1 %v206_v5  ;;  %v566_v14 = vld [vmem:[%s861_s1 + $0x50] sm:$0xff]  ;;  %v565_v16 = vld [vmem:[%s861_s1 + $0x48] sm:$0xff]  ;;  %v200_v17 = vld [vmem:[%s861_s1] sm:$0xff] }
  0x11   : > { %632 = vmatpush3.msra.mxu0 %v571_v4  ;;  %653 = vmatpush3.msra.mxu1 %v206_v5  ;;  %v209_v18 = vld [vmem:[%s800_s29 + $0x1] sm:$0xff]  ;;  %v210_v20 = vld [vmem:[%s800_s29 + $0x9] sm:$0xff]  ;;  %v583_v26 = vld [vmem:[%s861_s1 + $0xb8] sm:$0xff] }
  0x12   : > { %633 = vmatprep.subr.mxu0 %v570_v6  ;;  %654 = vmatprep.subr.mxu1 %v205_v7  ;;  %v198_v19 = vld [vmem:[%s800_s29] sm:$0xff]  ;;  %v199_v21 = vld [vmem:[%s800_s29 + $0x8] sm:$0xff]  ;;  %v586_v22 = vld [vmem:[%s861_s1 + $0xd0] sm:$0xff] }
  0x13   : > { %634 = vmatpush3.msra.mxu0 %v570_v6  ;;  %655 = vmatpush3.msra.mxu1 %v205_v7  ;;  %v384_v23 = vld [vmem:[%s800_s29 + $0x2] sm:$0xff]  ;;  %v582_v27 = vld [vmem:[%s861_s1 + $0xb0] sm:$0xff]  ;;  %v579_v30 = vld [vmem:[%s861_s1 + $0x98] sm:$0xff] }
  0x14   : > { %635 = vmatprep.subr.mxu0 %v569_v8  ;;  %656 = vmatprep.subr.mxu1 %v204_v9  ;;  %v585_v24 = vld [vmem:[%s861_s1 + $0xc8] sm:$0xff]  ;;  %v584_v25 = vld [vmem:[%s861_s1 + $0xc0] sm:$0xff]  ;;  %v578_v31 = vld [vmem:[%s861_s1 + $0x90] sm:$0xff] }
  0x15   : > { %636 = vmatpush3.msra.mxu0 %v569_v8  ;;  %657 = vmatpush3.msra.mxu1 %v204_v9  ;;  %v581_v28 = vld [vmem:[%s861_s1 + $0xa8] sm:$0xff]  ;;  %v580_v29 = vld [vmem:[%s861_s1 + $0xa0] sm:$0xff] }
  0x16   : > { %637 = vmatprep.subr.mxu0 %v568_v10  ;;  %658 = vmatprep.subr.mxu1 %v203_v11  ;;  %v385_v32 = vld [vmem:[%s800_s29 + $0xa] sm:$0xff]  ;;  %v589_v39 = vld [vmem:[%s862_s2] ss:$0 sm:$0xff]  ;;  %s593_s29 = sshll.u32 %s867_s16, 4 }
  0x17   : > { %638 = vmatpush3.msra.mxu0 %v568_v10  ;;  %659 = vmatpush3.msra.mxu1 %v203_v11  ;;  %v590_v42 = vld [vmem:[%s863_s3] ss:$0 sm:$0xff]  ;;  %s197_s9 = scalar_lea.vmem %s864_s4, %s593_s29 }
  0x18   : > { %639 = vmatprep.subr.mxu0 %v567_v12  ;;  %660 = vmatprep.subr.mxu1 %v202_v13 }
  0x19   : > { %640 = vmatpush3.msra.mxu0 %v567_v12  ;;  %661 = vmatpush3.msra.mxu1 %v202_v13 }
  0x1a   : > { %641 = vmatprep.subr.mxu0 %v566_v14  ;;  %662 = vmatprep.subr.mxu1 %v201_v15 }
  0x1b   : > { %642 = vmatpush3.msra.mxu0 %v566_v14  ;;  %663 = vmatpush3.msra.mxu1 %v201_v15 }
  0x1c   : > { %643 = vmatprep.subr.mxu0 %v565_v16  ;;  %664 = vmatprep.subr.mxu1 %v200_v17 }
  0x1d   : > { %644 = vmatpush3.msra.mxu0 %v565_v16  ;;  %645 = vmatprep.mubr.msk.f32.mxu0 %vm221_vm0, %v209_v18 }
  0x1e   : > { %665 = vmatpush3.msra.mxu1 %v200_v17  ;;  %666 = vmatprep.mubr.msk.f32.mxu1 %vm221_vm0, %v198_v19 }
  0x1f   : > { %646 = vmatmul.mubr.msk.f32.vlgmr.msra.gmra.mxu0 %vm221_vm0, %v210_v20  ;;  %667 = vmatmul.mubr.msk.f32.vlgmr.msra.gmra.mxu1 %vm221_vm0, %v199_v21 }
  0x20   : > { %669 = vmatprep.subr.mxu0 %v586_v22  ;;  %687 = vmatprep.mubr.msk.f32.mxu0 %vm221_vm0, %v384_v23 }
  0x21   : > { %670 = vmatpush3.msra.mxu0 %v586_v22 }
  0x22   : > { %671 = vmatprep.subr.mxu0 %v585_v24 }
  0x23   : > { %672 = vmatpush3.msra.mxu0 %v585_v24 }
  0x24   : > { %673 = vmatprep.subr.mxu0 %v584_v25 }
  0x25   : > { %674 = vmatpush3.msra.mxu0 %v584_v25 }
  0x26   : > { %675 = vmatprep.subr.mxu0 %v583_v26 }
  0x27   : > { %676 = vmatpush3.msra.mxu0 %v583_v26 }
  0x28   : > { %677 = vmatprep.subr.mxu0 %v582_v27 }
  0x29   : > { %678 = vmatpush3.msra.mxu0 %v582_v27 }
  0x2a   : > { %679 = vmatprep.subr.mxu0 %v581_v28 }
  0x2b   : > { %680 = vmatpush3.msra.mxu0 %v581_v28 }
  0x2c   : > { %681 = vmatprep.subr.mxu0 %v580_v29 }
  0x2d   : > { %682 = vmatpush3.msra.mxu0 %v580_v29 }
  0x2e   : > { %683 = vmatprep.subr.mxu0 %v579_v30 }
  0x2f   : > { %684 = vmatpush3.msra.mxu0 %v579_v30 }
  0x30   : > { %685 = vmatprep.subr.mxu0 %v578_v31 }
  0x31   : > { %686 = vmatpush3.msra.mxu0 %v578_v31 }
  0x32   : > { %688 = vmatmul.mubr.msk.f32.vlgmr.msra.gmra.mxu0 %vm221_vm0, %v385_v32 }
  0xdf   : > { %v647_v33 = vpop.f32.mrf.mxu0  ;;  %v668_v34 = vpop.f32.mrf.mxu1 }
  0xe0   : > { %v381_v37 = vadd.f32 %v668_v34, %v647_v33 }
  0xe1   : > { %v294_v35 = vpop.f32.mrf.mxu0  ;;  %v375_v36 = vpop.f32.mrf.mxu1 }
  0xe2   : > { %v376_v40 = vadd.f32 %v375_v36, %v294_v35 }
  0xf2   : > { %v689_v38 = vpop.f32.mrf.mxu0 }
  0xf3   : > { %v478_v41 = vadd.f32 %v689_v38, %v381_v37 }
  0xf4   : > { %v468_v43 = vpop.f32.mrf.mxu0 }
  0xf5   : > { %v487_v44 = vmul.f32 %v589_v39, %v478_v41  ;;  %v477_v45 = vadd.f32 %v468_v43, %v376_v40 }
  0xf7   : > { %v496_v46 = vadd.f32 %v590_v42, %v487_v44  ;;  %v486_v47 = vmul.f32 %v589_v39, %v477_v45 }
  0xf9   : > { %v498_v48 = vmax.f32 %v496_v46, 0.0  ;;  %v495_v49 = vadd.f32 %v590_v42, %v486_v47 }
  0xfb   : > { %501 = vst.msk [vmem:[%s197_s9 + $0x8] sm:$0xff] %vm499_vm1, %v498_v48  ;;  %v497_v50 = vmax.f32 %v495_v49, 0.0 }
  0xfd   : > { %500 = vst.msk [vmem:[%s197_s9] sm:$0xff] %vm499_vm1, %v497_v50 }
  0xfe PF: > { %s14_s15 = sadd.s32 1, %s705_s15  }
  0xff   : > { %p11_p4 = scmp.ge.s32.totalorder %s14_s15, 4  }
 0x101   :  { %13 = sbr.rel (!%p11_p4) target bundleno = 1 (0x1), region = 68 }

// kernel: attention_module_stage1.42
= control target key start
LH: loop header
LB: loop body
LE: loop exit
PB: predicated region body
PF: predicated region fallthrough
CT: control target
= control target key end

     0   :  { %s855_s12 = smov 0   ;;  %s1049_s0 = inlined_call_operand.vmem [shape: f32[512,4], index: 0, kind: input, shape index: {}]   ;;  %s1050_s1 = inlined_call_operand.vmem [shape: f32[512,16], index: 1, kind: input, shape index: {}]   ;;  %s1051_s2 = inlined_call_operand.vmem [shape: f32[4,16], index: 2, kind: input, shape index: {}]   ;;  %s1052_s3 = inlined_call_operand.vmem [shape: f32[512,16], index: 3, kind: output, shape index: {}]  }
   0x1 LB: > { %s688_s13 = sadd.s32 4294967295, %s833_s12   ;;  %p692_p0 = scmp.ge.s32.totalorder %s833_s12, 1  ;;  %s833_s12 = sphi %s855_s12, %s13_s12  }
   0x2   : > { %p149_p1 = scmp.lt.s32.totalorder %s833_s12, 3 }
   0x4   : > { %p150_p2 = pnand %p692_p0, %p149_p1 }
   0x5   : > { %s693_s16 = sshll.u32 (!%p150_p2), %s688_s13, 5 }
   0x6   : > { %153 = sbr.rel (%p150_p2) target bundleno = 243 (0xf3), region = 32  ;;  %p179_p3 = scmp.lt.s32.totalorder (!%p150_p2), %s693_s16, 63 }
   0xb   : > { %v228_v0 = vld [vmem:[%s1051_s2] sm:$0xf]  ;;  %vm358_vm0 = vcmask 1043456   ;;  %s1054_s16 = smov (!%p179_p3, %s693_s16), 63  ;;  %vm261_vm1 = vcmask 31744   ;;  %vm587_vm2 = vcmask 130048  }
   0xc   : > { %767 = vmatprep.subr.msk.mxu0 %vm358_vm0, %v228_v0  ;;  %817 = vmatprep.subr.msk.mxu1 %vm358_vm0, %v228_v0  ;;  %s866_s17 = sshll.u32 %s1054_s16, 3 }
   0xd   : > { %768 = vmatpush3.msk.msra.mxu0 %vm358_vm0, %v228_v0  ;;  %818 = vmatpush3.msk.msra.mxu1 %vm358_vm0, %v228_v0  ;;  %s872_s20 = scalar_lea.vmem %s1049_s0, %s866_s17  ;;  %s942_s23 = scalar_lea.vmem %s1050_s1, %s866_s17 }
   0xe   : > { %v196_v1 = vld [vmem:[%s872_s20] sm:$0xff]  ;;  %v197_v3 = vld [vmem:[%s872_s20 + $0x8] sm:$0xff]  ;;  %v198_v5 = vld [vmem:[%s872_s20 + $0x10] sm:$0xff]  ;;  %s950_s26 = scalar_lea.vmem %s1052_s3, %s866_s17 }
   0xf   : > { %v212_v2 = vld [vmem:[%s872_s20 + $0x80] sm:$0xff]  ;;  %769 = vmatprep.mubr.msk.f32.mxu0 %vm261_vm1, %v196_v1  ;;  %v213_v4 = vld [vmem:[%s872_s20 + $0x88] sm:$0xff]  ;;  %v214_v6 = vld [vmem:[%s872_s20 + $0x90] sm:$0xff] }
  0x10   : > { %793 = vmatprep.mubr.msk.f32.mxu1 %vm261_vm1, %v212_v2  ;;  %770 = vmatmul.mubr.msk.f32.vlgmr.msra.gmra.mxu0 %vm261_vm1, %v197_v3  ;;  %v199_v7 = vld [vmem:[%s872_s20 + $0x18] sm:$0xff]  ;;  %v200_v9 = vld [vmem:[%s872_s20 + $0x20] sm:$0xff]  ;;  %v201_v11 = vld [vmem:[%s872_s20 + $0x28] sm:$0xff] }
  0x11   : > { %794 = vmatmul.mubr.msk.f32.vlgmr.msra.gmra.mxu1 %vm261_vm1, %v213_v4  ;;  %772 = vmatprep.mubr.msk.f32.mxu0 %vm261_vm1, %v198_v5  ;;  %v215_v8 = vld [vmem:[%s872_s20 + $0x98] sm:$0xff]  ;;  %v216_v10 = vld [vmem:[%s872_s20 + $0xa0] sm:$0xff]  ;;  %v217_v12 = vld [vmem:[%s872_s20 + $0xa8] sm:$0xff] }
  0x12   : > { %796 = vmatprep.mubr.msk.f32.mxu1 %vm261_vm1, %v214_v6  ;;  %v202_v13 = vld [vmem:[%s872_s20 + $0x30] sm:$0xff]  ;;  %v203_v15 = vld [vmem:[%s872_s20 + $0x38] sm:$0xff]  ;;  %v204_v17 = vld [vmem:[%s872_s20 + $0x40] sm:$0xff] }
  0x13   : > { %v218_v14 = vld [vmem:[%s872_s20 + $0xb0] sm:$0xff]  ;;  %v219_v16 = vld [vmem:[%s872_s20 + $0xb8] sm:$0xff]  ;;  %v220_v18 = vld [vmem:[%s872_s20 + $0xc0] sm:$0xff] }
  0x14   : > { %773 = vmatmul.mubr.msk.f32.gmra.mxu0 %vm261_vm1, %v199_v7  ;;  %v205_v19 = vld [vmem:[%s872_s20 + $0x48] sm:$0xff]  ;;  %v206_v21 = vld [vmem:[%s872_s20 + $0x50] sm:$0xff]  ;;  %v207_v23 = vld [vmem:[%s872_s20 + $0x58] sm:$0xff] }
  0x15   : > { %797 = vmatmul.mubr.msk.f32.gmra.mxu1 %vm261_vm1, %v215_v8  ;;  %775 = vmatprep.mubr.msk.f32.mxu0 %vm261_vm1, %v200_v9  ;;  %v221_v20 = vld [vmem:[%s872_s20 + $0xc8] sm:$0xff]  ;;  %v222_v22 = vld [vmem:[%s872_s20 + $0xd0] sm:$0xff]  ;;  %v223_v24 = vld [vmem:[%s872_s20 + $0xd8] sm:$0xff] }
  0x16   : > { %799 = vmatprep.mubr.msk.f32.mxu1 %vm261_vm1, %v216_v10  ;;  %v208_v25 = vld [vmem:[%s872_s20 + $0x60] sm:$0xff]  ;;  %v209_v27 = vld [vmem:[%s872_s20 + $0x68] sm:$0xff]  ;;  %v210_v29 = vld [vmem:[%s872_s20 + $0x70] sm:$0xff] }
  0x17   : > { %v224_v26 = vld [vmem:[%s872_s20 + $0xe0] sm:$0xff]  ;;  %v225_v28 = vld [vmem:[%s872_s20 + $0xe8] sm:$0xff]  ;;  %v226_v30 = vld [vmem:[%s872_s20 + $0xf0] sm:$0xff] }
  0x18   : > { %776 = vmatmul.mubr.msk.f32.gmra.mxu0 %vm261_vm1, %v201_v11  ;;  %v211_v31 = vld [vmem:[%s872_s20 + $0x78] sm:$0xff]  ;;  %v230_v33 = vld [vmem:[%s942_s23 + $0x8] sm:$0xff]  ;;  %v229_v37 = vld [vmem:[%s942_s23] sm:$0xff] }
  0x19   : > { %800 = vmatmul.mubr.msk.f32.gmra.mxu1 %vm261_vm1, %v217_v12  ;;  %778 = vmatprep.mubr.msk.f32.mxu0 %vm261_vm1, %v202_v13  ;;  %v227_v32 = vld [vmem:[%s872_s20 + $0xf8] sm:$0xff]  ;;  %v246_v34 = vld [vmem:[%s942_s23 + $0x88] sm:$0xff]  ;;  %v245_v38 = vld [vmem:[%s942_s23 + $0x80] sm:$0xff] }
  0x1a   : > { %802 = vmatprep.mubr.msk.f32.mxu1 %vm261_vm1, %v218_v14  ;;  %v232_v43 = vld [vmem:[%s942_s23 + $0x18] sm:$0xff]  ;;  %v231_v49 = vld [vmem:[%s942_s23 + $0x10] sm:$0xff]  ;;  %v234_v55 = vld [vmem:[%s942_s23 + $0x28] sm:$0xff] }
  0x1b   : > { %v248_v44 = vld [vmem:[%s942_s23 + $0x98] sm:$0xff]  ;;  %v247_v50 = vld [vmem:[%s942_s23 + $0x90] sm:$0xff]  ;;  %v250_v56 = vld [vmem:[%s942_s23 + $0xa8] sm:$0xff] }
  0x1c   : > { %779 = vmatmul.mubr.msk.f32.gmra.mxu0 %vm261_vm1, %v203_v15  ;;  %v233_v61 = vld [vmem:[%s942_s23 + $0x20] sm:$0xff]  ;;  %v236_v3 = vld [vmem:[%s942_s23 + $0x38] sm:$0xff]  ;;  %v235_v9 = vld [vmem:[%s942_s23 + $0x30] sm:$0xff] }
  0x1d   : > { %803 = vmatmul.mubr.msk.f32.gmra.mxu1 %vm261_vm1, %v219_v16  ;;  %781 = vmatprep.mubr.msk.f32.mxu0 %vm261_vm1, %v204_v17  ;;  %v249_v62 = vld [vmem:[%s942_s23 + $0xa0] sm:$0xff]  ;;  %v252_v4 = vld [vmem:[%s942_s23 + $0xb8] sm:$0xff]  ;;  %v251_v10 = vld [vmem:[%s942_s23 + $0xb0] sm:$0xff] }
  0x1e   : > { %805 = vmatprep.mubr.msk.f32.mxu1 %vm261_vm1, %v220_v18  ;;  %v238_v15 = vld [vmem:[%s942_s23 + $0x48] sm:$0xff] }
  0x1f   : > { %v254_v16 = vld [vmem:[%s942_s23 + $0xc8] sm:$0xff] }
  0x20   : > { %782 = vmatmul.mubr.msk.f32.gmra.mxu0 %vm261_vm1, %v205_v19 }
  0x21   : > { %806 = vmatmul.mubr.msk.f32.gmra.mxu1 %vm261_vm1, %v221_v20  ;;  %784 = vmatprep.mubr.msk.f32.mxu0 %vm261_vm1, %v206_v21  ;;  %v237_v21 = vld [vmem:[%s942_s23 + $0x40] sm:$0xff] }
  0x22   : > { %808 = vmatprep.mubr.msk.f32.mxu1 %vm261_vm1, %v222_v22  ;;  %v253_v22 = vld [vmem:[%s942_s23 + $0xc0] sm:$0xff] }
  0x24   : > { %785 = vmatmul.mubr.msk.f32.gmra.mxu0 %vm261_vm1, %v207_v23 }
  0x25   : > { %809 = vmatmul.mubr.msk.f32.gmra.mxu1 %vm261_vm1, %v223_v24  ;;  %787 = vmatprep.mubr.msk.f32.mxu0 %vm261_vm1, %v208_v25 }
  0x26   : > { %811 = vmatprep.mubr.msk.f32.mxu1 %vm261_vm1, %v224_v26 }
  0x28   : > { %788 = vmatmul.mubr.msk.f32.gmra.mxu0 %vm261_vm1, %v209_v27  ;;  %v240_v27 = vld [vmem:[%s942_s23 + $0x58] sm:$0xff] }
  0x29   : > { %812 = vmatmul.mubr.msk.f32.gmra.mxu1 %vm261_vm1, %v225_v28  ;;  %790 = vmatprep.mubr.msk.f32.mxu0 %vm261_vm1, %v210_v29  ;;  %v256_v28 = vld [vmem:[%s942_s23 + $0xd8] sm:$0xff] }
  0x2a   : > { %814 = vmatprep.mubr.msk.f32.mxu1 %vm261_vm1, %v226_v30 }
  0x2c   : > { %791 = vmatmul.mubr.msk.f32.gmra.mxu0 %vm261_vm1, %v211_v31 }
  0x2d   : > { %815 = vmatmul.mubr.msk.f32.gmra.mxu1 %vm261_vm1, %v227_v32 }
  0xd0   : > { %v771_v35 = vpop.f32.mrf.mxu0 }
  0xd1   : > { %v795_v36 = vpop.f32.mrf.mxu1  ;;  %v434_v39 = vadd.f32 %v771_v35, %v230_v33  ;;  %v239_v33 = vld [vmem:[%s942_s23 + $0x50] sm:$0xff] }
  0xd2   : > { %v514_v40 = vadd.f32 %v795_v36, %v246_v34  ;;  %v428_v41 = vpop.f32.mrf.mxu0  ;;  %v255_v34 = vld [vmem:[%s942_s23 + $0xd0] sm:$0xff] }
  0xd3   : > { %v508_v42 = vpop.f32.mrf.mxu1  ;;  %589 = vst.msk [vmem:[%s950_s26 + $0x8] sm:$0xff] %vm587_vm2, %v434_v39  ;;  %v429_v45 = vadd.f32 %v428_v41, %v229_v37  ;;  %v242_v39 = vld [vmem:[%s942_s23 + $0x68] sm:$0xff] }
  0xd4   : > { %605 = vst.msk [vmem:[%s950_s26 + $0x88] sm:$0xff] %vm587_vm2, %v514_v40  ;;  %v509_v46 = vadd.f32 %v508_v42, %v245_v38  ;;  %v774_v47 = vpop.f32.mrf.mxu0  ;;  %v258_v40 = vld [vmem:[%s942_s23 + $0xe8] sm:$0xff] }
  0xd5   : > { %v798_v48 = vpop.f32.mrf.mxu1  ;;  %588 = vst.msk [vmem:[%s950_s26] sm:$0xff] %vm587_vm2, %v429_v45  ;;  %v444_v51 = vadd.f32 %v774_v47, %v232_v43  ;;  %v241_v45 = vld [vmem:[%s942_s23 + $0x60] sm:$0xff] }
  0xd6   : > { %604 = vst.msk [vmem:[%s950_s26 + $0x80] sm:$0xff] %vm587_vm2, %v509_v46  ;;  %v524_v52 = vadd.f32 %v798_v48, %v248_v44  ;;  %v438_v53 = vpop.f32.mrf.mxu0  ;;  %v257_v46 = vld [vmem:[%s942_s23 + $0xe0] sm:$0xff] }
  0xd7   : > { %v518_v54 = vpop.f32.mrf.mxu1  ;;  %591 = vst.msk [vmem:[%s950_s26 + $0x18] sm:$0xff] %vm587_vm2, %v444_v51  ;;  %v439_v57 = vadd.f32 %v438_v53, %v231_v49  ;;  %v244_v51 = vld [vmem:[%s942_s23 + $0x78] sm:$0xff] }
  0xd8   : > { %607 = vst.msk [vmem:[%s950_s26 + $0x98] sm:$0xff] %vm587_vm2, %v524_v52  ;;  %v519_v58 = vadd.f32 %v518_v54, %v247_v50  ;;  %v777_v59 = vpop.f32.mrf.mxu0  ;;  %v260_v52 = vld [vmem:[%s942_s23 + $0xf8] sm:$0xff] }
  0xd9   : > { %v801_v60 = vpop.f32.mrf.mxu1  ;;  %590 = vst.msk [vmem:[%s950_s26 + $0x10] sm:$0xff] %vm587_vm2, %v439_v57  ;;  %v454_v63 = vadd.f32 %v777_v59, %v234_v55  ;;  %v243_v57 = vld [vmem:[%s942_s23 + $0x70] sm:$0xff] }
  0xda   : > { %606 = vst.msk [vmem:[%s950_s26 + $0x90] sm:$0xff] %vm587_vm2, %v519_v58  ;;  %v534_v0 = vadd.f32 %v801_v60, %v250_v56  ;;  %v448_v1 = vpop.f32.mrf.mxu0  ;;  %v259_v58 = vld [vmem:[%s942_s23 + $0xf0] sm:$0xff] }
  0xdb   : > { %v528_v2 = vpop.f32.mrf.mxu1  ;;  %593 = vst.msk [vmem:[%s950_s26 + $0x28] sm:$0xff] %vm587_vm2, %v454_v63  ;;  %v449_v5 = vadd.f32 %v448_v1, %v233_v61 }
  0xdc   : > { %609 = vst.msk [vmem:[%s950_s26 + $0xa8] sm:$0xff] %vm587_vm2, %v534_v0  ;;  %v529_v6 = vadd.f32 %v528_v2, %v249_v62  ;;  %v780_v7 = vpop.f32.mrf.mxu0 }
  0xdd   : > { %v804_v8 = vpop.f32.mrf.mxu1  ;;  %592 = vst.msk [vmem:[%s950_s26 + $0x20] sm:$0xff] %vm587_vm2, %v449_v5  ;;  %v464_v11 = vadd.f32 %v780_v7, %v236_v3 }
  0xde   : > { %608 = vst.msk [vmem:[%s950_s26 + $0xa0] sm:$0xff] %vm587_vm2, %v529_v6  ;;  %v544_v12 = vadd.f32 %v804_v8, %v252_v4  ;;  %v458_v13 = vpop.f32.mrf.mxu0 }
  0xdf   : > { %v538_v14 = vpop.f32.mrf.mxu1  ;;  %595 = vst.msk [vmem:[%s950_s26 + $0x38] sm:$0xff] %vm587_vm2, %v464_v11  ;;  %v459_v17 = vadd.f32 %v458_v13, %v235_v9 }
  0xe0   : > { %611 = vst.msk [vmem:[%s950_s26 + $0xb8] sm:$0xff] %vm587_vm2, %v544_v12  ;;  %v539_v18 = vadd.f32 %v538_v14, %v251_v10  ;;  %v783_v19 = vpop.f32.mrf.mxu0 }
  0xe1   : > { %v807_v20 = vpop.f32.mrf.mxu1  ;;  %594 = vst.msk [vmem:[%s950_s26 + $0x30] sm:$0xff] %vm587_vm2, %v459_v17  ;;  %v474_v23 = vadd.f32 %v783_v19, %v238_v15 }
  0xe2   : > { %610 = vst.msk [vmem:[%s950_s26 + $0xb0] sm:$0xff] %vm587_vm2, %v539_v18  ;;  %v554_v24 = vadd.f32 %v807_v20, %v254_v16  ;;  %v468_v25 = vpop.f32.mrf.mxu0 }
  0xe3   : > { %v548_v26 = vpop.f32.mrf.mxu1  ;;  %597 = vst.msk [vmem:[%s950_s26 + $0x48] sm:$0xff] %vm587_vm2, %v474_v23  ;;  %v469_v29 = vadd.f32 %v468_v25, %v237_v21 }
  0xe4   : > { %613 = vst.msk [vmem:[%s950_s26 + $0xc8] sm:$0xff] %vm587_vm2, %v554_v24  ;;  %v549_v30 = vadd.f32 %v548_v26, %v253_v22  ;;  %v786_v31 = vpop.f32.mrf.mxu0 }
  0xe5   : > { %v810_v32 = vpop.f32.mrf.mxu1  ;;  %596 = vst.msk [vmem:[%s950_s26 + $0x40] sm:$0xff] %vm587_vm2, %v469_v29  ;;  %v484_v35 = vadd.f32 %v786_v31, %v240_v27 }
  0xe6   : > { %612 = vst.msk [vmem:[%s950_s26 + $0xc0] sm:$0xff] %vm587_vm2, %v549_v30  ;;  %v564_v36 = vadd.f32 %v810_v32, %v256_v28  ;;  %v478_v37 = vpop.f32.mrf.mxu0 }
  0xe7   : > { %v558_v38 = vpop.f32.mrf.mxu1  ;;  %599 = vst.msk [vmem:[%s950_s26 + $0x58] sm:$0xff] %vm587_vm2, %v484_v35  ;;  %v479_v41 = vadd.f32 %v478_v37, %v239_v33 }
  0xe8   : > { %615 = vst.msk [vmem:[%s950_s26 + $0xd8] sm:$0xff] %vm587_vm2, %v564_v36  ;;  %v559_v42 = vadd.f32 %v558_v38, %v255_v34  ;;  %v789_v43 = vpop.f32.mrf.mxu0 }
  0xe9   : > { %v813_v44 = vpop.f32.mrf.mxu1  ;;  %598 = vst.msk [vmem:[%s950_s26 + $0x50] sm:$0xff] %vm587_vm2, %v479_v41  ;;  %v494_v47 = vadd.f32 %v789_v43, %v242_v39 }
  0xea   : > { %614 = vst.msk [vmem:[%s950_s26 + $0xd0] sm:$0xff] %vm587_vm2, %v559_v42  ;;  %v574_v48 = vadd.f32 %v813_v44, %v258_v40  ;;  %v488_v49 = vpop.f32.mrf.mxu0 }
  0xeb   : > { %v568_v50 = vpop.f32.mrf.mxu1  ;;  %601 = vst.msk [vmem:[%s950_s26 + $0x68] sm:$0xff] %vm587_vm2, %v494_v47  ;;  %v489_v53 = vadd.f32 %v488_v49, %v241_v45 }
  0xec   : > { %617 = vst.msk [vmem:[%s950_s26 + $0xe8] sm:$0xff] %vm587_vm2, %v574_v48  ;;  %v569_v54 = vadd.f32 %v568_v50, %v257_v46  ;;  %v792_v55 = vpop.f32.mrf.mxu0 }
  0xed   : > { %v816_v56 = vpop.f32.mrf.mxu1  ;;  %600 = vst.msk [vmem:[%s950_s26 + $0x60] sm:$0xff] %vm587_vm2, %v489_v53  ;;  %v504_v59 = vadd.f32 %v792_v55, %v244_v51 }
  0xee   : > { %616 = vst.msk [vmem:[%s950_s26 + $0xe0] sm:$0xff] %vm587_vm2, %v569_v54  ;;  %v584_v60 = vadd.f32 %v816_v56, %v260_v52  ;;  %v498_v61 = vpop.f32.mrf.mxu0 }
  0xef   : > { %v578_v62 = vpop.f32.mrf.mxu1  ;;  %603 = vst.msk [vmem:[%s950_s26 + $0x78] sm:$0xff] %vm587_vm2, %v504_v59  ;;  %v499_v63 = vadd.f32 %v498_v61, %v243_v57 }
  0xf0   : > { %619 = vst.msk [vmem:[%s950_s26 + $0xf8] sm:$0xff] %vm587_vm2, %v584_v60  ;;  %v579_v0 = vadd.f32 %v578_v62, %v259_v58 }
  0xf1   : > { %602 = vst.msk [vmem:[%s950_s26 + $0x70] sm:$0xff] %vm587_vm2, %v499_v63 }
  0xf2   : > { %618 = vst.msk [vmem:[%s950_s26 + $0xf0] sm:$0xff] %vm587_vm2, %v579_v0 }
  0xf3 PF: > { %s13_s12 = sadd.s32 1, %s833_s12  }
  0xf4   : > { %p10_p4 = scmp.ge.s32.totalorder %s13_s12, 4  }
  0xf6   :  { %12 = sbr.rel (!%p10_p4) target bundleno = 1 (0x1), region = 65 }

// kernel: attention_module_stage1.49
= control target key start
LH: loop header
LB: loop body
LE: loop exit
PB: predicated region body
PF: predicated region fallthrough
CT: control target
= control target key end

     0   :  { %vm103_vm0 = vcmask 130048   ;;  %vm359_vm1 = vcmask 31744   ;;  %s703_s3 = inlined_call_operand.vmem [shape: f32[16,4], index: 3, kind: input, shape index: {}]   ;;  %s704_s0 = inlined_call_operand.vmem [shape: f32[128,16], index: 0, kind: input, shape index: {}]   ;;  %s705_s1 = inlined_call_operand.vmem [shape: f32[1,16], index: 1, kind: input, shape index: {}]   ;;  %s706_s2 = inlined_call_operand.vmem [shape: f32[1,16], index: 2, kind: input, shape index: {}]   ;;  %s707_s4 = inlined_call_operand.vmem [shape: f32[1,4], index: 4, kind: input, shape index: {}]   ;;  %s708_s5 = inlined_call_operand.vmem [shape: f32[1,4], index: 5, kind: input, shape index: {}]   ;;  %s709_s6 = inlined_call_operand.vmem [shape: f32[128,4], index: 6, kind: output, shape index: {}]  }
   0x1   :  { %v102_v0 = vld [vmem:[%s703_s3 + $0x8] sm:$0xff]  ;;  %v101_v1 = vld [vmem:[%s703_s3] sm:$0xff]  ;;  %v25_v10 = vld [vmem:[%s704_s0 + $0x10] sm:$0xff] }
   0x2   :  { %v23_v2 = vld [vmem:[%s704_s0] sm:$0xff]  ;;  %418 = vmatprep.subr.mxu0 %v102_v0  ;;  %446 = vmatprep.subr.mxu1 %v102_v0  ;;  %v24_v8 = vld [vmem:[%s704_s0 + $0x8] sm:$0xff]  ;;  %v33_v14 = vld [vmem:[%s704_s0 + $0x50] sm:$0xff] }
   0x3   :  { %v497_v3 = vld [vmem:[%s705_s1] ss:$0 sm:$0xff]  ;;  %419 = vmatpush3.msra.mxu0 %v102_v0  ;;  %448 = vmatpush3.msra.mxu1 %v102_v0  ;;  %v32_v9 = vld [vmem:[%s704_s0 + $0x48] sm:$0xff]  ;;  %v26_v15 = vld [vmem:[%s704_s0 + $0x18] sm:$0xff] }
   0x4   :  { %v502_v4 = vld [vmem:[%s706_s2] ss:$0 sm:$0xff]  ;;  %v46_v6 = vmul.f32 %v497_v3, %v23_v2  ;;  %420 = vmatprep.subr.mxu0 %v101_v1  ;;  %447 = vmatprep.subr.mxu1 %v101_v1  ;;  %v47_v11 = vmul.f32 %v497_v3, %v24_v8  ;;  %v55_v12 = vmul.f32 %v497_v3, %v32_v9  ;;  %v34_v16 = vld [vmem:[%s704_s0 + $0x58] sm:$0xff]  ;;  %v28_v30 = vld [vmem:[%s704_s0 + $0x28] sm:$0xff] }
   0x5   :  { %v31_v5 = vld [vmem:[%s704_s0 + $0x40] sm:$0xff]  ;;  %v48_v13 = vmul.f32 %v497_v3, %v25_v10  ;;  %421 = vmatpush3.msra.mxu0 %v101_v1  ;;  %449 = vmatpush3.msra.mxu1 %v101_v1  ;;  %v56_v19 = vmul.f32 %v497_v3, %v33_v14  ;;  %v49_v23 = vmul.f32 %v497_v3, %v26_v15  ;;  %v36_v31 = vld [vmem:[%s704_s0 + $0x68] sm:$0xff]  ;;  %v29_v32 = vld [vmem:[%s704_s0 + $0x30] sm:$0xff] }
   0x6   :  { %v54_v7 = vmul.f32 %v497_v3, %v31_v5  ;;  %v69_v17 = vadd.f32 %v502_v4, %v46_v6  ;;  %v70_v20 = vadd.f32 %v502_v4, %v47_v11  ;;  %v78_v21 = vadd.f32 %v502_v4, %v55_v12  ;;  %v27_v24 = vld [vmem:[%s704_s0 + $0x20] sm:$0xff]  ;;  %v37_v37 = vld [vmem:[%s704_s0 + $0x70] sm:$0xff]  ;;  %v30_v42 = vld [vmem:[%s704_s0 + $0x38] sm:$0xff] }
   0x7   :  { %v71_v22 = vadd.f32 %v502_v4, %v48_v13  ;;  %v35_v25 = vld [vmem:[%s704_s0 + $0x60] sm:$0xff]  ;;  %v79_v28 = vadd.f32 %v502_v4, %v56_v19  ;;  %v57_v29 = vmul.f32 %v497_v3, %v34_v16  ;;  %v72_v36 = vadd.f32 %v502_v4, %v49_v23  ;;  %v38_v47 = vld [vmem:[%s704_s0 + $0x78] sm:$0xff] }
   0x8   :  { %v77_v18 = vadd.f32 %v502_v4, %v54_v7  ;;  %v85_v26 = vmax.f32 %v69_v17, 0.0  ;;  %v86_v33 = vmax.f32 %v70_v20, 0.0  ;;  %v94_v34 = vmax.f32 %v78_v21, 0.0  ;;  %v600_v5 = vld [vmem:[%s707_s4] ss:$0 sm:$0xff] }
   0x9   :  { %v87_v35 = vmax.f32 %v71_v22, 0.0  ;;  %v95_v38 = vmax.f32 %v79_v28, 0.0  ;;  %v80_v39 = vadd.f32 %v502_v4, %v57_v29  ;;  %v50_v40 = vmul.f32 %v497_v3, %v27_v24  ;;  %v605_v6 = vld [vmem:[%s708_s5] ss:$0 sm:$0xff] }
   0xa   :  { %v93_v27 = vmax.f32 %v77_v18, 0.0  ;;  %422 = vmatprep.mubr.msk.f32.mxu0 %vm103_vm0, %v85_v26  ;;  %v58_v41 = vmul.f32 %v497_v3, %v35_v25  ;;  %v88_v43 = vmax.f32 %v72_v36, 0.0  ;;  %v51_v44 = vmul.f32 %v497_v3, %v28_v30 }
   0xb   :  { %423 = vmatmul.mubr.msk.f32.vlgmr.msra.gmra.mxu0 %vm103_vm0, %v86_v33  ;;  %v59_v45 = vmul.f32 %v497_v3, %v36_v31  ;;  %v52_v46 = vmul.f32 %v497_v3, %v29_v32  ;;  %v96_v48 = vmax.f32 %v80_v39, 0.0  ;;  %v73_v49 = vadd.f32 %v502_v4, %v50_v40 }
   0xc   :  { %434 = vmatprep.mubr.msk.f32.mxu1 %vm103_vm0, %v93_v27  ;;  %425 = vmatprep.mubr.msk.f32.mxu0 %vm103_vm0, %v87_v35  ;;  %v81_v50 = vadd.f32 %v502_v4, %v58_v41  ;;  %v60_v51 = vmul.f32 %v497_v3, %v37_v37  ;;  %v74_v52 = vadd.f32 %v502_v4, %v51_v44 }
   0xd   :  { %435 = vmatmul.mubr.msk.f32.vlgmr.msra.gmra.mxu1 %vm103_vm0, %v94_v34  ;;  %v82_v53 = vadd.f32 %v502_v4, %v59_v45  ;;  %v75_v54 = vadd.f32 %v502_v4, %v52_v46  ;;  %v53_v55 = vmul.f32 %v497_v3, %v30_v42  ;;  %v89_v56 = vmax.f32 %v73_v49, 0.0 }
   0xe   :  { %437 = vmatprep.mubr.msk.f32.mxu1 %vm103_vm0, %v95_v38  ;;  %v97_v57 = vmax.f32 %v81_v50, 0.0  ;;  %v83_v58 = vadd.f32 %v502_v4, %v60_v51  ;;  %v61_v59 = vmul.f32 %v497_v3, %v38_v47  ;;  %v90_v60 = vmax.f32 %v74_v52, 0.0 }
   0xf   :  { %426 = vmatmul.mubr.msk.f32.gmra.mxu0 %vm103_vm0, %v88_v43  ;;  %v98_v61 = vmax.f32 %v82_v53, 0.0  ;;  %v76_v62 = vadd.f32 %v502_v4, %v53_v55  ;;  %v91_v63 = vmax.f32 %v75_v54, 0.0 }
  0x10   :  { %428 = vmatprep.mubr.msk.f32.mxu0 %vm103_vm0, %v89_v56  ;;  %v99_v0 = vmax.f32 %v83_v58, 0.0  ;;  %v84_v1 = vadd.f32 %v502_v4, %v61_v59 }
  0x11   :  { %438 = vmatmul.mubr.msk.f32.gmra.mxu1 %vm103_vm0, %v96_v48  ;;  %v92_v2 = vmax.f32 %v76_v62, 0.0 }
  0x12   :  { %440 = vmatprep.mubr.msk.f32.mxu1 %vm103_vm0, %v97_v57  ;;  %v100_v3 = vmax.f32 %v84_v1, 0.0 }
  0x13   :  { %429 = vmatmul.mubr.msk.f32.gmra.mxu0 %vm103_vm0, %v90_v60 }
  0x14   :  { %431 = vmatprep.mubr.msk.f32.mxu0 %vm103_vm0, %v91_v63 }
  0x15   :  { %441 = vmatmul.mubr.msk.f32.gmra.mxu1 %vm103_vm0, %v98_v61 }
  0x16   :  { %443 = vmatprep.mubr.msk.f32.mxu1 %vm103_vm0, %v99_v0 }
  0x17   :  { %432 = vmatmul.mubr.msk.f32.gmra.mxu0 %vm103_vm0, %v92_v2 }
  0x19   :  { %444 = vmatmul.mubr.msk.f32.gmra.mxu1 %vm103_vm0, %v100_v3 }
  0xcb   :  { %v424_v4 = vpop.f32.mrf.mxu0 }
  0xcc   :  { %v305_v8 = vmul.f32 %v424_v4, %v600_v5 }
  0xcd   :  { %v436_v7 = vpop.f32.mrf.mxu1  ;;  %v218_v10 = vpop.f32.mrf.mxu0 }
  0xce   :  { %v313_v9 = vmul.f32 %v436_v7, %v600_v5  ;;  %v328_v12 = vadd.f32 %v605_v6, %v305_v8  ;;  %v304_v14 = vmul.f32 %v600_v5, %v218_v10 }
  0xcf   :  { %v258_v11 = vpop.f32.mrf.mxu1  ;;  %v427_v16 = vpop.f32.mrf.mxu0 }
  0xd0   :  { %v336_v13 = vadd.f32 %v605_v6, %v313_v9  ;;  %v312_v15 = vmul.f32 %v600_v5, %v258_v11  ;;  %v344_v18 = vmax.f32 %v328_v12, 0.0  ;;  %v327_v20 = vadd.f32 %v605_v6, %v304_v14 }
  0xd1   :  { %v439_v17 = vpop.f32.mrf.mxu1  ;;  %v307_v22 = vmul.f32 %v427_v16, %v600_v5  ;;  %v228_v24 = vpop.f32.mrf.mxu0 }
  0xd2   :  { %v352_v19 = vmax.f32 %v336_v13, 0.0  ;;  %v335_v21 = vadd.f32 %v605_v6, %v312_v15  ;;  %v315_v23 = vmul.f32 %v439_v17, %v600_v5  ;;  %361 = vst.msk [vmem:[%s709_s6 + $0x8] sm:$0xff] %vm359_vm1, %v344_v18  ;;  %v343_v26 = vmax.f32 %v327_v20, 0.0 }
  0xd3   :  { %v268_v25 = vpop.f32.mrf.mxu1  ;;  %v306_v28 = vmul.f32 %v600_v5, %v228_v24  ;;  %v330_v30 = vadd.f32 %v605_v6, %v307_v22  ;;  %v430_v32 = vpop.f32.mrf.mxu0 }
  0xd4   :  { %369 = vst.msk [vmem:[%s709_s6 + $0x48] sm:$0xff] %vm359_vm1, %v352_v19  ;;  %v351_v27 = vmax.f32 %v335_v21, 0.0  ;;  %v314_v29 = vmul.f32 %v600_v5, %v268_v25  ;;  %v338_v31 = vadd.f32 %v605_v6, %v315_v23  ;;  %360 = vst.msk [vmem:[%s709_s6] sm:$0xff] %vm359_vm1, %v343_v26  ;;  %v309_v36 = vmul.f32 %v430_v32, %v600_v5 }
  0xd5   :  { %v442_v33 = vpop.f32.mrf.mxu1  ;;  %v329_v34 = vadd.f32 %v605_v6, %v306_v28  ;;  %v346_v38 = vmax.f32 %v330_v30, 0.0  ;;  %v238_v40 = vpop.f32.mrf.mxu0 }
  0xd6   :  { %368 = vst.msk [vmem:[%s709_s6 + $0x40] sm:$0xff] %vm359_vm1, %v351_v27  ;;  %v337_v35 = vadd.f32 %v605_v6, %v314_v29  ;;  %v317_v37 = vmul.f32 %v442_v33, %v600_v5  ;;  %v354_v39 = vmax.f32 %v338_v31, 0.0  ;;  %v332_v44 = vadd.f32 %v605_v6, %v309_v36 }
  0xd7   :  { %v278_v41 = vpop.f32.mrf.mxu1  ;;  %v345_v42 = vmax.f32 %v329_v34, 0.0  ;;  %363 = vst.msk [vmem:[%s709_s6 + $0x18] sm:$0xff] %vm359_vm1, %v346_v38  ;;  %v308_v46 = vmul.f32 %v600_v5, %v238_v40  ;;  %v433_v48 = vpop.f32.mrf.mxu0 }
  0xd8   :  { %v353_v43 = vmax.f32 %v337_v35, 0.0  ;;  %v340_v45 = vadd.f32 %v605_v6, %v317_v37  ;;  %371 = vst.msk [vmem:[%s709_s6 + $0x58] sm:$0xff] %vm359_vm1, %v354_v39  ;;  %v316_v47 = vmul.f32 %v600_v5, %v278_v41  ;;  %v348_v50 = vmax.f32 %v332_v44, 0.0 }
  0xd9   :  { %v445_v49 = vpop.f32.mrf.mxu1  ;;  %362 = vst.msk [vmem:[%s709_s6 + $0x10] sm:$0xff] %vm359_vm1, %v345_v42  ;;  %v311_v52 = vmul.f32 %v433_v48, %v600_v5  ;;  %v331_v54 = vadd.f32 %v605_v6, %v308_v46  ;;  %v248_v56 = vpop.f32.mrf.mxu0 }
  0xda   :  { %370 = vst.msk [vmem:[%s709_s6 + $0x50] sm:$0xff] %vm359_vm1, %v353_v43  ;;  %v356_v51 = vmax.f32 %v340_v45, 0.0  ;;  %v319_v53 = vmul.f32 %v445_v49, %v600_v5  ;;  %v339_v55 = vadd.f32 %v605_v6, %v316_v47  ;;  %365 = vst.msk [vmem:[%s709_s6 + $0x28] sm:$0xff] %vm359_vm1, %v348_v50  ;;  %v310_v60 = vmul.f32 %v600_v5, %v248_v56 }
  0xdb   :  { %v288_v57 = vpop.f32.mrf.mxu1  ;;  %v334_v58 = vadd.f32 %v605_v6, %v311_v52  ;;  %v347_v62 = vmax.f32 %v331_v54, 0.0 }
  0xdc   :  { %373 = vst.msk [vmem:[%s709_s6 + $0x68] sm:$0xff] %vm359_vm1, %v356_v51  ;;  %v342_v59 = vadd.f32 %v605_v6, %v319_v53  ;;  %v318_v61 = vmul.f32 %v600_v5, %v288_v57  ;;  %v355_v63 = vmax.f32 %v339_v55, 0.0  ;;  %v333_v2 = vadd.f32 %v605_v6, %v310_v60 }
  0xdd   :  { %v350_v0 = vmax.f32 %v334_v58, 0.0  ;;  %364 = vst.msk [vmem:[%s709_s6 + $0x20] sm:$0xff] %vm359_vm1, %v347_v62 }
  0xde   :  { %v358_v1 = vmax.f32 %v342_v59, 0.0  ;;  %v341_v3 = vadd.f32 %v605_v6, %v318_v61  ;;  %372 = vst.msk [vmem:[%s709_s6 + $0x60] sm:$0xff] %vm359_vm1, %v355_v63  ;;  %v349_v5 = vmax.f32 %v333_v2, 0.0 }
  0xdf   :  { %367 = vst.msk [vmem:[%s709_s6 + $0x38] sm:$0xff] %vm359_vm1, %v350_v0 }
  0xe0   :  { %375 = vst.msk [vmem:[%s709_s6 + $0x78] sm:$0xff] %vm359_vm1, %v358_v1  ;;  %v357_v4 = vmax.f32 %v341_v3, 0.0  ;;  %366 = vst.msk [vmem:[%s709_s6 + $0x30] sm:$0xff] %vm359_vm1, %v349_v5 }
  0xe2   :  { %374 = vst.msk [vmem:[%s709_s6 + $0x70] sm:$0xff] %vm359_vm1, %v357_v4 }

// kernel: attention_module_stage1.50
= control target key start
LH: loop header
LB: loop body
LE: loop exit
PB: predicated region body
PF: predicated region fallthrough
CT: control target
= control target key end

     0   :  { %s637_s15 = smov 0   ;;  %s717_s0 = inlined_call_operand.vmem [shape: f32[2,10,40], index: 0, kind: input, shape index: {}]   ;;  %s718_s1 = inlined_call_operand.vmem [shape: f32[3,40,32], index: 1, kind: input, shape index: {}]   ;;  %s719_s2 = inlined_call_operand.vmem [shape: f32[1,32], index: 2, kind: input, shape index: {}]   ;;  %s720_s3 = inlined_call_operand.vmem [shape: f32[1,32], index: 3, kind: input, shape index: {}]   ;;  %s721_s4 = inlined_call_operand.vmem [shape: f32[2,8,32], index: 4, kind: output, shape index: {}]  }
   0x1 LB: > { %s509_s16 = sadd.s32 4294967295, %s608_s15   ;;  %p513_p0 = scmp.ge.s32.totalorder %s608_s15, 1  ;;  %s608_s15 = sphi %s637_s15, %s14_s15  }
   0x2   : > { %p162_p1 = scmp.lt.s32.totalorder %s608_s15, 3 }
   0x4   : > { %p163_p2 = pnand %p513_p0, %p162_p1 }
   0x5   : > { %p187_p3 = scmp.lt.s32.totalorder (!%p163_p2), %s509_s16, 1 }
   0x6   : > { %166 = sbr.rel (%p163_p2) target bundleno = 235 (0xeb), region = 36 }
   0xb   : > { %v521_v0 = vld [vmem:[%s718_s1 + $0x48] sm:$0xff]  ;;  %v201_v1 = vld [vmem:[%s718_s1 + $0x20] sm:$0xff]  ;;  %v610_v2 = vmov 0.0   ;;  %v200_v4 = vld [vmem:[%s718_s1 + $0x18] sm:$0xff]  ;;  %s723_s16 = smov (!%p187_p3, %s509_s16), 1  ;;  %vm209_vm0 = vcmask 326656  }
   0xc   : > { %553 = vmatprep.subr.mxu0 %v610_v2  ;;  %566 = vmatprep.subr.mxu1 %v610_v2  ;;  %v520_v3 = vld [vmem:[%s718_s1 + $0x40] sm:$0xff]  ;;  %v519_v5 = vld [vmem:[%s718_s1 + $0x38] sm:$0xff]  ;;  %v199_v6 = vld [vmem:[%s718_s1 + $0x10] sm:$0xff]  ;;  %s534_s29 = sshll.u32 %s723_s16, 4  ;;  %vm611_vm1 = vmmov 0   ;;  %s516_s5 = sshll.u32 %s723_s16, 3 }
   0xd   : > { %554 = vmatpush3.msra.mxu0 %v521_v0  ;;  %567 = vmatpush3.msra.mxu1 %v201_v1  ;;  %v518_v7 = vld [vmem:[%s718_s1 + $0x30] sm:$0xff]  ;;  %v198_v8 = vld [vmem:[%s718_s1 + $0x8] sm:$0xff]  ;;  %s675_s10 = scalar_lea.vmem %s717_s0, %s534_s29  ;;  %v197_v11 = vld [vmem:[%s718_s1] sm:$0xff]  ;;  %s195_s8 = scalar_lea.vmem %s721_s4, %s516_s5  ;;  %vm454_vm2 = vcmask 261120  }
   0xe   : > { %555 = vmatprep.subr.mxu0 %v610_v2  ;;  %568 = vmatprep.subr.mxu1 %v610_v2  ;;  %v517_v9 = vld [vmem:[%s718_s1 + $0x28] sm:$0xff]  ;;  %v196_v12 = vld [vmem:[%s675_s10] sm:$0xff]  ;;  %v528_v13 = vld [vmem:[%s718_s1 + $0x70] sm:$0xff] }
   0xf   : > { %556 = vmatpush3.msra.mxu0 %v520_v3  ;;  %569 = vmatpush3.msra.mxu1 %v200_v4  ;;  %v202_v10 = vld [vmem:[%s675_s10 + $0x1] sm:$0xff]  ;;  %v525_v16 = vld [vmem:[%s718_s1 + $0x58] sm:$0xff]  ;;  %v524_v17 = vld [vmem:[%s718_s1 + $0x50] sm:$0xff] }
  0x10   : > { %557 = vmatprep.subr.mxu0 %v610_v2  ;;  %570 = vmatprep.subr.mxu1 %v610_v2  ;;  %v527_v14 = vld [vmem:[%s718_s1 + $0x68] sm:$0xff]  ;;  %v526_v15 = vld [vmem:[%s718_s1 + $0x60] sm:$0xff] }
  0x11   : > { %558 = vmatpush3.msra.mxu0 %v519_v5  ;;  %571 = vmatpush3.msra.mxu1 %v199_v6  ;;  %v356_v18 = vld [vmem:[%s675_s10 + $0x2] sm:$0xff]  ;;  %v530_v25 = vld [vmem:[%s719_s2] ss:$0 sm:$0xff] }
  0x12   : > { %559 = vmatprep.subr.mxu0 %v610_v2  ;;  %572 = vmatprep.subr.mxu1 %v610_v2  ;;  %v531_v27 = vld [vmem:[%s720_s3] ss:$0 sm:$0xff] }
  0x13   : > { %560 = vmatpush3.msra.mxu0 %v518_v7  ;;  %573 = vmatpush3.msra.mxu1 %v198_v8 }
  0x14   : > { %561 = vmatprep.subr.mxu0 %v610_v2  ;;  %563 = vmatprep.mubr.msk.f32.mxu0 %vm611_vm1, %v610_v2 }
  0x15   : > { %562 = vmatpush3.msra.mxu0 %v517_v9  ;;  %574 = vmatprep.subr.mxu1 %v610_v2 }
  0x16   : > { %564 = vmatmul.mubr.msk.f32.vlgmr.msra.gmra.mxu0 %vm209_vm0, %v202_v10  ;;  %575 = vmatpush3.msra.mxu1 %v197_v11 }
  0x17   : > { %576 = vmatprep.mubr.msk.f32.mxu1 %vm611_vm1, %v610_v2  ;;  %579 = vmatprep.subr.mxu0 %v610_v2 }
  0x18   : > { %577 = vmatmul.mubr.msk.f32.vlgmr.msra.gmra.mxu1 %vm209_vm0, %v196_v12  ;;  %580 = vmatpush3.msra.mxu0 %v528_v13 }
  0x19   : > { %581 = vmatprep.subr.mxu0 %v610_v2  ;;  %589 = vmatprep.mubr.msk.f32.mxu0 %vm611_vm1, %v610_v2 }
  0x1a   : > { %582 = vmatpush3.msra.mxu0 %v527_v14 }
  0x1b   : > { %583 = vmatprep.subr.mxu0 %v610_v2 }
  0x1c   : > { %584 = vmatpush3.msra.mxu0 %v526_v15 }
  0x1d   : > { %585 = vmatprep.subr.mxu0 %v610_v2 }
  0x1e   : > { %586 = vmatpush3.msra.mxu0 %v525_v16 }
  0x1f   : > { %587 = vmatprep.subr.mxu0 %v610_v2 }
  0x20   : > { %588 = vmatpush3.msra.mxu0 %v524_v17 }
  0x21   : > { %590 = vmatmul.mubr.msk.f32.vlgmr.msra.gmra.mxu0 %vm209_vm0, %v356_v18 }
  0xd6   : > { %v279_v19 = vpop.f32.mrf.mxu0 }
  0xd8   : > { %v352_v20 = vpop.f32.mrf.mxu1  ;;  %v565_v21 = vpop.f32.mrf.mxu0 }
  0xd9   : > { %v353_v23 = vadd.f32 %v352_v20, %v279_v19 }
  0xda   : > { %v578_v22 = vpop.f32.mrf.mxu1 }
  0xe1   : > { %v432_v24 = vpop.f32.mrf.mxu0 }
  0xe2   : > { %v436_v26 = vadd.f32 %v432_v24, %v353_v23 }
  0xe3   : > { %v591_v28 = vpop.f32.mrf.mxu0 }
  0xe4   : > { %v444_v29 = vmul.f32 %v530_v25, %v436_v26 }
  0xe6   : > { %v452_v30 = vadd.f32 %v531_v27, %v444_v29 }
  0xe8   : > { %v453_v31 = vmax.f32 %v452_v30, 0.0 }
  0xea   : > { %455 = vst.msk [vmem:[%s195_s8] sm:$0xff] %vm454_vm2, %v453_v31 }
  0xeb PF: > { %s14_s15 = sadd.s32 1, %s608_s15  }
  0xec   : > { %p11_p4 = scmp.ge.s32.totalorder %s14_s15, 4  }
  0xee   :  { %13 = sbr.rel (!%p11_p4) target bundleno = 1 (0x1), region = 68 }

// kernel: attention_module_stage1.51
= control target key start
LH: loop header
LB: loop body
LE: loop exit
PB: predicated region body
PF: predicated region fallthrough
CT: control target
= control target key end

     0   :  { %vm96_vm0 = vcmask 1043456   ;;  %vm47_vm1 = vcmask 31744   ;;  %vm245_vm2 = vcmask 130048   ;;  %s527_s2 = inlined_call_operand.vmem [shape: f32[4,16], index: 2, kind: input, shape index: {}]   ;;  %s528_s0 = inlined_call_operand.vmem [shape: f32[128,4], index: 0, kind: input, shape index: {}]   ;;  %s529_s1 = inlined_call_operand.vmem [shape: f32[128,16], index: 1, kind: input, shape index: {}]   ;;  %s530_s3 = inlined_call_operand.vmem [shape: f32[128,16], index: 3, kind: output, shape index: {}]  }
   0x1   :  { %v30_v0 = vld [vmem:[%s527_s2] sm:$0xf]  ;;  %v15_v3 = vld [vmem:[%s528_s0 + $0x8] sm:$0xff]  ;;  %v16_v5 = vld [vmem:[%s528_s0 + $0x10] sm:$0xff] }
   0x2   :  { %v14_v1 = vld [vmem:[%s528_s0] sm:$0xff]  ;;  %300 = vmatprep.subr.msk.mxu0 %vm96_vm0, %v30_v0  ;;  %326 = vmatprep.subr.msk.mxu1 %vm96_vm0, %v30_v0  ;;  %v23_v4 = vld [vmem:[%s528_s0 + $0x48] sm:$0xff]  ;;  %v24_v6 = vld [vmem:[%s528_s0 + $0x50] sm:$0xff] }
   0x3   :  { %v22_v2 = vld [vmem:[%s528_s0 + $0x40] sm:$0xff]  ;;  %301 = vmatpush3.msk.msra.mxu0 %vm96_vm0, %v30_v0  ;;  %327 = vmatpush3.msk.msra.mxu1 %vm96_vm0, %v30_v0  ;;  %v17_v7 = vld [vmem:[%s528_s0 + $0x18] sm:$0xff]  ;;  %v19_v11 = vld [vmem:[%s528_s0 + $0x28] sm:$0xff] }
   0x4   :  { %302 = vmatprep.mubr.msk.f32.mxu0 %vm47_vm1, %v14_v1  ;;  %314 = vmatprep.mubr.msk.f32.mxu1 %vm47_vm1, %v22_v2  ;;  %v25_v8 = vld [vmem:[%s528_s0 + $0x58] sm:$0xff]  ;;  %v18_v9 = vld [vmem:[%s528_s0 + $0x20] sm:$0xff]  ;;  %v27_v12 = vld [vmem:[%s528_s0 + $0x68] sm:$0xff] }
   0x5   :  { %303 = vmatmul.mubr.msk.f32.vlgmr.msra.gmra.mxu0 %vm47_vm1, %v15_v3  ;;  %315 = vmatmul.mubr.msk.f32.vlgmr.msra.gmra.mxu1 %vm47_vm1, %v23_v4  ;;  %v26_v10 = vld [vmem:[%s528_s0 + $0x60] sm:$0xff]  ;;  %v20_v13 = vld [vmem:[%s528_s0 + $0x30] sm:$0xff]  ;;  %v21_v15 = vld [vmem:[%s528_s0 + $0x38] sm:$0xff] }
   0x6   :  { %305 = vmatprep.mubr.msk.f32.mxu0 %vm47_vm1, %v16_v5  ;;  %317 = vmatprep.mubr.msk.f32.mxu1 %vm47_vm1, %v24_v6  ;;  %v28_v14 = vld [vmem:[%s528_s0 + $0x70] sm:$0xff]  ;;  %v29_v16 = vld [vmem:[%s528_s0 + $0x78] sm:$0xff]  ;;  %v32_v17 = vld [vmem:[%s529_s1 + $0x8] sm:$0xff] }
   0x7   :  { %v40_v18 = vld [vmem:[%s529_s1 + $0x48] sm:$0xff]  ;;  %v31_v21 = vld [vmem:[%s529_s1] sm:$0xff]  ;;  %v34_v27 = vld [vmem:[%s529_s1 + $0x18] sm:$0xff] }
   0x8   :  { %v39_v22 = vld [vmem:[%s529_s1 + $0x40] sm:$0xff]  ;;  %v42_v28 = vld [vmem:[%s529_s1 + $0x58] sm:$0xff]  ;;  %v33_v33 = vld [vmem:[%s529_s1 + $0x10] sm:$0xff] }
   0x9   :  { %306 = vmatmul.mubr.msk.f32.gmra.mxu0 %vm47_vm1, %v17_v7  ;;  %318 = vmatmul.mubr.msk.f32.gmra.mxu1 %vm47_vm1, %v25_v8  ;;  %v41_v34 = vld [vmem:[%s529_s1 + $0x50] sm:$0xff]  ;;  %v36_v39 = vld [vmem:[%s529_s1 + $0x28] sm:$0xff]  ;;  %v35_v45 = vld [vmem:[%s529_s1 + $0x20] sm:$0xff] }
   0xa   :  { %308 = vmatprep.mubr.msk.f32.mxu0 %vm47_vm1, %v18_v9  ;;  %320 = vmatprep.mubr.msk.f32.mxu1 %vm47_vm1, %v26_v10  ;;  %v44_v40 = vld [vmem:[%s529_s1 + $0x68] sm:$0xff]  ;;  %v43_v46 = vld [vmem:[%s529_s1 + $0x60] sm:$0xff]  ;;  %v38_v51 = vld [vmem:[%s529_s1 + $0x38] sm:$0xff] }
   0xb   :  { %v46_v52 = vld [vmem:[%s529_s1 + $0x78] sm:$0xff]  ;;  %v37_v57 = vld [vmem:[%s529_s1 + $0x30] sm:$0xff] }
   0xc   :  { %v45_v58 = vld [vmem:[%s529_s1 + $0x70] sm:$0xff] }
   0xd   :  { %309 = vmatmul.mubr.msk.f32.gmra.mxu0 %vm47_vm1, %v19_v11  ;;  %321 = vmatmul.mubr.msk.f32.gmra.mxu1 %vm47_vm1, %v27_v12 }
   0xe   :  { %311 = vmatprep.mubr.msk.f32.mxu0 %vm47_vm1, %v20_v13  ;;  %323 = vmatprep.mubr.msk.f32.mxu1 %vm47_vm1, %v28_v14 }
  0x11   :  { %312 = vmatmul.mubr.msk.f32.gmra.mxu0 %vm47_vm1, %v21_v15  ;;  %324 = vmatmul.mubr.msk.f32.gmra.mxu1 %vm47_vm1, %v29_v16 }
  0xc5   :  { %v304_v19 = vpop.f32.mrf.mxu0  ;;  %v316_v20 = vpop.f32.mrf.mxu1 }
  0xc6   :  { %v172_v23 = vadd.f32 %v304_v19, %v32_v17  ;;  %v212_v24 = vadd.f32 %v316_v20, %v40_v18 }
  0xc7   :  { %v166_v25 = vpop.f32.mrf.mxu0  ;;  %v206_v26 = vpop.f32.mrf.mxu1 }
  0xc8   :  { %247 = vst.msk [vmem:[%s530_s3 + $0x8] sm:$0xff] %vm245_vm2, %v172_v23  ;;  %255 = vst.msk [vmem:[%s530_s3 + $0x48] sm:$0xff] %vm245_vm2, %v212_v24  ;;  %v167_v29 = vadd.f32 %v166_v25, %v31_v21  ;;  %v207_v30 = vadd.f32 %v206_v26, %v39_v22 }
  0xc9   :  { %v307_v31 = vpop.f32.mrf.mxu0  ;;  %v319_v32 = vpop.f32.mrf.mxu1 }
  0xca   :  { %246 = vst.msk [vmem:[%s530_s3] sm:$0xff] %vm245_vm2, %v167_v29  ;;  %254 = vst.msk [vmem:[%s530_s3 + $0x40] sm:$0xff] %vm245_vm2, %v207_v30  ;;  %v182_v35 = vadd.f32 %v307_v31, %v34_v27  ;;  %v222_v36 = vadd.f32 %v319_v32, %v42_v28 }
  0xcb   :  { %v176_v37 = vpop.f32.mrf.mxu0  ;;  %v216_v38 = vpop.f32.mrf.mxu1 }
  0xcc   :  { %249 = vst.msk [vmem:[%s530_s3 + $0x18] sm:$0xff] %vm245_vm2, %v182_v35  ;;  %257 = vst.msk [vmem:[%s530_s3 + $0x58] sm:$0xff] %vm245_vm2, %v222_v36  ;;  %v177_v41 = vadd.f32 %v176_v37, %v33_v33  ;;  %v217_v42 = vadd.f32 %v216_v38, %v41_v34 }
  0xcd   :  { %v310_v43 = vpop.f32.mrf.mxu0  ;;  %v322_v44 = vpop.f32.mrf.mxu1 }
  0xce   :  { %248 = vst.msk [vmem:[%s530_s3 + $0x10] sm:$0xff] %vm245_vm2, %v177_v41  ;;  %256 = vst.msk [vmem:[%s530_s3 + $0x50] sm:$0xff] %vm245_vm2, %v217_v42  ;;  %v192_v47 = vadd.f32 %v310_v43, %v36_v39  ;;  %v232_v48 = vadd.f32 %v322_v44, %v44_v40 }
  0xcf   :  { %v186_v49 = vpop.f32.mrf.mxu0  ;;  %v226_v50 = vpop.f32.mrf.mxu1 }
  0xd0   :  { %251 = vst.msk [vmem:[%s530_s3 + $0x28] sm:$0xff] %vm245_vm2, %v192_v47  ;;  %259 = vst.msk [vmem:[%s530_s3 + $0x68] sm:$0xff] %vm245_vm2, %v232_v48  ;;  %v187_v53 = vadd.f32 %v186_v49, %v35_v45  ;;  %v227_v54 = vadd.f32 %v226_v50, %v43_v46 }
  0xd1   :  { %v313_v55 = vpop.f32.mrf.mxu0  ;;  %v325_v56 = vpop.f32.mrf.mxu1 }
  0xd2   :  { %250 = vst.msk [vmem:[%s530_s3 + $0x20] sm:$0xff] %vm245_vm2, %v187_v53  ;;  %258 = vst.msk [vmem:[%s530_s3 + $0x60] sm:$0xff] %vm245_vm2, %v227_v54  ;;  %v202_v59 = vadd.f32 %v313_v55, %v38_v51  ;;  %v242_v60 = vadd.f32 %v325_v56, %v46_v52 }
  0xd3   :  { %v196_v61 = vpop.f32.mrf.mxu0  ;;  %v236_v62 = vpop.f32.mrf.mxu1 }
  0xd4   :  { %253 = vst.msk [vmem:[%s530_s3 + $0x38] sm:$0xff] %vm245_vm2, %v202_v59  ;;  %261 = vst.msk [vmem:[%s530_s3 + $0x78] sm:$0xff] %vm245_vm2, %v242_v60  ;;  %v197_v63 = vadd.f32 %v196_v61, %v37_v57  ;;  %v237_v0 = vadd.f32 %v236_v62, %v45_v58 }
  0xd6   :  { %252 = vst.msk [vmem:[%s530_s3 + $0x30] sm:$0xff] %vm245_vm2, %v197_v63  ;;  %260 = vst.msk [vmem:[%s530_s3 + $0x70] sm:$0xff] %vm245_vm2, %v237_v0 }

// kernel: attention_module_stage1.55
= control target key start
LH: loop header
LB: loop body
LE: loop exit
PB: predicated region body
PF: predicated region fallthrough
CT: control target
= control target key end

     0   :  { %vm55_vm0 = vcmask 130048   ;;  %vm179_vm1 = vcmask 31744   ;;  %s293_s3 = inlined_call_operand.vmem [shape: f32[16,4], index: 3, kind: input, shape index: {}]   ;;  %s294_s0 = inlined_call_operand.vmem [shape: f32[32,16], index: 0, kind: input, shape index: {}]   ;;  %s295_s1 = inlined_call_operand.vmem [shape: f32[1,16], index: 1, kind: input, shape index: {}]   ;;  %s296_s2 = inlined_call_operand.vmem [shape: f32[1,16], index: 2, kind: input, shape index: {}]   ;;  %s297_s4 = inlined_call_operand.vmem [shape: f32[1,4], index: 4, kind: input, shape index: {}]   ;;  %s298_s5 = inlined_call_operand.vmem [shape: f32[1,4], index: 5, kind: input, shape index: {}]   ;;  %s299_s6 = inlined_call_operand.vmem [shape: f32[32,4], index: 6, kind: output, shape index: {}]  }
   0x1   :  { %v54_v0 = vld [vmem:[%s293_s3 + $0x8] sm:$0xff]  ;;  %v53_v1 = vld [vmem:[%s293_s3] sm:$0xff]  ;;  %v25_v5 = vld [vmem:[%s294_s0 + $0x10] sm:$0xff] }
   0x2   :  { %v23_v2 = vld [vmem:[%s294_s0] sm:$0xff]  ;;  %202 = vmatprep.subr.mxu0 %v54_v0  ;;  %212 = vmatprep.subr.mxu1 %v54_v0  ;;  %v24_v8 = vld [vmem:[%s294_s0 + $0x8] sm:$0xff]  ;;  %v26_v9 = vld [vmem:[%s294_s0 + $0x18] sm:$0xff] }
   0x3   :  { %v188_v3 = vld [vmem:[%s295_s1] ss:$0 sm:$0xff]  ;;  %203 = vmatpush3.msra.mxu0 %v54_v0  ;;  %214 = vmatpush3.msra.mxu1 %v54_v0 }
   0x4   :  { %v189_v4 = vld [vmem:[%s296_s2] ss:$0 sm:$0xff]  ;;  %v34_v6 = vmul.f32 %v188_v3, %v23_v2  ;;  %v36_v7 = vmul.f32 %v188_v3, %v25_v5  ;;  %204 = vmatprep.subr.mxu0 %v53_v1  ;;  %213 = vmatprep.subr.mxu1 %v53_v1  ;;  %v35_v10 = vmul.f32 %v188_v3, %v24_v8 }
   0x5   :  { %v37_v11 = vmul.f32 %v188_v3, %v26_v9  ;;  %205 = vmatpush3.msra.mxu0 %v53_v1  ;;  %215 = vmatpush3.msra.mxu1 %v53_v1  ;;  %v194_v20 = vld [vmem:[%s297_s4] ss:$0 sm:$0xff] }
   0x6   :  { %v45_v12 = vadd.f32 %v189_v4, %v34_v6  ;;  %v47_v13 = vadd.f32 %v189_v4, %v36_v7  ;;  %v46_v14 = vadd.f32 %v189_v4, %v35_v10  ;;  %v195_v22 = vld [vmem:[%s298_s5] ss:$0 sm:$0xff] }
   0x7   :  { %v48_v15 = vadd.f32 %v189_v4, %v37_v11 }
   0x8   :  { %v49_v16 = vmax.f32 %v45_v12, 0.0  ;;  %v51_v17 = vmax.f32 %v47_v13, 0.0  ;;  %v50_v18 = vmax.f32 %v46_v14, 0.0 }
   0x9   :  { %v52_v19 = vmax.f32 %v48_v15, 0.0 }
   0xa   :  { %206 = vmatprep.mubr.msk.f32.mxu0 %vm55_vm0, %v49_v16  ;;  %209 = vmatprep.mubr.msk.f32.mxu1 %vm55_vm0, %v51_v17 }
   0xb   :  { %207 = vmatmul.mubr.msk.f32.vlgmr.msra.gmra.mxu0 %vm55_vm0, %v50_v18  ;;  %210 = vmatmul.mubr.msk.f32.vlgmr.msra.gmra.mxu1 %vm55_vm0, %v52_v19 }
  0xcb   :  { %v208_v21 = vpop.f32.mrf.mxu0  ;;  %v211_v23 = vpop.f32.mrf.mxu1 }
  0xcc   :  { %v161_v24 = vmul.f32 %v208_v21, %v194_v20  ;;  %v163_v25 = vmul.f32 %v211_v23, %v194_v20 }
  0xcd   :  { %v134_v26 = vpop.f32.mrf.mxu0  ;;  %v144_v27 = vpop.f32.mrf.mxu1 }
  0xce   :  { %v172_v28 = vadd.f32 %v195_v22, %v161_v24  ;;  %v174_v29 = vadd.f32 %v195_v22, %v163_v25  ;;  %v160_v30 = vmul.f32 %v194_v20, %v134_v26  ;;  %v162_v31 = vmul.f32 %v194_v20, %v144_v27 }
  0xd0   :  { %v176_v32 = vmax.f32 %v172_v28, 0.0  ;;  %v178_v33 = vmax.f32 %v174_v29, 0.0  ;;  %v171_v34 = vadd.f32 %v195_v22, %v160_v30  ;;  %v173_v35 = vadd.f32 %v195_v22, %v162_v31 }
  0xd2   :  { %181 = vst.msk [vmem:[%s299_s6 + $0x8] sm:$0xff] %vm179_vm1, %v176_v32  ;;  %183 = vst.msk [vmem:[%s299_s6 + $0x18] sm:$0xff] %vm179_vm1, %v178_v33  ;;  %v175_v36 = vmax.f32 %v171_v34, 0.0  ;;  %v177_v37 = vmax.f32 %v173_v35, 0.0 }
  0xd4   :  { %180 = vst.msk [vmem:[%s299_s6] sm:$0xff] %vm179_vm1, %v175_v36  ;;  %182 = vst.msk [vmem:[%s299_s6 + $0x10] sm:$0xff] %vm179_vm1, %v177_v37 }

// kernel: attention_module_stage1.56
= control target key start
LH: loop header
LB: loop body
LE: loop exit
PB: predicated region body
PF: predicated region fallthrough
CT: control target
= control target key end

     0   :  { %s604_s15 = smov 0   ;;  %s664_s0 = inlined_call_operand.vmem [shape: f32[2,6,24], index: 0, kind: input, shape index: {}]   ;;  %s665_s1 = inlined_call_operand.vmem [shape: f32[3,24,16], index: 1, kind: input, shape index: {}]   ;;  %s666_s2 = inlined_call_operand.vmem [shape: f32[1,16], index: 2, kind: input, shape index: {}]   ;;  %s667_s3 = inlined_call_operand.vmem [shape: f32[1,16], index: 3, kind: input, shape index: {}]   ;;  %s668_s4 = inlined_call_operand.vmem [shape: f32[2,4,16], index: 4, kind: output, shape index: {}]  }
   0x1 LB: > { %s500_s16 = sadd.s32 4294967295, %s575_s15   ;;  %p504_p0 = scmp.ge.s32.totalorder %s575_s15, 1  ;;  %s575_s15 = sphi %s604_s15, %s14_s15  }
   0x2   : > { %p161_p1 = scmp.lt.s32.totalorder %s575_s15, 3 }
   0x4   : > { %p162_p2 = pnand %p504_p0, %p161_p1 }
   0x5   : > { %p185_p3 = scmp.lt.s32.totalorder (!%p162_p2), %s500_s16, 1 }
   0x6   : > { %165 = sbr.rel (%p162_p2) target bundleno = 227 (0xe3), region = 36 }
   0xb   : > { %v509_v0 = vld [vmem:[%s665_s1 + $0x28] sm:$0xff]  ;;  %v196_v1 = vld [vmem:[%s665_s1 + $0x10] sm:$0xff]  ;;  %v577_v2 = vmov 0.0   ;;  %v508_v3 = vld [vmem:[%s665_s1 + $0x20] sm:$0xff]  ;;  %s670_s16 = smov (!%p185_p3, %s500_s16), 1  ;;  %vm202_vm0 = vcmask 195584  }
   0xc   : > { %532 = vmatprep.subr.mxu0 %v577_v2  ;;  %541 = vmatprep.subr.mxu1 %v577_v2  ;;  %v195_v4 = vld [vmem:[%s665_s1 + $0x8] sm:$0xff]  ;;  %v507_v5 = vld [vmem:[%s665_s1 + $0x18] sm:$0xff]  ;;  %s505_s27 = sshll.u32 %s670_s16, 3  ;;  %v194_v6 = vld [vmem:[%s665_s1] sm:$0xff]  ;;  %vm578_vm1 = vmmov 0   ;;  %s506_s19 = sshll.u32 %s670_s16, 2 }
   0xd   : > { %533 = vmatpush3.msra.mxu0 %v509_v0  ;;  %542 = vmatpush3.msra.mxu1 %v196_v1  ;;  %s188_s6 = scalar_lea.vmem %s664_s0, %s505_s27  ;;  %v514_v9 = vld [vmem:[%s665_s1 + $0x40] sm:$0xff]  ;;  %v513_v10 = vld [vmem:[%s665_s1 + $0x38] sm:$0xff]  ;;  %v512_v11 = vld [vmem:[%s665_s1 + $0x30] sm:$0xff]  ;;  %s192_s22 = scalar_lea.vmem %s668_s4, %s506_s19  ;;  %vm445_vm2 = vcmask 125952  }
   0xe   : > { %534 = vmatprep.subr.mxu0 %v577_v2  ;;  %543 = vmatprep.subr.mxu1 %v577_v2  ;;  %v197_v7 = vld [vmem:[%s188_s6 + $0x1] sm:$0xf]  ;;  %v516_v19 = vld [vmem:[%s666_s2] ss:$0 sm:$0xff] }
   0xf   : > { %535 = vmatpush3.msra.mxu0 %v508_v3  ;;  %544 = vmatpush3.msra.mxu1 %v195_v4  ;;  %v193_v8 = vld [vmem:[%s188_s6] sm:$0xf] }
  0x10   : > { %536 = vmatprep.subr.mxu0 %v577_v2  ;;  %538 = vmatprep.mubr.msk.f32.mxu0 %vm578_vm1, %v577_v2  ;;  %v349_v12 = vld [vmem:[%s188_s6 + $0x2] sm:$0xf]  ;;  %v517_v21 = vld [vmem:[%s667_s3] ss:$0 sm:$0xff] }
  0x11   : > { %537 = vmatpush3.msra.mxu0 %v507_v5  ;;  %545 = vmatprep.subr.mxu1 %v577_v2 }
  0x12   : > { %539 = vmatmul.mubr.msk.f32.vlgmr.msra.gmra.mxu0 %vm202_vm0, %v197_v7  ;;  %546 = vmatpush3.msra.mxu1 %v194_v6 }
  0x13   : > { %547 = vmatprep.mubr.msk.f32.mxu1 %vm578_vm1, %v577_v2  ;;  %550 = vmatprep.subr.mxu0 %v577_v2 }
  0x14   : > { %548 = vmatmul.mubr.msk.f32.vlgmr.msra.gmra.mxu1 %vm202_vm0, %v193_v8  ;;  %551 = vmatpush3.msra.mxu0 %v514_v9 }
  0x15   : > { %552 = vmatprep.subr.mxu0 %v577_v2  ;;  %556 = vmatprep.mubr.msk.f32.mxu0 %vm578_vm1, %v577_v2 }
  0x16   : > { %553 = vmatpush3.msra.mxu0 %v513_v10 }
  0x17   : > { %554 = vmatprep.subr.mxu0 %v577_v2 }
  0x18   : > { %555 = vmatpush3.msra.mxu0 %v512_v11 }
  0x19   : > { %557 = vmatmul.mubr.msk.f32.vlgmr.msra.gmra.mxu0 %vm202_vm0, %v349_v12 }
  0xd2   : > { %v272_v13 = vpop.f32.mrf.mxu0 }
  0xd4   : > { %v345_v14 = vpop.f32.mrf.mxu1  ;;  %v540_v15 = vpop.f32.mrf.mxu0 }
  0xd5   : > { %v346_v17 = vadd.f32 %v345_v14, %v272_v13 }
  0xd6   : > { %v549_v16 = vpop.f32.mrf.mxu1 }
  0xd9   : > { %v423_v18 = vpop.f32.mrf.mxu0 }
  0xda   : > { %v427_v20 = vadd.f32 %v423_v18, %v346_v17 }
  0xdb   : > { %v558_v22 = vpop.f32.mrf.mxu0 }
  0xdc   : > { %v435_v23 = vmul.f32 %v516_v19, %v427_v20 }
  0xde   : > { %v443_v24 = vadd.f32 %v517_v21, %v435_v23 }
  0xe0   : > { %v444_v25 = vmax.f32 %v443_v24, 0.0 }
  0xe2   : > { %446 = vst.msk [vmem:[%s192_s22] sm:$0xf] %vm445_vm2, %v444_v25 }
  0xe3 PF: > { %s14_s15 = sadd.s32 1, %s575_s15  }
  0xe4   : > { %p11_p4 = scmp.ge.s32.totalorder %s14_s15, 4  }
  0xe6   :  { %13 = sbr.rel (!%p11_p4) target bundleno = 1 (0x1), region = 68 }

// kernel: attention_module_stage1.57
= control target key start
LH: loop header
LB: loop body
LE: loop exit
PB: predicated region body
PF: predicated region fallthrough
CT: control target
= control target key end

     0   :  { %vm36_vm0 = vcmask 1043456   ;;  %vm23_vm1 = vcmask 31744   ;;  %vm125_vm2 = vcmask 130048   ;;  %s213_s2 = inlined_call_operand.vmem [shape: f32[4,16], index: 2, kind: input, shape index: {}]   ;;  %s214_s0 = inlined_call_operand.vmem [shape: f32[32,4], index: 0, kind: input, shape index: {}]   ;;  %s215_s1 = inlined_call_operand.vmem [shape: f32[32,16], index: 1, kind: input, shape index: {}]   ;;  %s216_s3 = inlined_call_operand.vmem [shape: f32[32,16], index: 3, kind: output, shape index: {}]  }
   0x1   :  { %v18_v0 = vld [vmem:[%s213_s2] sm:$0xf]  ;;  %v16_v2 = vld [vmem:[%s214_s0 + $0x10] sm:$0xff]  ;;  %v15_v3 = vld [vmem:[%s214_s0 + $0x8] sm:$0xff] }
   0x2   :  { %v14_v1 = vld [vmem:[%s214_s0] sm:$0xff]  ;;  %144 = vmatprep.subr.msk.mxu0 %vm36_vm0, %v18_v0  ;;  %152 = vmatprep.subr.msk.mxu1 %vm36_vm0, %v18_v0  ;;  %v17_v4 = vld [vmem:[%s214_s0 + $0x18] sm:$0xff]  ;;  %v20_v5 = vld [vmem:[%s215_s1 + $0x8] sm:$0xff] }
   0x3   :  { %145 = vmatpush3.msk.msra.mxu0 %vm36_vm0, %v18_v0  ;;  %153 = vmatpush3.msk.msra.mxu1 %vm36_vm0, %v18_v0  ;;  %v22_v6 = vld [vmem:[%s215_s1 + $0x18] sm:$0xff]  ;;  %v19_v9 = vld [vmem:[%s215_s1] sm:$0xff]  ;;  %v21_v10 = vld [vmem:[%s215_s1 + $0x10] sm:$0xff] }
   0x4   :  { %146 = vmatprep.mubr.msk.f32.mxu0 %vm23_vm1, %v14_v1  ;;  %149 = vmatprep.mubr.msk.f32.mxu1 %vm23_vm1, %v16_v2 }
   0x5   :  { %147 = vmatmul.mubr.msk.f32.vlgmr.msra.gmra.mxu0 %vm23_vm1, %v15_v3  ;;  %150 = vmatmul.mubr.msk.f32.vlgmr.msra.gmra.mxu1 %vm23_vm1, %v17_v4 }
  0xc5   :  { %v148_v7 = vpop.f32.mrf.mxu0  ;;  %v151_v8 = vpop.f32.mrf.mxu1 }
  0xc6   :  { %v112_v11 = vadd.f32 %v148_v7, %v20_v5  ;;  %v122_v12 = vadd.f32 %v151_v8, %v22_v6 }
  0xc7   :  { %v106_v13 = vpop.f32.mrf.mxu0  ;;  %v116_v14 = vpop.f32.mrf.mxu1 }
  0xc8   :  { %127 = vst.msk [vmem:[%s216_s3 + $0x8] sm:$0xff] %vm125_vm2, %v112_v11  ;;  %129 = vst.msk [vmem:[%s216_s3 + $0x18] sm:$0xff] %vm125_vm2, %v122_v12  ;;  %v107_v15 = vadd.f32 %v106_v13, %v19_v9  ;;  %v117_v16 = vadd.f32 %v116_v14, %v21_v10 }
  0xca   :  { %126 = vst.msk [vmem:[%s216_s3] sm:$0xff] %vm125_vm2, %v107_v15  ;;  %128 = vst.msk [vmem:[%s216_s3 + $0x10] sm:$0xff] %vm125_vm2, %v117_v16 }

// kernel: attention_module_stage1.61
= control target key start
LH: loop header
LB: loop body
LE: loop exit
PB: predicated region body
PF: predicated region fallthrough
CT: control target
= control target key end

     0   :  { %v157_v0 = vmov 0.0   ;;  %vm158_vm0 = vmmov 0   ;;  %vm43_vm1 = vcmask 130048   ;;  %vm134_vm2 = vcmask 31744   ;;  %s218_s3 = inlined_call_operand.vmem [shape: f32[16,4], index: 3, kind: input, shape index: {}]   ;;  %s219_s0 = inlined_call_operand.vmem [shape: f32[8,16], index: 0, kind: input, shape index: {}]   ;;  %s220_s1 = inlined_call_operand.vmem [shape: f32[1,16], index: 1, kind: input, shape index: {}]   ;;  %s221_s2 = inlined_call_operand.vmem [shape: f32[1,16], index: 2, kind: input, shape index: {}]   ;;  %s222_s4 = inlined_call_operand.vmem [shape: f32[1,4], index: 4, kind: input, shape index: {}]   ;;  %s223_s5 = inlined_call_operand.vmem [shape: f32[1,4], index: 5, kind: input, shape index: {}]   ;;  %s224_s6 = inlined_call_operand.vmem [shape: f32[8,4], index: 6, kind: output, shape index: {}]  }
   0x1   :  { %148 = vmatprep.subr.mxu0 %v157_v0  ;;  %v42_v1 = vld [vmem:[%s218_s3 + $0x8] sm:$0xff]  ;;  %v41_v2 = vld [vmem:[%s218_s3] sm:$0xff]  ;;  %152 = vmatprep.mubr.msk.f32.mxu0 %vm158_vm0, %v157_v0 }
   0x2   :  { %v23_v3 = vld [vmem:[%s219_s0] sm:$0xff]  ;;  %149 = vmatpush3.msra.mxu0 %v42_v1 }
   0x3   :  { %v140_v4 = vld [vmem:[%s220_s1] ss:$0 sm:$0xff]  ;;  %150 = vmatprep.subr.mxu0 %v157_v0 }
   0x4   :  { %v141_v5 = vld [vmem:[%s221_s2] ss:$0 sm:$0xff]  ;;  %v31_v6 = vmul.f32 %v140_v4, %v23_v3  ;;  %151 = vmatpush3.msra.mxu0 %v41_v2 }
   0x5   :  { %v143_v9 = vld [vmem:[%s222_s4] ss:$0 sm:$0xff] }
   0x6   :  { %v39_v7 = vadd.f32 %v141_v5, %v31_v6  ;;  %v144_v11 = vld [vmem:[%s223_s5] ss:$0 sm:$0xff] }
   0x8   :  { %v40_v8 = vmax.f32 %v39_v7, 0.0 }
   0xa   :  { %153 = vmatmul.mubr.msk.f32.vlgmr.msra.gmra.mxu0 %vm43_vm1, %v40_v8 }
  0xca   :  { %v113_v10 = vpop.f32.mrf.mxu0 }
  0xcb   :  { %v124_v12 = vmul.f32 %v143_v9, %v113_v10 }
  0xcc   :  { %v154_v13 = vpop.f32.mrf.mxu0 }
  0xcd   :  { %v132_v14 = vadd.f32 %v144_v11, %v124_v12 }
  0xcf   :  { %v133_v15 = vmax.f32 %v132_v14, 0.0 }
  0xd1   :  { %135 = vst.msk [vmem:[%s224_s6] sm:$0xff] %vm134_vm2, %v133_v15 }

// kernel: attention_module_stage1.63
= control target key start
LH: loop header
LB: loop body
LE: loop exit
PB: predicated region body
PF: predicated region fallthrough
CT: control target
= control target key end

     0   :  { %vm21_vm0 = vcmask 1043456   ;;  %vm17_vm1 = vcmask 31744   ;;  %v112_v0 = vmov 0.0   ;;  %vm113_vm2 = vmmov 0   ;;  %s146_s2 = inlined_call_operand.vmem [shape: f32[4,16], index: 2, kind: input, shape index: {}]   ;;  %s147_s0 = inlined_call_operand.vmem [shape: f32[8,4], index: 0, kind: input, shape index: {}]   ;;  %s148_s1 = inlined_call_operand.vmem [shape: f32[8,16], index: 1, kind: input, shape index: {}]   ;;  %s149_s3 = inlined_call_operand.vmem [shape: f32[8,16], index: 3, kind: output, shape index: {}]  }
   0x1   :  { %105 = vmatprep.subr.mxu0 %v112_v0  ;;  %v15_v1 = vld [vmem:[%s146_s2] sm:$0xf]  ;;  %107 = vmatprep.mubr.msk.f32.mxu0 %vm113_vm2, %v112_v0  ;;  %vm95_vm3 = vcmask 130048  }
   0x2   :  { %v14_v2 = vld [vmem:[%s147_s0] sm:$0xff]  ;;  %106 = vmatpush3.msk.msra.mxu0 %vm21_vm0, %v15_v1 }
   0x3   :  { %108 = vmatmul.mubr.msk.f32.vlgmr.msra.gmra.mxu0 %vm17_vm1, %v14_v2  ;;  %v16_v3 = vld [vmem:[%s148_s1] sm:$0xff] }
  0xc3   :  { %v91_v4 = vpop.f32.mrf.mxu0 }
  0xc4   :  { %v92_v5 = vadd.f32 %v91_v4, %v16_v3 }
  0xc5   :  { %v109_v6 = vpop.f32.mrf.mxu0 }
  0xc6   :  { %96 = vst.msk [vmem:[%s149_s3] sm:$0xff] %vm95_vm3, %v92_v5 }

// kernel: attention_module_stage1.62
= control target key start
LH: loop header
LB: loop body
LE: loop exit
PB: predicated region body
PF: predicated region fallthrough
CT: control target
= control target key end

     0   :  { %s590_s15 = smov 0   ;;  %s638_s0 = inlined_call_operand.vmem [shape: f32[2,4,16], index: 0, kind: input, shape index: {}]   ;;  %s639_s1 = inlined_call_operand.vmem [shape: f32[3,16,8], index: 1, kind: input, shape index: {}]   ;;  %s640_s2 = inlined_call_operand.vmem [shape: f32[1,8], index: 2, kind: input, shape index: {}]   ;;  %s641_s3 = inlined_call_operand.vmem [shape: f32[1,8], index: 3, kind: input, shape index: {}]   ;;  %s642_s4 = inlined_call_operand.vmem [shape: f32[2,2,8], index: 4, kind: output, shape index: {}]  }
   0x1 LB: > { %s497_s16 = sadd.s32 4294967295, %s561_s15   ;;  %p501_p0 = scmp.ge.s32.totalorder %s561_s15, 1  ;;  %s561_s15 = sphi %s590_s15, %s14_s15  }
   0x2   : > { %p161_p1 = scmp.lt.s32.totalorder %s561_s15, 3 }
   0x4   : > { %p162_p2 = pnand %p501_p0, %p161_p1 }
   0x5   : > { %p185_p3 = scmp.lt.s32.totalorder (!%p162_p2), %s497_s16, 1 }
   0x6   : > { %165 = sbr.rel (%p162_p2) target bundleno = 223 (0xdf), region = 36 }
   0xb   : > { %v505_v0 = vld [vmem:[%s639_s1 + $0x18] sm:$0xff]  ;;  %v195_v1 = vld [vmem:[%s639_s1 + $0x8] sm:$0xff]  ;;  %v563_v2 = vmov 0.0   ;;  %v504_v3 = vld [vmem:[%s639_s1 + $0x10] sm:$0xff]  ;;  %s644_s16 = smov (!%p185_p3, %s497_s16), 1  ;;  %vm564_vm0 = vmmov 0  }
   0xc   : > { %524 = vmatprep.subr.mxu0 %v563_v2  ;;  %531 = vmatprep.subr.mxu1 %v563_v2  ;;  %v194_v4 = vld [vmem:[%s639_s1] sm:$0xff]  ;;  %s502_s25 = sshll.u32 %s644_s16, 2  ;;  %vm200_vm1 = vcmask 130048   ;;  %v509_v5 = vld [vmem:[%s639_s1 + $0x28] sm:$0xff]  ;;  %s503_s11 = sshll.u32 %s644_s16, 1  ;;  %vm442_vm2 = vcmask 58368  }
   0xd   : > { %525 = vmatpush3.msra.mxu0 %v505_v0  ;;  %532 = vmatpush3.msra.mxu1 %v195_v1  ;;  %s188_s28 = scalar_lea.vmem %s638_s0, %s502_s25  ;;  %v508_v8 = vld [vmem:[%s639_s1 + $0x20] sm:$0xff]  ;;  %s192_s14 = scalar_lea.vmem %s642_s4, %s503_s11 }
   0xe   : > { %526 = vmatprep.subr.mxu0 %v563_v2  ;;  %533 = vmatprep.subr.mxu1 %v563_v2  ;;  %v196_v6 = vld [vmem:[%s188_s28 + $0x1] sm:$0x3]  ;;  %v511_v16 = vld [vmem:[%s640_s2] ss:$0 sm:$0xff] }
   0xf   : > { %527 = vmatpush3.msra.mxu0 %v504_v3  ;;  %528 = vmatprep.mubr.msk.f32.mxu0 %vm564_vm0, %v563_v2  ;;  %v193_v7 = vld [vmem:[%s188_s28] sm:$0x3]  ;;  %v347_v9 = vld [vmem:[%s188_s28 + $0x2] sm:$0x3] }
  0x10   : > { %534 = vmatpush3.msra.mxu1 %v194_v4  ;;  %535 = vmatprep.mubr.msk.f32.mxu1 %vm564_vm0, %v563_v2  ;;  %v512_v18 = vld [vmem:[%s641_s3] ss:$0 sm:$0xff] }
  0x11   : > { %538 = vmatprep.subr.mxu0 %v563_v2  ;;  %529 = vmatmul.mubr.msk.f32.vlgmr.msra.gmra.mxu0 %vm200_vm1, %v196_v6 }
  0x12   : > { %536 = vmatmul.mubr.msk.f32.vlgmr.msra.gmra.mxu1 %vm200_vm1, %v193_v7  ;;  %539 = vmatpush3.msra.mxu0 %v509_v5 }
  0x13   : > { %542 = vmatprep.mubr.msk.f32.mxu0 %vm564_vm0, %v563_v2  ;;  %540 = vmatprep.subr.mxu0 %v563_v2 }
  0x14   : > { %541 = vmatpush3.msra.mxu0 %v508_v8 }
  0x15   : > { %543 = vmatmul.mubr.msk.f32.vlgmr.msra.gmra.mxu0 %vm200_vm1, %v347_v9 }
  0xd1   : > { %v270_v10 = vpop.f32.mrf.mxu0 }
  0xd2   : > { %v343_v11 = vpop.f32.mrf.mxu1 }
  0xd3   : > { %v530_v12 = vpop.f32.mrf.mxu0  ;;  %v344_v14 = vadd.f32 %v343_v11, %v270_v10 }
  0xd4   : > { %v537_v13 = vpop.f32.mrf.mxu1 }
  0xd5   : > { %v420_v15 = vpop.f32.mrf.mxu0 }
  0xd6   : > { %v424_v17 = vadd.f32 %v420_v15, %v344_v14 }
  0xd7   : > { %v544_v19 = vpop.f32.mrf.mxu0 }
  0xd8   : > { %v432_v20 = vmul.f32 %v511_v16, %v424_v17 }
  0xda   : > { %v440_v21 = vadd.f32 %v512_v18, %v432_v20 }
  0xdc   : > { %v441_v22 = vmax.f32 %v440_v21, 0.0 }
  0xde   : > { %443 = vst.msk [vmem:[%s192_s14] sm:$0x3] %vm442_vm2, %v441_v22 }
  0xdf PF: > { %s14_s15 = sadd.s32 1, %s561_s15  }
  0xe0   : > { %p11_p4 = scmp.ge.s32.totalorder %s14_s15, 4  }
  0xe2   :  { %13 = sbr.rel (!%p11_p4) target bundleno = 1 (0x1), region = 68 }

// kernel: attention_module_stage1.67
= control target key start
LH: loop header
LB: loop body
LE: loop exit
PB: predicated region body
PF: predicated region fallthrough
CT: control target
= control target key end

     0   :  { %vm29_vm0 = vcmask 1043456   ;;  %vm22_vm1 = vcmask 31744   ;;  %vm112_vm2 = vcmask 261120   ;;  %s182_s1 = inlined_call_operand.vmem [shape: f32[4,32], index: 1, kind: input, shape index: {}]   ;;  %s183_s0 = inlined_call_operand.vmem [shape: f32[16,4], index: 0, kind: input, shape index: {}]   ;;  %s184_s2 = inlined_call_operand.vmem [shape: f32[16,32], index: 2, kind: input, shape index: {}]   ;;  %s185_s3 = inlined_call_operand.vmem [shape: f32[16,32], index: 3, kind: input, shape index: {}]   ;;  %s186_s4 = inlined_call_operand.vmem [shape: f32[16,32], index: 4, kind: output, shape index: {}]  }
   0x1   :  { %v19_v0 = vld [vmem:[%s182_s1] sm:$0xf]  ;;  %v18_v2 = vld [vmem:[%s183_s0 + $0x8] sm:$0xff] }
   0x2   :  { %v17_v1 = vld [vmem:[%s183_s0] sm:$0xff]  ;;  %125 = vmatprep.subr.msk.mxu0 %vm29_vm0, %v19_v0  ;;  %v21_v3 = vld [vmem:[%s184_s2 + $0x8] sm:$0xff] }
   0x3   :  { %127 = vmatprep.mubr.msk.f32.mxu0 %vm22_vm1, %v17_v1  ;;  %126 = vmatpush3.msk.msra.mxu0 %vm29_vm0, %v19_v0  ;;  %v109_v5 = vld [vmem:[%s185_s3 + $0x8] sm:$0xff]  ;;  %v20_v6 = vld [vmem:[%s184_s2] sm:$0xff] }
   0x4   :  { %128 = vmatmul.mubr.msk.f32.vlgmr.msra.gmra.mxu0 %vm22_vm1, %v18_v2  ;;  %v108_v9 = vld [vmem:[%s185_s3] sm:$0xff] }
  0xc4   :  { %v129_v4 = vpop.f32.mrf.mxu0 }
  0xc5   :  { %v105_v7 = vadd.f32 %v129_v4, %v21_v3 }
  0xc6   :  { %v99_v8 = vpop.f32.mrf.mxu0 }
  0xc7   :  { %v111_v10 = vadd.f32 %v109_v5, %v105_v7  ;;  %v100_v11 = vadd.f32 %v99_v8, %v20_v6 }
  0xc9   :  { %114 = vst.msk [vmem:[%s186_s4 + $0x8] sm:$0xff] %vm112_vm2, %v111_v10  ;;  %v110_v12 = vadd.f32 %v108_v9, %v100_v11 }
  0xcb   :  { %113 = vst.msk [vmem:[%s186_s4] sm:$0xff] %vm112_vm2, %v110_v12 }

// kernel: attention_module_stage1.71
= control target key start
LH: loop header
LB: loop body
LE: loop exit
PB: predicated region body
PF: predicated region fallthrough
CT: control target
= control target key end

     0   :  { %vm35_vm0 = vcmask 130048   ;;  %vm181_vm1 = vcmask 261120   ;;  %s375_s1 = inlined_call_operand.vmem [shape: f32[16,32], index: 1, kind: input, shape index: {}]   ;;  %s376_s0 = inlined_call_operand.vmem [shape: f32[64,16], index: 0, kind: input, shape index: {}]   ;;  %s377_s2 = inlined_call_operand.vmem [shape: f32[64,32], index: 2, kind: input, shape index: {}]   ;;  %s378_s3 = inlined_call_operand.vmem [shape: f32[64,32], index: 3, kind: input, shape index: {}]   ;;  %s379_s4 = inlined_call_operand.vmem [shape: f32[64,32], index: 4, kind: output, shape index: {}]  }
   0x1   :  { %v26_v0 = vld [vmem:[%s375_s1 + $0x8] sm:$0xff]  ;;  %v25_v1 = vld [vmem:[%s375_s1] sm:$0xff]  ;;  %v19_v6 = vld [vmem:[%s376_s0 + $0x10] sm:$0xff] }
   0x2   :  { %212 = vmatprep.subr.mxu0 %v26_v0  ;;  %228 = vmatprep.subr.mxu1 %v26_v0  ;;  %v17_v2 = vld [vmem:[%s376_s0] sm:$0xff]  ;;  %v18_v4 = vld [vmem:[%s376_s0 + $0x8] sm:$0xff]  ;;  %v23_v7 = vld [vmem:[%s376_s0 + $0x30] sm:$0xff] }
   0x3   :  { %213 = vmatpush3.msra.mxu0 %v26_v0  ;;  %230 = vmatpush3.msra.mxu1 %v26_v0  ;;  %v21_v3 = vld [vmem:[%s376_s0 + $0x20] sm:$0xff]  ;;  %v22_v5 = vld [vmem:[%s376_s0 + $0x28] sm:$0xff]  ;;  %v20_v8 = vld [vmem:[%s376_s0 + $0x18] sm:$0xff] }
   0x4   :  { %214 = vmatprep.subr.mxu0 %v25_v1  ;;  %229 = vmatprep.subr.mxu1 %v25_v1  ;;  %v24_v9 = vld [vmem:[%s376_s0 + $0x38] sm:$0xff]  ;;  %v28_v10 = vld [vmem:[%s377_s2 + $0x8] sm:$0xff]  ;;  %v27_v16 = vld [vmem:[%s377_s2] sm:$0xff] }
   0x5   :  { %215 = vmatpush3.msra.mxu0 %v25_v1  ;;  %231 = vmatpush3.msra.mxu1 %v25_v1  ;;  %v32_v11 = vld [vmem:[%s377_s2 + $0x28] sm:$0xff]  ;;  %v31_v17 = vld [vmem:[%s377_s2 + $0x20] sm:$0xff]  ;;  %v30_v24 = vld [vmem:[%s377_s2 + $0x18] sm:$0xff] }
   0x6   :  { %216 = vmatprep.mubr.msk.f32.mxu0 %vm35_vm0, %v17_v2  ;;  %222 = vmatprep.mubr.msk.f32.mxu1 %vm35_vm0, %v21_v3  ;;  %v166_v12 = vld [vmem:[%s378_s3 + $0x8] sm:$0xff]  ;;  %v165_v20 = vld [vmem:[%s378_s3] sm:$0xff]  ;;  %v34_v25 = vld [vmem:[%s377_s2 + $0x38] sm:$0xff] }
   0x7   :  { %217 = vmatmul.mubr.msk.f32.vlgmr.msra.gmra.mxu0 %vm35_vm0, %v18_v4  ;;  %223 = vmatmul.mubr.msk.f32.vlgmr.msra.gmra.mxu1 %vm35_vm0, %v22_v5  ;;  %v170_v15 = vld [vmem:[%s378_s3 + $0x28] sm:$0xff]  ;;  %v169_v23 = vld [vmem:[%s378_s3 + $0x20] sm:$0xff]  ;;  %v168_v30 = vld [vmem:[%s378_s3 + $0x18] sm:$0xff] }
   0x8   :  { %219 = vmatprep.mubr.msk.f32.mxu0 %vm35_vm0, %v19_v6  ;;  %225 = vmatprep.mubr.msk.f32.mxu1 %vm35_vm0, %v23_v7  ;;  %v172_v33 = vld [vmem:[%s378_s3 + $0x38] sm:$0xff]  ;;  %v29_v34 = vld [vmem:[%s377_s2 + $0x10] sm:$0xff] }
   0x9   :  { %v33_v35 = vld [vmem:[%s377_s2 + $0x30] sm:$0xff] }
   0xa   :  { %v167_v41 = vld [vmem:[%s378_s3 + $0x10] sm:$0xff] }
   0xb   :  { %220 = vmatmul.mubr.msk.f32.gmra.mxu0 %vm35_vm0, %v20_v8  ;;  %226 = vmatmul.mubr.msk.f32.gmra.mxu1 %vm35_vm0, %v24_v9  ;;  %v171_v43 = vld [vmem:[%s378_s3 + $0x30] sm:$0xff] }
  0xc7   :  { %v218_v13 = vpop.f32.mrf.mxu0  ;;  %v224_v14 = vpop.f32.mrf.mxu1 }
  0xc8   :  { %v132_v18 = vadd.f32 %v218_v13, %v28_v10  ;;  %v152_v19 = vadd.f32 %v224_v14, %v32_v11 }
  0xc9   :  { %v126_v21 = vpop.f32.mrf.mxu0  ;;  %v146_v22 = vpop.f32.mrf.mxu1 }
  0xca   :  { %v174_v26 = vadd.f32 %v166_v12, %v132_v18  ;;  %v178_v27 = vadd.f32 %v170_v15, %v152_v19  ;;  %v127_v28 = vadd.f32 %v126_v21, %v27_v16  ;;  %v147_v29 = vadd.f32 %v146_v22, %v31_v17 }
  0xcb   :  { %v221_v31 = vpop.f32.mrf.mxu0  ;;  %v227_v32 = vpop.f32.mrf.mxu1 }
  0xcc   :  { %183 = vst.msk [vmem:[%s379_s4 + $0x8] sm:$0xff] %vm181_vm1, %v174_v26  ;;  %187 = vst.msk [vmem:[%s379_s4 + $0x28] sm:$0xff] %vm181_vm1, %v178_v27  ;;  %v173_v36 = vadd.f32 %v165_v20, %v127_v28  ;;  %v177_v37 = vadd.f32 %v169_v23, %v147_v29  ;;  %v142_v38 = vadd.f32 %v221_v31, %v30_v24 }
  0xcd   :  { %v162_v39 = vadd.f32 %v227_v32, %v34_v25  ;;  %v136_v40 = vpop.f32.mrf.mxu0  ;;  %v156_v42 = vpop.f32.mrf.mxu1 }
  0xce   :  { %182 = vst.msk [vmem:[%s379_s4] sm:$0xff] %vm181_vm1, %v173_v36  ;;  %186 = vst.msk [vmem:[%s379_s4 + $0x20] sm:$0xff] %vm181_vm1, %v177_v37  ;;  %v176_v44 = vadd.f32 %v168_v30, %v142_v38  ;;  %v137_v46 = vadd.f32 %v136_v40, %v29_v34  ;;  %v157_v47 = vadd.f32 %v156_v42, %v33_v35 }
  0xcf   :  { %v180_v45 = vadd.f32 %v172_v33, %v162_v39 }
  0xd0   :  { %185 = vst.msk [vmem:[%s379_s4 + $0x18] sm:$0xff] %vm181_vm1, %v176_v44  ;;  %v175_v48 = vadd.f32 %v167_v41, %v137_v46  ;;  %v179_v49 = vadd.f32 %v171_v43, %v157_v47 }
  0xd1   :  { %189 = vst.msk [vmem:[%s379_s4 + $0x38] sm:$0xff] %vm181_vm1, %v180_v45 }
  0xd2   :  { %184 = vst.msk [vmem:[%s379_s4 + $0x10] sm:$0xff] %vm181_vm1, %v175_v48  ;;  %188 = vst.msk [vmem:[%s379_s4 + $0x30] sm:$0xff] %vm181_vm1, %v179_v49 }

// kernel: attention_module_stage1.75
= control target key start
LH: loop header
LB: loop body
LE: loop exit
PB: predicated region body
PF: predicated region fallthrough
CT: control target
= control target key end

     0   :  { %vm86_vm0 = vcmask 523264   ;;  %vm408_vm1 = vcmask 261120   ;;  %s993_s1 = inlined_call_operand.vmem [shape: f32[64,32], index: 1, kind: input, shape index: {}]   ;;  %s994_s0 = inlined_call_operand.vmem [shape: f32[256,64], index: 0, kind: input, shape index: {}]   ;;  %s995_s2 = inlined_call_operand.vmem [shape: f32[256,32], index: 2, kind: input, shape index: {}]   ;;  %s996_s3 = inlined_call_operand.vmem [shape: f32[256,32], index: 3, kind: output, shape index: {}]  }
   0x1   :  { %v53_v0 = vld [vmem:[%s993_s1 + $0x38] sm:$0xff]  ;;  %v52_v1 = vld [vmem:[%s993_s1 + $0x30] sm:$0xff]  ;;  %v51_v2 = vld [vmem:[%s993_s1 + $0x28] sm:$0xff] }
   0x2   :  { %517 = vmatprep.subr.mxu0 %v53_v0  ;;  %581 = vmatprep.subr.mxu1 %v53_v0  ;;  %v50_v3 = vld [vmem:[%s993_s1 + $0x20] sm:$0xff]  ;;  %v49_v4 = vld [vmem:[%s993_s1 + $0x18] sm:$0xff]  ;;  %v48_v5 = vld [vmem:[%s993_s1 + $0x10] sm:$0xff] }
   0x3   :  { %518 = vmatpush3.msra.mxu0 %v53_v0  ;;  %589 = vmatpush3.msra.mxu1 %v53_v0  ;;  %v47_v6 = vld [vmem:[%s993_s1 + $0x8] sm:$0xff]  ;;  %v46_v7 = vld [vmem:[%s993_s1] sm:$0xff]  ;;  %v16_v12 = vld [vmem:[%s994_s0 + $0x10] sm:$0xff] }
   0x4   :  { %519 = vmatprep.subr.mxu0 %v52_v1  ;;  %582 = vmatprep.subr.mxu1 %v52_v1  ;;  %v14_v8 = vld [vmem:[%s994_s0] sm:$0xff]  ;;  %v15_v10 = vld [vmem:[%s994_s0 + $0x8] sm:$0xff]  ;;  %v32_v13 = vld [vmem:[%s994_s0 + $0x90] sm:$0xff] }
   0x5   :  { %520 = vmatpush3.msra.mxu0 %v52_v1  ;;  %590 = vmatpush3.msra.mxu1 %v52_v1  ;;  %v30_v9 = vld [vmem:[%s994_s0 + $0x80] sm:$0xff]  ;;  %v31_v11 = vld [vmem:[%s994_s0 + $0x88] sm:$0xff]  ;;  %v17_v14 = vld [vmem:[%s994_s0 + $0x18] sm:$0xff] }
   0x6   :  { %521 = vmatprep.subr.mxu0 %v51_v2  ;;  %583 = vmatprep.subr.mxu1 %v51_v2  ;;  %v33_v15 = vld [vmem:[%s994_s0 + $0x98] sm:$0xff]  ;;  %v18_v16 = vld [vmem:[%s994_s0 + $0x20] sm:$0xff]  ;;  %v19_v18 = vld [vmem:[%s994_s0 + $0x28] sm:$0xff] }
   0x7   :  { %522 = vmatpush3.msra.mxu0 %v51_v2  ;;  %591 = vmatpush3.msra.mxu1 %v51_v2  ;;  %v34_v17 = vld [vmem:[%s994_s0 + $0xa0] sm:$0xff]  ;;  %v35_v19 = vld [vmem:[%s994_s0 + $0xa8] sm:$0xff]  ;;  %v20_v20 = vld [vmem:[%s994_s0 + $0x30] sm:$0xff] }
   0x8   :  { %523 = vmatprep.subr.mxu0 %v50_v3  ;;  %584 = vmatprep.subr.mxu1 %v50_v3  ;;  %v36_v21 = vld [vmem:[%s994_s0 + $0xb0] sm:$0xff]  ;;  %v21_v22 = vld [vmem:[%s994_s0 + $0x38] sm:$0xff]  ;;  %v22_v24 = vld [vmem:[%s994_s0 + $0x40] sm:$0xff] }
   0x9   :  { %524 = vmatpush3.msra.mxu0 %v50_v3  ;;  %592 = vmatpush3.msra.mxu1 %v50_v3  ;;  %v37_v23 = vld [vmem:[%s994_s0 + $0xb8] sm:$0xff]  ;;  %v38_v25 = vld [vmem:[%s994_s0 + $0xc0] sm:$0xff]  ;;  %v23_v26 = vld [vmem:[%s994_s0 + $0x48] sm:$0xff] }
   0xa   :  { %525 = vmatprep.subr.mxu0 %v49_v4  ;;  %585 = vmatprep.subr.mxu1 %v49_v4  ;;  %v39_v27 = vld [vmem:[%s994_s0 + $0xc8] sm:$0xff]  ;;  %v24_v28 = vld [vmem:[%s994_s0 + $0x50] sm:$0xff]  ;;  %v25_v30 = vld [vmem:[%s994_s0 + $0x58] sm:$0xff] }
   0xb   :  { %526 = vmatpush3.msra.mxu0 %v49_v4  ;;  %593 = vmatpush3.msra.mxu1 %v49_v4  ;;  %v40_v29 = vld [vmem:[%s994_s0 + $0xd0] sm:$0xff]  ;;  %v41_v31 = vld [vmem:[%s994_s0 + $0xd8] sm:$0xff]  ;;  %v26_v32 = vld [vmem:[%s994_s0 + $0x60] sm:$0xff] }
   0xc   :  { %527 = vmatprep.subr.mxu0 %v48_v5  ;;  %586 = vmatprep.subr.mxu1 %v48_v5  ;;  %v42_v33 = vld [vmem:[%s994_s0 + $0xe0] sm:$0xff]  ;;  %v27_v34 = vld [vmem:[%s994_s0 + $0x68] sm:$0xff]  ;;  %v28_v36 = vld [vmem:[%s994_s0 + $0x70] sm:$0xff] }
   0xd   :  { %528 = vmatpush3.msra.mxu0 %v48_v5  ;;  %594 = vmatpush3.msra.mxu1 %v48_v5  ;;  %v43_v35 = vld [vmem:[%s994_s0 + $0xe8] sm:$0xff]  ;;  %v44_v37 = vld [vmem:[%s994_s0 + $0xf0] sm:$0xff]  ;;  %v29_v38 = vld [vmem:[%s994_s0 + $0x78] sm:$0xff] }
   0xe   :  { %529 = vmatprep.subr.mxu0 %v47_v6  ;;  %587 = vmatprep.subr.mxu1 %v47_v6  ;;  %v45_v39 = vld [vmem:[%s994_s0 + $0xf8] sm:$0xff]  ;;  %v55_v40 = vld [vmem:[%s995_s2 + $0x8] sm:$0xff]  ;;  %v54_v44 = vld [vmem:[%s995_s2] sm:$0xff] }
   0xf   :  { %530 = vmatpush3.msra.mxu0 %v47_v6  ;;  %595 = vmatpush3.msra.mxu1 %v47_v6  ;;  %v71_v41 = vld [vmem:[%s995_s2 + $0x88] sm:$0xff]  ;;  %v70_v45 = vld [vmem:[%s995_s2 + $0x80] sm:$0xff]  ;;  %v57_v50 = vld [vmem:[%s995_s2 + $0x18] sm:$0xff] }
  0x10   :  { %531 = vmatprep.subr.mxu0 %v46_v7  ;;  %588 = vmatprep.subr.mxu1 %v46_v7  ;;  %v73_v51 = vld [vmem:[%s995_s2 + $0x98] sm:$0xff]  ;;  %v56_v56 = vld [vmem:[%s995_s2 + $0x10] sm:$0xff]  ;;  %v59_v62 = vld [vmem:[%s995_s2 + $0x28] sm:$0xff] }
  0x11   :  { %532 = vmatpush3.msra.mxu0 %v46_v7  ;;  %596 = vmatpush3.msra.mxu1 %v46_v7  ;;  %v72_v57 = vld [vmem:[%s995_s2 + $0x90] sm:$0xff]  ;;  %v75_v63 = vld [vmem:[%s995_s2 + $0xa8] sm:$0xff]  ;;  %v58_v4 = vld [vmem:[%s995_s2 + $0x20] sm:$0xff] }
  0x12   :  { %533 = vmatprep.mubr.msk.f32.mxu0 %vm86_vm0, %v14_v8  ;;  %557 = vmatprep.mubr.msk.f32.mxu1 %vm86_vm0, %v30_v9  ;;  %v74_v5 = vld [vmem:[%s995_s2 + $0xa0] sm:$0xff] }
  0x13   :  { %534 = vmatmul.mubr.msk.f32.vlgmr.msra.gmra.mxu0 %vm86_vm0, %v15_v10  ;;  %558 = vmatmul.mubr.msk.f32.vlgmr.msra.gmra.mxu1 %vm86_vm0, %v31_v11  ;;  %v61_v10 = vld [vmem:[%s995_s2 + $0x38] sm:$0xff] }
  0x14   :  { %536 = vmatprep.mubr.msk.f32.mxu0 %vm86_vm0, %v16_v12  ;;  %560 = vmatprep.mubr.msk.f32.mxu1 %vm86_vm0, %v32_v13  ;;  %v77_v11 = vld [vmem:[%s995_s2 + $0xb8] sm:$0xff] }
  0x17   :  { %537 = vmatmul.mubr.msk.f32.gmra.mxu0 %vm86_vm0, %v17_v14  ;;  %561 = vmatmul.mubr.msk.f32.gmra.mxu1 %vm86_vm0, %v33_v15 }
  0x18   :  { %539 = vmatprep.mubr.msk.f32.mxu0 %vm86_vm0, %v18_v16  ;;  %563 = vmatprep.mubr.msk.f32.mxu1 %vm86_vm0, %v34_v17  ;;  %v60_v16 = vld [vmem:[%s995_s2 + $0x30] sm:$0xff] }
  0x19   :  { %v76_v17 = vld [vmem:[%s995_s2 + $0xb0] sm:$0xff] }
  0x1b   :  { %540 = vmatmul.mubr.msk.f32.gmra.mxu0 %vm86_vm0, %v19_v18  ;;  %564 = vmatmul.mubr.msk.f32.gmra.mxu1 %vm86_vm0, %v35_v19 }
  0x1c   :  { %542 = vmatprep.mubr.msk.f32.mxu0 %vm86_vm0, %v20_v20  ;;  %566 = vmatprep.mubr.msk.f32.mxu1 %vm86_vm0, %v36_v21 }
  0x1f   :  { %543 = vmatmul.mubr.msk.f32.gmra.mxu0 %vm86_vm0, %v21_v22  ;;  %567 = vmatmul.mubr.msk.f32.gmra.mxu1 %vm86_vm0, %v37_v23  ;;  %v63_v22 = vld [vmem:[%s995_s2 + $0x48] sm:$0xff] }
  0x20   :  { %545 = vmatprep.mubr.msk.f32.mxu0 %vm86_vm0, %v22_v24  ;;  %569 = vmatprep.mubr.msk.f32.mxu1 %vm86_vm0, %v38_v25  ;;  %v79_v23 = vld [vmem:[%s995_s2 + $0xc8] sm:$0xff] }
  0x23   :  { %546 = vmatmul.mubr.msk.f32.gmra.mxu0 %vm86_vm0, %v23_v26  ;;  %570 = vmatmul.mubr.msk.f32.gmra.mxu1 %vm86_vm0, %v39_v27 }
  0x24   :  { %548 = vmatprep.mubr.msk.f32.mxu0 %vm86_vm0, %v24_v28  ;;  %572 = vmatprep.mubr.msk.f32.mxu1 %vm86_vm0, %v40_v29  ;;  %v62_v28 = vld [vmem:[%s995_s2 + $0x40] sm:$0xff] }
  0x25   :  { %v78_v29 = vld [vmem:[%s995_s2 + $0xc0] sm:$0xff] }
  0x27   :  { %549 = vmatmul.mubr.msk.f32.gmra.mxu0 %vm86_vm0, %v25_v30  ;;  %573 = vmatmul.mubr.msk.f32.gmra.mxu1 %vm86_vm0, %v41_v31 }
  0x28   :  { %551 = vmatprep.mubr.msk.f32.mxu0 %vm86_vm0, %v26_v32  ;;  %575 = vmatprep.mubr.msk.f32.mxu1 %vm86_vm0, %v42_v33 }
  0x2b   :  { %552 = vmatmul.mubr.msk.f32.gmra.mxu0 %vm86_vm0, %v27_v34  ;;  %576 = vmatmul.mubr.msk.f32.gmra.mxu1 %vm86_vm0, %v43_v35  ;;  %v65_v34 = vld [vmem:[%s995_s2 + $0x58] sm:$0xff] }
  0x2c   :  { %554 = vmatprep.mubr.msk.f32.mxu0 %vm86_vm0, %v28_v36  ;;  %578 = vmatprep.mubr.msk.f32.mxu1 %vm86_vm0, %v44_v37  ;;  %v81_v35 = vld [vmem:[%s995_s2 + $0xd8] sm:$0xff] }
  0x2f   :  { %555 = vmatmul.mubr.msk.f32.gmra.mxu0 %vm86_vm0, %v29_v38  ;;  %579 = vmatmul.mubr.msk.f32.gmra.mxu1 %vm86_vm0, %v45_v39 }
  0xd3   :  { %v535_v42 = vpop.f32.mrf.mxu0  ;;  %v559_v43 = vpop.f32.mrf.mxu1 }
  0xd4   :  { %v255_v46 = vadd.f32 %v535_v42, %v55_v40  ;;  %v335_v47 = vadd.f32 %v559_v43, %v71_v41  ;;  %v64_v40 = vld [vmem:[%s995_s2 + $0x50] sm:$0xff] }
  0xd5   :  { %v249_v48 = vpop.f32.mrf.mxu0  ;;  %v329_v49 = vpop.f32.mrf.mxu1  ;;  %v80_v41 = vld [vmem:[%s995_s2 + $0xd0] sm:$0xff] }
  0xd6   :  { %410 = vst.msk [vmem:[%s996_s3 + $0x8] sm:$0xff] %vm408_vm1, %v255_v46  ;;  %426 = vst.msk [vmem:[%s996_s3 + $0x88] sm:$0xff] %vm408_vm1, %v335_v47  ;;  %v250_v52 = vadd.f32 %v249_v48, %v54_v44  ;;  %v330_v53 = vadd.f32 %v329_v49, %v70_v45  ;;  %v67_v46 = vld [vmem:[%s995_s2 + $0x68] sm:$0xff] }
  0xd7   :  { %v538_v54 = vpop.f32.mrf.mxu0  ;;  %v562_v55 = vpop.f32.mrf.mxu1  ;;  %v83_v47 = vld [vmem:[%s995_s2 + $0xe8] sm:$0xff] }
  0xd8   :  { %409 = vst.msk [vmem:[%s996_s3] sm:$0xff] %vm408_vm1, %v250_v52  ;;  %425 = vst.msk [vmem:[%s996_s3 + $0x80] sm:$0xff] %vm408_vm1, %v330_v53  ;;  %v265_v58 = vadd.f32 %v538_v54, %v57_v50  ;;  %v345_v59 = vadd.f32 %v562_v55, %v73_v51  ;;  %v66_v52 = vld [vmem:[%s995_s2 + $0x60] sm:$0xff] }
  0xd9   :  { %v259_v60 = vpop.f32.mrf.mxu0  ;;  %v339_v61 = vpop.f32.mrf.mxu1  ;;  %v82_v53 = vld [vmem:[%s995_s2 + $0xe0] sm:$0xff] }
  0xda   :  { %412 = vst.msk [vmem:[%s996_s3 + $0x18] sm:$0xff] %vm408_vm1, %v265_v58  ;;  %428 = vst.msk [vmem:[%s996_s3 + $0x98] sm:$0xff] %vm408_vm1, %v345_v59  ;;  %v260_v0 = vadd.f32 %v259_v60, %v56_v56  ;;  %v340_v1 = vadd.f32 %v339_v61, %v72_v57  ;;  %v69_v58 = vld [vmem:[%s995_s2 + $0x78] sm:$0xff] }
  0xdb   :  { %v541_v2 = vpop.f32.mrf.mxu0  ;;  %v565_v3 = vpop.f32.mrf.mxu1  ;;  %v85_v59 = vld [vmem:[%s995_s2 + $0xf8] sm:$0xff] }
  0xdc   :  { %411 = vst.msk [vmem:[%s996_s3 + $0x10] sm:$0xff] %vm408_vm1, %v260_v0  ;;  %427 = vst.msk [vmem:[%s996_s3 + $0x90] sm:$0xff] %vm408_vm1, %v340_v1  ;;  %v275_v6 = vadd.f32 %v541_v2, %v59_v62  ;;  %v355_v7 = vadd.f32 %v565_v3, %v75_v63  ;;  %v68_v0 = vld [vmem:[%s995_s2 + $0x70] sm:$0xff] }
  0xdd   :  { %v269_v8 = vpop.f32.mrf.mxu0  ;;  %v349_v9 = vpop.f32.mrf.mxu1  ;;  %v84_v1 = vld [vmem:[%s995_s2 + $0xf0] sm:$0xff] }
  0xde   :  { %414 = vst.msk [vmem:[%s996_s3 + $0x28] sm:$0xff] %vm408_vm1, %v275_v6  ;;  %430 = vst.msk [vmem:[%s996_s3 + $0xa8] sm:$0xff] %vm408_vm1, %v355_v7  ;;  %v270_v12 = vadd.f32 %v269_v8, %v58_v4  ;;  %v350_v13 = vadd.f32 %v349_v9, %v74_v5 }
  0xdf   :  { %v544_v14 = vpop.f32.mrf.mxu0  ;;  %v568_v15 = vpop.f32.mrf.mxu1 }
  0xe0   :  { %413 = vst.msk [vmem:[%s996_s3 + $0x20] sm:$0xff] %vm408_vm1, %v270_v12  ;;  %429 = vst.msk [vmem:[%s996_s3 + $0xa0] sm:$0xff] %vm408_vm1, %v350_v13  ;;  %v285_v18 = vadd.f32 %v544_v14, %v61_v10  ;;  %v365_v19 = vadd.f32 %v568_v15, %v77_v11 }
  0xe1   :  { %v279_v20 = vpop.f32.mrf.mxu0  ;;  %v359_v21 = vpop.f32.mrf.mxu1 }
  0xe2   :  { %416 = vst.msk [vmem:[%s996_s3 + $0x38] sm:$0xff] %vm408_vm1, %v285_v18  ;;  %432 = vst.msk [vmem:[%s996_s3 + $0xb8] sm:$0xff] %vm408_vm1, %v365_v19  ;;  %v280_v24 = vadd.f32 %v279_v20, %v60_v16  ;;  %v360_v25 = vadd.f32 %v359_v21, %v76_v17 }
  0xe3   :  { %v547_v26 = vpop.f32.mrf.mxu0  ;;  %v571_v27 = vpop.f32.mrf.mxu1 }
  0xe4   :  { %415 = vst.msk [vmem:[%s996_s3 + $0x30] sm:$0xff] %vm408_vm1, %v280_v24  ;;  %431 = vst.msk [vmem:[%s996_s3 + $0xb0] sm:$0xff] %vm408_vm1, %v360_v25  ;;  %v295_v30 = vadd.f32 %v547_v26, %v63_v22  ;;  %v375_v31 = vadd.f32 %v571_v27, %v79_v23 }
  0xe5   :  { %v289_v32 = vpop.f32.mrf.mxu0  ;;  %v369_v33 = vpop.f32.mrf.mxu1 }
  0xe6   :  { %418 = vst.msk [vmem:[%s996_s3 + $0x48] sm:$0xff] %vm408_vm1, %v295_v30  ;;  %434 = vst.msk [vmem:[%s996_s3 + $0xc8] sm:$0xff] %vm408_vm1, %v375_v31  ;;  %v290_v36 = vadd.f32 %v289_v32, %v62_v28  ;;  %v370_v37 = vadd.f32 %v369_v33, %v78_v29 }
  0xe7   :  { %v550_v38 = vpop.f32.mrf.mxu0  ;;  %v574_v39 = vpop.f32.mrf.mxu1 }
  0xe8   :  { %417 = vst.msk [vmem:[%s996_s3 + $0x40] sm:$0xff] %vm408_vm1, %v290_v36  ;;  %433 = vst.msk [vmem:[%s996_s3 + $0xc0] sm:$0xff] %vm408_vm1, %v370_v37  ;;  %v305_v42 = vadd.f32 %v550_v38, %v65_v34  ;;  %v385_v43 = vadd.f32 %v574_v39, %v81_v35 }
  0xe9   :  { %v299_v44 = vpop.f32.mrf.mxu0  ;;  %v379_v45 = vpop.f32.mrf.mxu1 }
  0xea   :  { %420 = vst.msk [vmem:[%s996_s3 + $0x58] sm:$0xff] %vm408_vm1, %v305_v42  ;;  %436 = vst.msk [vmem:[%s996_s3 + $0xd8] sm:$0xff] %vm408_vm1, %v385_v43  ;;  %v300_v48 = vadd.f32 %v299_v44, %v64_v40  ;;  %v380_v49 = vadd.f32 %v379_v45, %v80_v41 }
  0xeb   :  { %v553_v50 = vpop.f32.mrf.mxu0  ;;  %v577_v51 = vpop.f32.mrf.mxu1 }
  0xec   :  { %419 = vst.msk [vmem:[%s996_s3 + $0x50] sm:$0xff] %vm408_vm1, %v300_v48  ;;  %435 = vst.msk [vmem:[%s996_s3 + $0xd0] sm:$0xff] %vm408_vm1, %v380_v49  ;;  %v315_v54 = vadd.f32 %v553_v50, %v67_v46  ;;  %v395_v55 = vadd.f32 %v577_v51, %v83_v47 }
  0xed   :  { %v309_v56 = vpop.f32.mrf.mxu0  ;;  %v389_v57 = vpop.f32.mrf.mxu1 }
  0xee   :  { %422 = vst.msk [vmem:[%s996_s3 + $0x68] sm:$0xff] %vm408_vm1, %v315_v54  ;;  %438 = vst.msk [vmem:[%s996_s3 + $0xe8] sm:$0xff] %vm408_vm1, %v395_v55  ;;  %v310_v60 = vadd.f32 %v309_v56, %v66_v52  ;;  %v390_v61 = vadd.f32 %v389_v57, %v82_v53 }
  0xef   :  { %v556_v62 = vpop.f32.mrf.mxu0  ;;  %v580_v63 = vpop.f32.mrf.mxu1 }
  0xf0   :  { %421 = vst.msk [vmem:[%s996_s3 + $0x60] sm:$0xff] %vm408_vm1, %v310_v60  ;;  %437 = vst.msk [vmem:[%s996_s3 + $0xe0] sm:$0xff] %vm408_vm1, %v390_v61  ;;  %v325_v2 = vadd.f32 %v556_v62, %v69_v58  ;;  %v405_v3 = vadd.f32 %v580_v63, %v85_v59 }
  0xf1   :  { %v319_v4 = vpop.f32.mrf.mxu0  ;;  %v399_v5 = vpop.f32.mrf.mxu1 }
  0xf2   :  { %424 = vst.msk [vmem:[%s996_s3 + $0x78] sm:$0xff] %vm408_vm1, %v325_v2  ;;  %440 = vst.msk [vmem:[%s996_s3 + $0xf8] sm:$0xff] %vm408_vm1, %v405_v3  ;;  %v320_v6 = vadd.f32 %v319_v4, %v68_v0  ;;  %v400_v7 = vadd.f32 %v399_v5, %v84_v1 }
  0xf4   :  { %423 = vst.msk [vmem:[%s996_s3 + $0x70] sm:$0xff] %vm408_vm1, %v320_v6  ;;  %439 = vst.msk [vmem:[%s996_s3 + $0xf0] sm:$0xff] %vm408_vm1, %v400_v7 }

// kernel: attention_module_stage1.76
= control target key start
LH: loop header
LB: loop body
LE: loop exit
PB: predicated region body
PF: predicated region fallthrough
CT: control target
= control target key end

     0   :  { %s2028_s27 = smov 0   ;;  %s2411_s0 = inlined_call_operand.vmem [shape: f32[512,16], index: 0, kind: input, shape index: {}]   ;;  %s2412_s1 = inlined_call_operand.vmem [shape: f32[512,16], index: 1, kind: input, shape index: {}]   ;;  %s2413_s2 = inlined_call_operand.vmem [shape: f32[1,16], index: 2, kind: input, shape index: {}]   ;;  %s2414_s3 = inlined_call_operand.vmem [shape: f32[1,16], index: 3, kind: input, shape index: {}]   ;;  %s2415_s4 = inlined_call_operand.vmem [shape: f32[16,16], index: 4, kind: input, shape index: {}]   ;;  %s2416_s5 = inlined_call_operand.vmem [shape: f32[1,16], index: 5, kind: input, shape index: {}]   ;;  %s2417_s6 = inlined_call_operand.vmem [shape: f32[1,16], index: 6, kind: input, shape index: {}]   ;;  %s2418_s7 = inlined_call_operand.vmem [shape: f32[16,16], index: 7, kind: input, shape index: {}]   ;;  %s2419_s8 = inlined_call_operand.vmem [shape: f32[512,16], index: 8, kind: output, shape index: {}]  }
   0x1 LB: > { %s1586_s28 = sadd.s32 4294967295, %s1981_s27   ;;  %p1590_p0 = scmp.ge.s32.totalorder %s1981_s27, 1  ;;  %s1981_s27 = sphi %s2028_s27, %s18_s27  }
   0x2   : > { %p274_p1 = scmp.lt.s32.totalorder %s1981_s27, 3 }
   0x4   : > { %p275_p2 = pnand %p1590_p0, %p274_p1 }
   0x5   : > { %s1591_s11 = sshll.u32 (!%p275_p2), %s1586_s28, 5 }
   0x6   : > { %278 = sbr.rel (%p275_p2) target bundleno = 519 (0x207), region = 52  ;;  %p314_p3 = scmp.lt.s32.totalorder (!%p275_p2), %s1591_s11, 63 }
   0xb   : > { %v474_v0 = vld [vmem:[%s2415_s4 + $0x8] sm:$0xff]  ;;  %v473_v1 = vld [vmem:[%s2415_s4] sm:$0xff]  ;;  %s2421_s11 = smov (!%p314_p3, %s1591_s11), 63  ;;  %vm475_vm0 = vcmask 130048  }
   0xc   : > { %1735 = vmatprep.subr.mxu0 %v474_v0  ;;  %s2042_s12 = sshll.u32 %s2421_s11, 3  ;;  %v2047_v2 = vld [vmem:[%s2413_s2] ss:$0 sm:$0xff] }
   0xd   : > { %1736 = vmatpush3.msra.mxu0 %v474_v0  ;;  %s2053_s17 = scalar_lea.vmem %s2411_s0, %s2042_s12  ;;  %v2058_v3 = vld [vmem:[%s2414_s3] ss:$0 sm:$0xff]  ;;  %s2304_s9 = scalar_lea.vmem %s2412_s1, %s2042_s12 }
   0xe   : > { %1737 = vmatprep.subr.mxu0 %v473_v1  ;;  %v331_v4 = vld [vmem:[%s2053_s17] sm:$0xff]  ;;  %v332_v5 = vld [vmem:[%s2053_s17 + $0x8] sm:$0xff]  ;;  %v333_v6 = vld [vmem:[%s2053_s17 + $0x10] sm:$0xff]  ;;  %s2311_s13 = scalar_lea.vmem %s2419_s8, %s2042_s12 }
   0xf   : > { %1738 = vmatpush3.msra.mxu0 %v473_v1  ;;  %v370_v7 = vmul.f32 %v2047_v2, %v331_v4  ;;  %v371_v8 = vmul.f32 %v2047_v2, %v332_v5  ;;  %v372_v9 = vmul.f32 %v2047_v2, %v333_v6  ;;  %v334_v10 = vld [vmem:[%s2053_s17 + $0x18] sm:$0xff]  ;;  %v335_v11 = vld [vmem:[%s2053_s17 + $0x20] sm:$0xff]  ;;  %v336_v12 = vld [vmem:[%s2053_s17 + $0x28] sm:$0xff] }
  0x10   : > { %v373_v13 = vmul.f32 %v2047_v2, %v334_v10  ;;  %v374_v14 = vmul.f32 %v2047_v2, %v335_v11  ;;  %v337_v15 = vld [vmem:[%s2053_s17 + $0x30] sm:$0xff]  ;;  %v375_v20 = vmul.f32 %v2047_v2, %v336_v12  ;;  %v338_v26 = vld [vmem:[%s2053_s17 + $0x38] sm:$0xff]  ;;  %v339_v27 = vld [vmem:[%s2053_s17 + $0x40] sm:$0xff] }
  0x11   : > { %v409_v16 = vadd.f32 %v2058_v3, %v370_v7  ;;  %v410_v17 = vadd.f32 %v2058_v3, %v371_v8  ;;  %v411_v18 = vadd.f32 %v2058_v3, %v372_v9  ;;  %v376_v21 = vmul.f32 %v2047_v2, %v337_v15  ;;  %v340_v34 = vld [vmem:[%s2053_s17 + $0x48] sm:$0xff]  ;;  %v341_v35 = vld [vmem:[%s2053_s17 + $0x50] sm:$0xff]  ;;  %v342_v42 = vld [vmem:[%s2053_s17 + $0x58] sm:$0xff] }
  0x12   : > { %v412_v19 = vadd.f32 %v2058_v3, %v373_v13  ;;  %v413_v25 = vadd.f32 %v2058_v3, %v374_v14  ;;  %v414_v29 = vadd.f32 %v2058_v3, %v375_v20  ;;  %v377_v30 = vmul.f32 %v2047_v2, %v338_v26  ;;  %v343_v43 = vld [vmem:[%s2053_s17 + $0x60] sm:$0xff]  ;;  %v344_v50 = vld [vmem:[%s2053_s17 + $0x68] sm:$0xff]  ;;  %v345_v51 = vld [vmem:[%s2053_s17 + $0x70] sm:$0xff] }
  0x13   : > { %v441_v22 = vmax.f32 %v409_v16, 0.0  ;;  %v442_v23 = vmax.f32 %v410_v17, 0.0  ;;  %v443_v24 = vmax.f32 %v411_v18, 0.0  ;;  %v415_v32 = vadd.f32 %v2058_v3, %v376_v21  ;;  %v346_v58 = vld [vmem:[%s2053_s17 + $0x78] sm:$0xff]  ;;  %v347_v59 = vld [vmem:[%s2053_s17 + $0x80] sm:$0xff]  ;;  %v348_v4 = vld [vmem:[%s2053_s17 + $0x88] sm:$0xff] }
  0x14   : > { %v444_v28 = vmax.f32 %v412_v19, 0.0  ;;  %v445_v31 = vmax.f32 %v413_v25, 0.0  ;;  %v378_v33 = vmul.f32 %v2047_v2, %v339_v27  ;;  %v446_v36 = vmax.f32 %v414_v29, 0.0  ;;  %v349_v5 = vld [vmem:[%s2053_s17 + $0x90] sm:$0xff]  ;;  %v350_v12 = vld [vmem:[%s2053_s17 + $0x98] sm:$0xff]  ;;  %v351_v13 = vld [vmem:[%s2053_s17 + $0xa0] sm:$0xff] }
  0x15   : > { %1739 = vmatprep.mubr.msk.f32.mxu0 %vm475_vm0, %v441_v22  ;;  %v416_v37 = vadd.f32 %v2058_v3, %v377_v30  ;;  %v379_v38 = vmul.f32 %v2047_v2, %v340_v34  ;;  %v447_v39 = vmax.f32 %v415_v32, 0.0  ;;  %v380_v41 = vmul.f32 %v2047_v2, %v341_v35  ;;  %v352_v20 = vld [vmem:[%s2053_s17 + $0xa8] sm:$0xff]  ;;  %v353_v21 = vld [vmem:[%s2053_s17 + $0xb0] sm:$0xff]  ;;  %v355_v29 = vld [vmem:[%s2053_s17 + $0xc0] sm:$0xff] }
  0x16   : > { %1740 = vmatmul.mubr.msk.f32.vlgmr.msra.gmra.mxu0 %vm475_vm0, %v442_v23  ;;  %v417_v40 = vadd.f32 %v2058_v3, %v378_v33  ;;  %v381_v46 = vmul.f32 %v2047_v2, %v342_v42  ;;  %v382_v49 = vmul.f32 %v2047_v2, %v343_v43  ;;  %v383_v54 = vmul.f32 %v2047_v2, %v344_v50 }
  0x17   : > { %1742 = vmatprep.mubr.msk.f32.mxu0 %vm475_vm0, %v443_v24  ;;  %v448_v44 = vmax.f32 %v416_v37, 0.0  ;;  %v418_v45 = vadd.f32 %v2058_v3, %v379_v38  ;;  %v419_v48 = vadd.f32 %v2058_v3, %v380_v41  ;;  %v384_v57 = vmul.f32 %v2047_v2, %v345_v51  ;;  %v357_v37 = vld [vmem:[%s2053_s17 + $0xd0] sm:$0xff] }
  0x18   : > { %v449_v47 = vmax.f32 %v417_v40, 0.0  ;;  %v420_v53 = vadd.f32 %v2058_v3, %v381_v46  ;;  %v421_v56 = vadd.f32 %v2058_v3, %v382_v49  ;;  %v422_v61 = vadd.f32 %v2058_v3, %v383_v54 }
  0x19   : > { %v450_v52 = vmax.f32 %v418_v45, 0.0  ;;  %v451_v55 = vmax.f32 %v419_v48, 0.0  ;;  %v385_v62 = vmul.f32 %v2047_v2, %v346_v58  ;;  %v423_v0 = vadd.f32 %v2058_v3, %v384_v57  ;;  %v359_v45 = vld [vmem:[%s2053_s17 + $0xe0] sm:$0xff] }
  0x1a   : > { %1743 = vmatmul.mubr.msk.f32.gmra.mxu0 %vm475_vm0, %v444_v28  ;;  %v452_v60 = vmax.f32 %v420_v53, 0.0  ;;  %v453_v63 = vmax.f32 %v421_v56, 0.0  ;;  %v386_v1 = vmul.f32 %v2047_v2, %v347_v59  ;;  %v454_v6 = vmax.f32 %v422_v61, 0.0  ;;  %v354_v28 = vld [vmem:[%s2053_s17 + $0xb8] sm:$0xff]  ;;  %v361_v53 = vld [vmem:[%s2053_s17 + $0xf0] sm:$0xff] }
  0x1b   : > { %1745 = vmatprep.mubr.msk.f32.mxu0 %vm475_vm0, %v445_v31  ;;  %v424_v7 = vadd.f32 %v2058_v3, %v385_v62  ;;  %v387_v8 = vmul.f32 %v2047_v2, %v348_v4  ;;  %v455_v9 = vmax.f32 %v423_v0, 0.0  ;;  %v388_v11 = vmul.f32 %v2047_v2, %v349_v5 }
  0x1c   : > { %v425_v10 = vadd.f32 %v2058_v3, %v386_v1  ;;  %v389_v16 = vmul.f32 %v2047_v2, %v350_v12  ;;  %v390_v19 = vmul.f32 %v2047_v2, %v351_v13  ;;  %v391_v24 = vmul.f32 %v2047_v2, %v352_v20 }
  0x1d   : > { %v456_v14 = vmax.f32 %v424_v7, 0.0  ;;  %v426_v15 = vadd.f32 %v2058_v3, %v387_v8  ;;  %v427_v18 = vadd.f32 %v2058_v3, %v388_v11  ;;  %v392_v27 = vmul.f32 %v2047_v2, %v353_v21  ;;  %v2197_v8 = vld [vmem:[%s2416_s5] ss:$0 sm:$0xff] }
  0x1e   : > { %1746 = vmatmul.mubr.msk.f32.gmra.mxu0 %vm475_vm0, %v446_v36  ;;  %v457_v17 = vmax.f32 %v425_v10, 0.0  ;;  %v428_v23 = vadd.f32 %v2058_v3, %v389_v16  ;;  %v429_v26 = vadd.f32 %v2058_v3, %v390_v19  ;;  %v430_v31 = vadd.f32 %v2058_v3, %v391_v24  ;;  %v356_v36 = vld [vmem:[%s2053_s17 + $0xc8] sm:$0xff]  ;;  %v2203_v11 = vld [vmem:[%s2417_s6] ss:$0 sm:$0xff] }
  0x1f   : > { %1748 = vmatprep.mubr.msk.f32.mxu0 %vm475_vm0, %v447_v39  ;;  %v458_v22 = vmax.f32 %v426_v15, 0.0  ;;  %v459_v25 = vmax.f32 %v427_v18, 0.0  ;;  %v393_v32 = vmul.f32 %v2047_v2, %v354_v28  ;;  %v431_v34 = vadd.f32 %v2058_v3, %v392_v27 }
  0x20   : > { %v460_v30 = vmax.f32 %v428_v23, 0.0  ;;  %v461_v33 = vmax.f32 %v429_v26, 0.0  ;;  %v394_v35 = vmul.f32 %v2047_v2, %v355_v29  ;;  %v462_v38 = vmax.f32 %v430_v31, 0.0 }
  0x21   : > { %v432_v39 = vadd.f32 %v2058_v3, %v393_v32  ;;  %v395_v40 = vmul.f32 %v2047_v2, %v356_v36  ;;  %v463_v41 = vmax.f32 %v431_v34, 0.0  ;;  %v396_v43 = vmul.f32 %v2047_v2, %v357_v37 }
  0x22   : > { %1749 = vmatmul.mubr.msk.f32.gmra.mxu0 %vm475_vm0, %v448_v44  ;;  %v433_v42 = vadd.f32 %v2058_v3, %v394_v35  ;;  %v358_v44 = vld [vmem:[%s2053_s17 + $0xd8] sm:$0xff]  ;;  %v398_v51 = vmul.f32 %v2047_v2, %v359_v45  ;;  %v400_v59 = vmul.f32 %v2047_v2, %v361_v53 }
  0x23   : > { %1751 = vmatprep.mubr.msk.f32.mxu0 %vm475_vm0, %v449_v47  ;;  %v464_v46 = vmax.f32 %v432_v39, 0.0  ;;  %v434_v47 = vadd.f32 %v2058_v3, %v395_v40  ;;  %v397_v48 = vmul.f32 %v2047_v2, %v358_v44  ;;  %v435_v50 = vadd.f32 %v2058_v3, %v396_v43 }
  0x24   : > { %v465_v49 = vmax.f32 %v433_v42, 0.0  ;;  %v437_v58 = vadd.f32 %v2058_v3, %v398_v51  ;;  %v439_v1 = vadd.f32 %v2058_v3, %v400_v59 }
  0x25   : > { %v466_v54 = vmax.f32 %v434_v47, 0.0  ;;  %v467_v57 = vmax.f32 %v435_v50, 0.0 }
  0x26   : > { %1752 = vmatmul.mubr.msk.f32.gmra.mxu0 %vm475_vm0, %v450_v52  ;;  %v360_v52 = vld [vmem:[%s2053_s17 + $0xe8] sm:$0xff]  ;;  %v469_v0 = vmax.f32 %v437_v58, 0.0 }
  0x27   : > { %1754 = vmatprep.mubr.msk.f32.mxu0 %vm475_vm0, %v451_v55  ;;  %v436_v55 = vadd.f32 %v2058_v3, %v397_v48  ;;  %v399_v56 = vmul.f32 %v2047_v2, %v360_v52 }
  0x29   : > { %v468_v61 = vmax.f32 %v436_v55, 0.0  ;;  %v438_v62 = vadd.f32 %v2058_v3, %v399_v56 }
  0x2a   : > { %1755 = vmatmul.mubr.msk.f32.gmra.mxu0 %vm475_vm0, %v452_v60  ;;  %v362_v60 = vld [vmem:[%s2053_s17 + $0xf8] sm:$0xff] }
  0x2b   : > { %1757 = vmatprep.mubr.msk.f32.mxu0 %vm475_vm0, %v453_v63  ;;  %v401_v63 = vmul.f32 %v2047_v2, %v362_v60  ;;  %v470_v4 = vmax.f32 %v438_v62, 0.0  ;;  %v908_v2 = vld [vmem:[%s2418_s7 + $0x8] sm:$0xff] }
  0x2c   : > { %1787 = vmatprep.subr.mxu1 %v908_v2 }
  0x2d   : > { %v440_v5 = vadd.f32 %v2058_v3, %v401_v63  ;;  %1788 = vmatpush3.msra.mxu1 %v908_v2  ;;  %v907_v3 = vld [vmem:[%s2418_s7] sm:$0xff] }
  0x2e   : > { %1758 = vmatmul.mubr.msk.f32.gmra.mxu0 %vm475_vm0, %v454_v6  ;;  %v471_v6 = vmax.f32 %v439_v1, 0.0  ;;  %1789 = vmatprep.subr.mxu1 %v907_v3 }
  0x2f   : > { %1760 = vmatprep.mubr.msk.f32.mxu0 %vm475_vm0, %v455_v9  ;;  %v472_v7 = vmax.f32 %v440_v5, 0.0  ;;  %1790 = vmatpush3.msra.mxu1 %v907_v3 }
  0x32   : > { %1761 = vmatmul.mubr.msk.f32.gmra.mxu0 %vm475_vm0, %v456_v14 }
  0x33   : > { %1763 = vmatprep.mubr.msk.f32.mxu0 %vm475_vm0, %v457_v17 }
  0x36   : > { %1764 = vmatmul.mubr.msk.f32.gmra.mxu0 %vm475_vm0, %v458_v22 }
  0x37   : > { %1766 = vmatprep.mubr.msk.f32.mxu0 %vm475_vm0, %v459_v25 }
  0x3a   : > { %1767 = vmatmul.mubr.msk.f32.gmra.mxu0 %vm475_vm0, %v460_v30 }
  0x3b   : > { %1769 = vmatprep.mubr.msk.f32.mxu0 %vm475_vm0, %v461_v33 }
  0x3e   : > { %1770 = vmatmul.mubr.msk.f32.gmra.mxu0 %vm475_vm0, %v462_v38 }
  0x3f   : > { %1772 = vmatprep.mubr.msk.f32.mxu0 %vm475_vm0, %v463_v41 }
  0x42   : > { %1773 = vmatmul.mubr.msk.f32.gmra.mxu0 %vm475_vm0, %v464_v46 }
  0x43   : > { %1775 = vmatprep.mubr.msk.f32.mxu0 %vm475_vm0, %v465_v49 }
  0x46   : > { %1776 = vmatmul.mubr.msk.f32.gmra.mxu0 %vm475_vm0, %v466_v54 }
  0x47   : > { %1778 = vmatprep.mubr.msk.f32.mxu0 %vm475_vm0, %v467_v57 }
  0x4a   : > { %1779 = vmatmul.mubr.msk.f32.gmra.mxu0 %vm475_vm0, %v468_v61 }
  0x4b   : > { %1781 = vmatprep.mubr.msk.f32.mxu0 %vm475_vm0, %v469_v0 }
  0x4e   : > { %1782 = vmatmul.mubr.msk.f32.gmra.mxu0 %vm475_vm0, %v470_v4 }
  0x4f   : > { %1784 = vmatprep.mubr.msk.f32.mxu0 %vm475_vm0, %v471_v6 }
  0x52   : > { %1785 = vmatmul.mubr.msk.f32.gmra.mxu0 %vm475_vm0, %v472_v7 }
  0xd6   : > { %v1741_v9 = vpop.f32.mrf.mxu0 }
  0xd7   : > { %v805_v10 = vmul.f32 %v1741_v9, %v2197_v8 }
  0xd8   : > { %v638_v12 = vpop.f32.mrf.mxu0 }
  0xd9   : > { %v804_v13 = vmul.f32 %v2197_v8, %v638_v12  ;;  %v844_v14 = vadd.f32 %v2203_v11, %v805_v10 }
  0xda   : > { %v1744_v15 = vpop.f32.mrf.mxu0 }
  0xdb   : > { %v807_v16 = vmul.f32 %v1744_v15, %v2197_v8  ;;  %v843_v17 = vadd.f32 %v2203_v11, %v804_v13  ;;  %v876_v21 = vmax.f32 %v844_v14, 0.0 }
  0xdc   : > { %v648_v18 = vpop.f32.mrf.mxu0 }
  0xdd   : > { %v806_v19 = vmul.f32 %v2197_v8, %v648_v18  ;;  %v875_v20 = vmax.f32 %v843_v17, 0.0  ;;  %v846_v22 = vadd.f32 %v2203_v11, %v807_v16 }
  0xde   : > { %v1747_v23 = vpop.f32.mrf.mxu0 }
  0xdf   : > { %v845_v24 = vadd.f32 %v2203_v11, %v806_v19  ;;  %v809_v25 = vmul.f32 %v1747_v23, %v2197_v8  ;;  %1791 = vmatprep.mubr.msk.f32.mxu1 %vm475_vm0, %v875_v20  ;;  %v878_v29 = vmax.f32 %v846_v22, 0.0 }
  0xe0   : > { %v658_v26 = vpop.f32.mrf.mxu0  ;;  %1792 = vmatmul.mubr.msk.f32.vlgmr.msra.gmra.mxu1 %vm475_vm0, %v876_v21 }
  0xe1   : > { %v877_v27 = vmax.f32 %v845_v24, 0.0  ;;  %v808_v28 = vmul.f32 %v2197_v8, %v658_v26  ;;  %v848_v30 = vadd.f32 %v2203_v11, %v809_v25 }
  0xe2   : > { %v1750_v31 = vpop.f32.mrf.mxu0 }
  0xe3   : > { %v847_v32 = vadd.f32 %v2203_v11, %v808_v28  ;;  %v811_v33 = vmul.f32 %v1750_v31, %v2197_v8  ;;  %1794 = vmatprep.mubr.msk.f32.mxu1 %vm475_vm0, %v877_v27  ;;  %v880_v37 = vmax.f32 %v848_v30, 0.0 }
  0xe4   : > { %v668_v34 = vpop.f32.mrf.mxu0  ;;  %1795 = vmatmul.mubr.msk.f32.gmra.mxu1 %vm475_vm0, %v878_v29 }
  0xe5   : > { %v879_v35 = vmax.f32 %v847_v32, 0.0  ;;  %v810_v36 = vmul.f32 %v2197_v8, %v668_v34  ;;  %v850_v38 = vadd.f32 %v2203_v11, %v811_v33 }
  0xe6   : > { %v1753_v39 = vpop.f32.mrf.mxu0 }
  0xe7   : > { %v849_v40 = vadd.f32 %v2203_v11, %v810_v36  ;;  %v813_v41 = vmul.f32 %v1753_v39, %v2197_v8  ;;  %1797 = vmatprep.mubr.msk.f32.mxu1 %vm475_vm0, %v879_v35  ;;  %v882_v45 = vmax.f32 %v850_v38, 0.0 }
  0xe8   : > { %v678_v42 = vpop.f32.mrf.mxu0  ;;  %1798 = vmatmul.mubr.msk.f32.gmra.mxu1 %vm475_vm0, %v880_v37 }
  0xe9   : > { %v881_v43 = vmax.f32 %v849_v40, 0.0  ;;  %v812_v44 = vmul.f32 %v2197_v8, %v678_v42  ;;  %v852_v46 = vadd.f32 %v2203_v11, %v813_v41 }
  0xea   : > { %v1756_v47 = vpop.f32.mrf.mxu0 }
  0xeb   : > { %v851_v48 = vadd.f32 %v2203_v11, %v812_v44  ;;  %v815_v49 = vmul.f32 %v1756_v47, %v2197_v8  ;;  %1800 = vmatprep.mubr.msk.f32.mxu1 %vm475_vm0, %v881_v43  ;;  %v884_v53 = vmax.f32 %v852_v46, 0.0 }
  0xec   : > { %v688_v50 = vpop.f32.mrf.mxu0  ;;  %1801 = vmatmul.mubr.msk.f32.gmra.mxu1 %vm475_vm0, %v882_v45 }
  0xed   : > { %v883_v51 = vmax.f32 %v851_v48, 0.0  ;;  %v814_v52 = vmul.f32 %v2197_v8, %v688_v50  ;;  %v854_v54 = vadd.f32 %v2203_v11, %v815_v49 }
  0xee   : > { %v1759_v55 = vpop.f32.mrf.mxu0 }
  0xef   : > { %v853_v56 = vadd.f32 %v2203_v11, %v814_v52  ;;  %v817_v57 = vmul.f32 %v1759_v55, %v2197_v8  ;;  %1803 = vmatprep.mubr.msk.f32.mxu1 %vm475_vm0, %v883_v51  ;;  %v886_v61 = vmax.f32 %v854_v54, 0.0 }
  0xf0   : > { %v698_v58 = vpop.f32.mrf.mxu0  ;;  %1804 = vmatmul.mubr.msk.f32.gmra.mxu1 %vm475_vm0, %v884_v53 }
  0xf1   : > { %v885_v59 = vmax.f32 %v853_v56, 0.0  ;;  %v816_v60 = vmul.f32 %v2197_v8, %v698_v58  ;;  %v856_v62 = vadd.f32 %v2203_v11, %v817_v57 }
  0xf2   : > { %v1762_v63 = vpop.f32.mrf.mxu0 }
  0xf3   : > { %v855_v0 = vadd.f32 %v2203_v11, %v816_v60  ;;  %v819_v1 = vmul.f32 %v1762_v63, %v2197_v8  ;;  %1806 = vmatprep.mubr.msk.f32.mxu1 %vm475_vm0, %v885_v59  ;;  %v888_v7 = vmax.f32 %v856_v62, 0.0 }
  0xf4   : > { %v708_v4 = vpop.f32.mrf.mxu0  ;;  %1807 = vmatmul.mubr.msk.f32.gmra.mxu1 %vm475_vm0, %v886_v61 }
  0xf5   : > { %v887_v5 = vmax.f32 %v855_v0, 0.0  ;;  %v818_v6 = vmul.f32 %v2197_v8, %v708_v4  ;;  %v858_v2 = vadd.f32 %v2203_v11, %v819_v1 }
  0xf6   : > { %v1765_v3 = vpop.f32.mrf.mxu0 }
  0xf7   : > { %v857_v9 = vadd.f32 %v2203_v11, %v818_v6  ;;  %v821_v10 = vmul.f32 %v1765_v3, %v2197_v8  ;;  %1809 = vmatprep.mubr.msk.f32.mxu1 %vm475_vm0, %v887_v5  ;;  %v890_v15 = vmax.f32 %v858_v2, 0.0 }
  0xf8   : > { %v718_v12 = vpop.f32.mrf.mxu0  ;;  %1810 = vmatmul.mubr.msk.f32.gmra.mxu1 %vm475_vm0, %v888_v7 }
  0xf9   : > { %v889_v13 = vmax.f32 %v857_v9, 0.0  ;;  %v820_v14 = vmul.f32 %v2197_v8, %v718_v12  ;;  %v860_v16 = vadd.f32 %v2203_v11, %v821_v10 }
  0xfa   : > { %v1768_v17 = vpop.f32.mrf.mxu0 }
  0xfb   : > { %v859_v18 = vadd.f32 %v2203_v11, %v820_v14  ;;  %v823_v19 = vmul.f32 %v1768_v17, %v2197_v8  ;;  %1812 = vmatprep.mubr.msk.f32.mxu1 %vm475_vm0, %v889_v13  ;;  %v892_v23 = vmax.f32 %v860_v16, 0.0 }
  0xfc   : > { %v728_v20 = vpop.f32.mrf.mxu0  ;;  %1813 = vmatmul.mubr.msk.f32.gmra.mxu1 %vm475_vm0, %v890_v15 }
  0xfd   : > { %v891_v21 = vmax.f32 %v859_v18, 0.0  ;;  %v822_v22 = vmul.f32 %v2197_v8, %v728_v20  ;;  %v862_v24 = vadd.f32 %v2203_v11, %v823_v19 }
  0xfe   : > { %v1771_v25 = vpop.f32.mrf.mxu0 }
  0xff   : > { %v861_v26 = vadd.f32 %v2203_v11, %v822_v22  ;;  %v825_v27 = vmul.f32 %v1771_v25, %v2197_v8  ;;  %1815 = vmatprep.mubr.msk.f32.mxu1 %vm475_vm0, %v891_v21  ;;  %v894_v31 = vmax.f32 %v862_v24, 0.0 }
 0x100   : > { %v738_v28 = vpop.f32.mrf.mxu0  ;;  %1816 = vmatmul.mubr.msk.f32.gmra.mxu1 %vm475_vm0, %v892_v23 }
 0x101   : > { %v893_v29 = vmax.f32 %v861_v26, 0.0  ;;  %v824_v30 = vmul.f32 %v2197_v8, %v738_v28  ;;  %v864_v32 = vadd.f32 %v2203_v11, %v825_v27 }
 0x102   : > { %v1774_v33 = vpop.f32.mrf.mxu0 }
 0x103   : > { %v863_v34 = vadd.f32 %v2203_v11, %v824_v30  ;;  %v827_v35 = vmul.f32 %v1774_v33, %v2197_v8  ;;  %1818 = vmatprep.mubr.msk.f32.mxu1 %vm475_vm0, %v893_v29  ;;  %v896_v39 = vmax.f32 %v864_v32, 0.0 }
 0x104   : > { %v748_v36 = vpop.f32.mrf.mxu0  ;;  %1819 = vmatmul.mubr.msk.f32.gmra.mxu1 %vm475_vm0, %v894_v31 }
 0x105   : > { %v895_v37 = vmax.f32 %v863_v34, 0.0  ;;  %v826_v38 = vmul.f32 %v2197_v8, %v748_v36  ;;  %v866_v40 = vadd.f32 %v2203_v11, %v827_v35 }
 0x106   : > { %v1777_v41 = vpop.f32.mrf.mxu0 }
 0x107   : > { %v865_v42 = vadd.f32 %v2203_v11, %v826_v38  ;;  %v829_v43 = vmul.f32 %v1777_v41, %v2197_v8  ;;  %1821 = vmatprep.mubr.msk.f32.mxu1 %vm475_vm0, %v895_v37  ;;  %v898_v47 = vmax.f32 %v866_v40, 0.0 }
 0x108   : > { %v758_v44 = vpop.f32.mrf.mxu0  ;;  %1822 = vmatmul.mubr.msk.f32.gmra.mxu1 %vm475_vm0, %v896_v39 }
 0x109   : > { %v897_v45 = vmax.f32 %v865_v42, 0.0  ;;  %v828_v46 = vmul.f32 %v2197_v8, %v758_v44  ;;  %v868_v48 = vadd.f32 %v2203_v11, %v829_v43 }
 0x10a   : > { %v1780_v49 = vpop.f32.mrf.mxu0 }
 0x10b   : > { %v867_v50 = vadd.f32 %v2203_v11, %v828_v46  ;;  %v831_v51 = vmul.f32 %v1780_v49, %v2197_v8  ;;  %1824 = vmatprep.mubr.msk.f32.mxu1 %vm475_vm0, %v897_v45  ;;  %v900_v55 = vmax.f32 %v868_v48, 0.0 }
 0x10c   : > { %v768_v52 = vpop.f32.mrf.mxu0  ;;  %1825 = vmatmul.mubr.msk.f32.gmra.mxu1 %vm475_vm0, %v898_v47 }
 0x10d   : > { %v899_v53 = vmax.f32 %v867_v50, 0.0  ;;  %v830_v54 = vmul.f32 %v2197_v8, %v768_v52  ;;  %v870_v56 = vadd.f32 %v2203_v11, %v831_v51 }
 0x10e   : > { %v1783_v57 = vpop.f32.mrf.mxu0 }
 0x10f   : > { %v869_v58 = vadd.f32 %v2203_v11, %v830_v54  ;;  %v833_v59 = vmul.f32 %v1783_v57, %v2197_v8  ;;  %1827 = vmatprep.mubr.msk.f32.mxu1 %vm475_vm0, %v899_v53  ;;  %v902_v63 = vmax.f32 %v870_v56, 0.0 }
 0x110   : > { %v778_v60 = vpop.f32.mrf.mxu0  ;;  %1828 = vmatmul.mubr.msk.f32.gmra.mxu1 %vm475_vm0, %v900_v55 }
 0x111   : > { %v901_v61 = vmax.f32 %v869_v58, 0.0  ;;  %v832_v62 = vmul.f32 %v2197_v8, %v778_v60  ;;  %v872_v0 = vadd.f32 %v2203_v11, %v833_v59 }
 0x112   : > { %v1786_v1 = vpop.f32.mrf.mxu0 }
 0x113   : > { %v871_v4 = vadd.f32 %v2203_v11, %v832_v62  ;;  %v835_v5 = vmul.f32 %v1786_v1, %v2197_v8  ;;  %1830 = vmatprep.mubr.msk.f32.mxu1 %vm475_vm0, %v901_v61  ;;  %v904_v3 = vmax.f32 %v872_v0, 0.0 }
 0x114   : > { %v788_v6 = vpop.f32.mrf.mxu0  ;;  %1831 = vmatmul.mubr.msk.f32.gmra.mxu1 %vm475_vm0, %v902_v63 }
 0x115   : > { %v903_v7 = vmax.f32 %v871_v4, 0.0  ;;  %v834_v2 = vmul.f32 %v2197_v8, %v788_v6  ;;  %v874_v9 = vadd.f32 %v2203_v11, %v835_v5 }
 0x117   : > { %v873_v10 = vadd.f32 %v2203_v11, %v834_v2  ;;  %1833 = vmatprep.mubr.msk.f32.mxu1 %vm475_vm0, %v903_v7  ;;  %v906_v13 = vmax.f32 %v874_v9, 0.0 }
 0x118   : > { %1834 = vmatmul.mubr.msk.f32.gmra.mxu1 %vm475_vm0, %v904_v3 }
 0x119   : > { %v905_v12 = vmax.f32 %v873_v10, 0.0 }
 0x11b   : > { %1836 = vmatprep.mubr.msk.f32.mxu1 %vm475_vm0, %v905_v12 }
 0x11c   : > { %1837 = vmatmul.mubr.msk.f32.gmra.mxu1 %vm475_vm0, %v906_v13 }
 0x1a0   : > { %v1793_v14 = vpop.f32.mrf.mxu1 }
 0x1a1   : > { %v1231_v15 = vsub.f32 0.0, %v1793_v14 }
 0x1a2   : > { %v1071_v16 = vpop.f32.mrf.mxu1 }
 0x1a3   : > { %v1264_v17 = vmul.f32 1.442695, %v1231_v15  ;;  %v1230_v8 = vsub.f32 0.0, %v1071_v16 }
 0x1a4   : > { %v1796_v18 = vpop.f32.mrf.mxu1 }
 0x1a5   : > { %1847 = vpow2.f32 %v1264_v17  ;;  %v1262_v19 = vmul.f32 1.442695, %v1230_v8  ;;  %v1233_v20 = vsub.f32 0.0, %v1796_v18  ;;  %v1423_v17 = vld [vmem:[%s2304_s9 + $0x8] sm:$0xff] }
 0x1a6   : > { %v1081_v11 = vpop.f32.mrf.mxu1 }
 0x1a7   : > { %1849 = vpow2.f32 %v1262_v19  ;;  %v1268_v21 = vmul.f32 1.442695, %v1233_v20  ;;  %v1232_v22 = vsub.f32 0.0, %v1081_v11 }
 0x1a8   : > { %v1799_v23 = vpop.f32.mrf.mxu1 }
 0x1a9   : > { %1851 = vpow2.f32 %v1268_v21  ;;  %v1266_v24 = vmul.f32 1.442695, %v1232_v22  ;;  %v1235_v25 = vsub.f32 0.0, %v1799_v23  ;;  %v1422_v22 = vld [vmem:[%s2304_s9] sm:$0xff] }
 0x1aa   : > { %v1091_v26 = vpop.f32.mrf.mxu1 }
 0x1ab   : > { %1853 = vpow2.f32 %v1266_v24  ;;  %v1272_v27 = vmul.f32 1.442695, %v1235_v25  ;;  %v1234_v28 = vsub.f32 0.0, %v1091_v26 }
 0x1ac   : > { %v1802_v29 = vpop.f32.mrf.mxu1 }
 0x1ad   : > { %1855 = vpow2.f32 %v1272_v27  ;;  %v1270_v30 = vmul.f32 1.442695, %v1234_v28  ;;  %v1237_v31 = vsub.f32 0.0, %v1802_v29 }
 0x1ae   : > { %v1101_v32 = vpop.f32.mrf.mxu1 }
 0x1af   : > { %1857 = vpow2.f32 %v1270_v30  ;;  %v1276_v33 = vmul.f32 1.442695, %v1237_v31  ;;  %v1236_v34 = vsub.f32 0.0, %v1101_v32  ;;  %v1425_v30 = vld [vmem:[%s2304_s9 + $0x18] sm:$0xff] }
 0x1b0   : > { %v1805_v35 = vpop.f32.mrf.mxu1 }
 0x1b1   : > { %1859 = vpow2.f32 %v1276_v33  ;;  %v1274_v36 = vmul.f32 1.442695, %v1236_v34  ;;  %v1239_v37 = vsub.f32 0.0, %v1805_v35 }
 0x1b2   : > { %v1848_v38 = vpop.eup %1847  ;;  %v1111_v39 = vpop.f32.mrf.mxu1 }
 0x1b3   : > { %v1327_v40 = vadd.f32 1.0, %v1848_v38  ;;  %1861 = vpow2.f32 %v1274_v36  ;;  %v1280_v41 = vmul.f32 1.442695, %v1239_v37  ;;  %v1238_v42 = vsub.f32 0.0, %v1111_v39  ;;  %v1424_v39 = vld [vmem:[%s2304_s9 + $0x10] sm:$0xff] }
 0x1b4   : > { %v1850_v43 = vpop.eup %1849  ;;  %v1808_v44 = vpop.f32.mrf.mxu1 }
 0x1b5   : > { %1863 = vrcp.f32 %v1327_v40  ;;  %v1326_v45 = vadd.f32 1.0, %v1850_v43  ;;  %v1278_v46 = vmul.f32 1.442695, %v1238_v42  ;;  %v1241_v47 = vsub.f32 0.0, %v1808_v44 }
 0x1b6   : > { %v1852_v48 = vpop.eup %1851  ;;  %1865 = vpow2.f32 %v1280_v41  ;;  %v1121_v49 = vpop.f32.mrf.mxu1 }
 0x1b7   : > { %1867 = vrcp.f32 %v1326_v45  ;;  %v1329_v50 = vadd.f32 1.0, %v1852_v48  ;;  %v1284_v51 = vmul.f32 1.442695, %v1241_v47  ;;  %v1240_v52 = vsub.f32 0.0, %v1121_v49  ;;  %v1427_v49 = vld [vmem:[%s2304_s9 + $0x28] sm:$0xff] }
 0x1b8   : > { %v1854_v53 = vpop.eup %1853  ;;  %1869 = vpow2.f32 %v1278_v46  ;;  %v1811_v54 = vpop.f32.mrf.mxu1 }
 0x1b9   : > { %1871 = vrcp.f32 %v1329_v50  ;;  %v1328_v55 = vadd.f32 1.0, %v1854_v53  ;;  %v1282_v56 = vmul.f32 1.442695, %v1240_v52  ;;  %v1243_v57 = vsub.f32 0.0, %v1811_v54 }
 0x1ba   : > { %v1856_v58 = vpop.eup %1855  ;;  %1873 = vpow2.f32 %v1284_v51  ;;  %v1131_v59 = vpop.f32.mrf.mxu1 }
 0x1bb   : > { %1875 = vrcp.f32 %v1328_v55  ;;  %v1331_v60 = vadd.f32 1.0, %v1856_v58  ;;  %v1288_v61 = vmul.f32 1.442695, %v1243_v57  ;;  %v1242_v62 = vsub.f32 0.0, %v1131_v59  ;;  %v1426_v57 = vld [vmem:[%s2304_s9 + $0x20] sm:$0xff] }
 0x1bc   : > { %v1858_v63 = vpop.eup %1857  ;;  %1877 = vpow2.f32 %v1282_v56  ;;  %v1814_v0 = vpop.f32.mrf.mxu1 }
 0x1bd   : > { %1879 = vrcp.f32 %v1331_v60  ;;  %v1330_v1 = vadd.f32 1.0, %v1858_v63  ;;  %v1286_v4 = vmul.f32 1.442695, %v1242_v62  ;;  %v1245_v5 = vsub.f32 0.0, %v1814_v0 }
 0x1be   : > { %v1860_v6 = vpop.eup %1859  ;;  %1881 = vpow2.f32 %v1288_v61  ;;  %v1141_v7 = vpop.f32.mrf.mxu1 }
 0x1bf   : > { %1883 = vrcp.f32 %v1330_v1  ;;  %v1333_v2 = vadd.f32 1.0, %v1860_v6  ;;  %v1292_v3 = vmul.f32 1.442695, %v1245_v5  ;;  %v1244_v9 = vsub.f32 0.0, %v1141_v7 }
 0x1c0   : > { %v1862_v10 = vpop.eup %1861  ;;  %1885 = vpow2.f32 %v1286_v4  ;;  %v1817_v12 = vpop.f32.mrf.mxu1  ;;  %v1429_v4 = vld [vmem:[%s2304_s9 + $0x38] sm:$0xff] }
 0x1c1   : > { %1887 = vrcp.f32 %v1333_v2  ;;  %v1332_v13 = vadd.f32 1.0, %v1862_v10  ;;  %v1290_v14 = vmul.f32 1.442695, %v1244_v9  ;;  %v1247_v15 = vsub.f32 0.0, %v1817_v12 }
 0x1c2   : > { %v1864_v16 = vpop.eup %1863  ;;  %1889 = vpow2.f32 %v1292_v3  ;;  %v1151_v8 = vpop.f32.mrf.mxu1 }
 0x1c3   : > { %v1866_v18 = vpop.eup %1865  ;;  %v1391_v19 = vadd.f32 1.0, %v1864_v16  ;;  %1891 = vrcp.f32 %v1332_v13  ;;  %v1296_v20 = vmul.f32 1.442695, %v1247_v15  ;;  %v1246_v11 = vsub.f32 0.0, %v1151_v8  ;;  %v1428_v13 = vld [vmem:[%s2304_s9 + $0x30] sm:$0xff] }
 0x1c4   : > { %v1868_v21 = vpop.eup %1867  ;;  %v1335_v23 = vadd.f32 1.0, %v1866_v18  ;;  %1893 = vpow2.f32 %v1290_v14  ;;  %v1820_v24 = vpop.f32.mrf.mxu1 }
 0x1c5   : > { %v1870_v25 = vpop.eup %1869  ;;  %v1455_v26 = vmul.f32 %v1423_v17, %v1391_v19  ;;  %v1390_v27 = vadd.f32 1.0, %v1868_v21  ;;  %1895 = vpow2.f32 %v1296_v20  ;;  %v1294_v28 = vmul.f32 1.442695, %v1246_v11 }
 0x1c6   : > { %v1872_v29 = vpop.eup %1871  ;;  %1897 = vrcp.f32 %v1335_v23  ;;  %v1334_v31 = vadd.f32 1.0, %v1870_v25  ;;  %v1249_v32 = vsub.f32 0.0, %v1820_v24  ;;  %v1161_v33 = vpop.f32.mrf.mxu1  ;;  %v1431_v25 = vld [vmem:[%s2304_s9 + $0x48] sm:$0xff] }
 0x1c7   : > { %v1874_v34 = vpop.eup %1873  ;;  %1487 = vst.msk [vmem:[%s2311_s13 + $0x8] sm:$0xff] %vm475_vm0, %v1455_v26  ;;  %v1454_v35 = vmul.f32 %v1422_v22, %v1390_v27  ;;  %v1393_v36 = vadd.f32 1.0, %v1872_v29  ;;  %1899 = vpow2.f32 %v1294_v28  ;;  %v1248_v37 = vsub.f32 0.0, %v1161_v33  ;;  %v1430_v33 = vld [vmem:[%s2304_s9 + $0x40] sm:$0xff] }
 0x1c8   : > { %v1876_v38 = vpop.eup %1875  ;;  %1901 = vrcp.f32 %v1334_v31  ;;  %v1337_v40 = vadd.f32 1.0, %v1874_v34  ;;  %v1300_v41 = vmul.f32 1.442695, %v1249_v32  ;;  %v1823_v42 = vpop.f32.mrf.mxu1 }
 0x1c9   : > { %v1878_v43 = vpop.eup %1877  ;;  %1486 = vst.msk [vmem:[%s2311_s13] sm:$0xff] %vm475_vm0, %v1454_v35  ;;  %v1457_v44 = vmul.f32 %v1425_v30, %v1393_v36  ;;  %v1392_v45 = vadd.f32 1.0, %v1876_v38  ;;  %v1298_v46 = vmul.f32 1.442695, %v1248_v37  ;;  %v1251_v47 = vsub.f32 0.0, %v1823_v42 }
 0x1ca   : > { %v1880_v48 = vpop.eup %1879  ;;  %1903 = vrcp.f32 %v1337_v40  ;;  %v1336_v50 = vadd.f32 1.0, %v1878_v43  ;;  %v1171_v51 = vpop.f32.mrf.mxu1 }
 0x1cb   : > { %v1882_v52 = vpop.eup %1881  ;;  %1489 = vst.msk [vmem:[%s2311_s13 + $0x18] sm:$0xff] %vm475_vm0, %v1457_v44  ;;  %v1456_v53 = vmul.f32 %v1424_v39, %v1392_v45  ;;  %v1395_v54 = vadd.f32 1.0, %v1880_v48  ;;  %1905 = vpow2.f32 %v1300_v41  ;;  %v1304_v55 = vmul.f32 1.442695, %v1251_v47  ;;  %v1433_v41 = vld [vmem:[%s2304_s9 + $0x58] sm:$0xff] }
 0x1cc   : > { %v1884_v56 = vpop.eup %1883  ;;  %1907 = vrcp.f32 %v1336_v50  ;;  %v1339_v58 = vadd.f32 1.0, %v1882_v52  ;;  %v1250_v59 = vsub.f32 0.0, %v1171_v51  ;;  %v1826_v60 = vpop.f32.mrf.mxu1 }
 0x1cd   : > { %v1886_v61 = vpop.eup %1885  ;;  %1488 = vst.msk [vmem:[%s2311_s13 + $0x10] sm:$0xff] %vm475_vm0, %v1456_v53  ;;  %v1459_v62 = vmul.f32 %v1427_v49, %v1395_v54  ;;  %v1394_v63 = vadd.f32 1.0, %v1884_v56  ;;  %1909 = vpow2.f32 %v1298_v46  ;;  %v1253_v0 = vsub.f32 0.0, %v1826_v60  ;;  %v1432_v49 = vld [vmem:[%s2304_s9 + $0x50] sm:$0xff] }
 0x1ce   : > { %v1888_v1 = vpop.eup %1887  ;;  %1911 = vrcp.f32 %v1339_v58  ;;  %v1338_v5 = vadd.f32 1.0, %v1886_v61  ;;  %v1302_v6 = vmul.f32 1.442695, %v1250_v59  ;;  %v1181_v7 = vpop.f32.mrf.mxu1  ;;  %v1435_v58 = vld [vmem:[%s2304_s9 + $0x68] sm:$0xff] }
 0x1cf   : > { %v1890_v2 = vpop.eup %1889  ;;  %1491 = vst.msk [vmem:[%s2311_s13 + $0x28] sm:$0xff] %vm475_vm0, %v1459_v62  ;;  %v1458_v3 = vmul.f32 %v1426_v57, %v1394_v63  ;;  %v1397_v9 = vadd.f32 1.0, %v1888_v1  ;;  %1913 = vpow2.f32 %v1304_v55  ;;  %v1308_v10 = vmul.f32 1.442695, %v1253_v0 }
 0x1d0   : > { %v1892_v12 = vpop.eup %1891  ;;  %1915 = vrcp.f32 %v1338_v5  ;;  %v1341_v14 = vadd.f32 1.0, %v1890_v2  ;;  %v1252_v15 = vsub.f32 0.0, %v1181_v7  ;;  %v1829_v16 = vpop.f32.mrf.mxu1  ;;  %v1434_v5 = vld [vmem:[%s2304_s9 + $0x60] sm:$0xff] }
 0x1d1   : > { %v1894_v17 = vpop.eup %1893  ;;  %1490 = vst.msk [vmem:[%s2311_s13 + $0x20] sm:$0xff] %vm475_vm0, %v1458_v3  ;;  %v1461_v8 = vmul.f32 %v1429_v4, %v1397_v9  ;;  %v1396_v18 = vadd.f32 1.0, %v1892_v12  ;;  %1917 = vpow2.f32 %v1302_v6  ;;  %v1255_v19 = vsub.f32 0.0, %v1829_v16 }
 0x1d2   : > { %v1896_v20 = vpop.eup %1895  ;;  %1919 = vrcp.f32 %v1341_v14  ;;  %v1340_v11 = vadd.f32 1.0, %v1894_v17  ;;  %v1306_v21 = vmul.f32 1.442695, %v1252_v15  ;;  %v1191_v22 = vpop.f32.mrf.mxu1  ;;  %v1437_v14 = vld [vmem:[%s2304_s9 + $0x78] sm:$0xff] }
 0x1d3   : > { %v1898_v23 = vpop.eup %1897  ;;  %1493 = vst.msk [vmem:[%s2311_s13 + $0x38] sm:$0xff] %vm475_vm0, %v1461_v8  ;;  %v1460_v24 = vmul.f32 %v1428_v13, %v1396_v18  ;;  %v1343_v26 = vadd.f32 1.0, %v1896_v20  ;;  %1921 = vpow2.f32 %v1308_v10  ;;  %v1312_v29 = vmul.f32 1.442695, %v1255_v19 }
 0x1d4   : > { %v1900_v27 = vpop.eup %1899  ;;  %v1399_v28 = vadd.f32 1.0, %v1898_v23  ;;  %1923 = vrcp.f32 %v1340_v11  ;;  %v1254_v30 = vsub.f32 0.0, %v1191_v22  ;;  %v1832_v31 = vpop.f32.mrf.mxu1  ;;  %v1436_v11 = vld [vmem:[%s2304_s9 + $0x70] sm:$0xff] }
 0x1d5   : > { %v1902_v32 = vpop.eup %1901  ;;  %1492 = vst.msk [vmem:[%s2311_s13 + $0x30] sm:$0xff] %vm475_vm0, %v1460_v24  ;;  %1925 = vrcp.f32 %v1343_v26  ;;  %v1342_v34 = vadd.f32 1.0, %v1900_v27  ;;  %v1257_v35 = vsub.f32 0.0, %v1832_v31  ;;  %v1439_v26 = vld [vmem:[%s2304_s9 + $0x88] sm:$0xff]  ;;  %v1438_v31 = vld [vmem:[%s2304_s9 + $0x80] sm:$0xff] }
 0x1d6   : > { %v1463_v36 = vmul.f32 %v1431_v25, %v1399_v28  ;;  %v1398_v37 = vadd.f32 1.0, %v1902_v32  ;;  %1927 = vpow2.f32 %v1306_v21  ;;  %v1310_v38 = vmul.f32 1.442695, %v1254_v30  ;;  %v1201_v39 = vpop.f32.mrf.mxu1 }
 0x1d7   : > { %v1904_v40 = vpop.eup %1903  ;;  %1929 = vrcp.f32 %v1342_v34  ;;  %v1316_v42 = vmul.f32 1.442695, %v1257_v35  ;;  %v1256_v43 = vsub.f32 0.0, %v1201_v39 }
 0x1d8   : > { %v1906_v44 = vpop.eup %1905  ;;  %1495 = vst.msk [vmem:[%s2311_s13 + $0x48] sm:$0xff] %vm475_vm0, %v1463_v36  ;;  %v1462_v45 = vmul.f32 %v1430_v33, %v1398_v37  ;;  %v1401_v46 = vadd.f32 1.0, %v1904_v40  ;;  %1931 = vpow2.f32 %v1312_v29  ;;  %v1835_v47 = vpop.f32.mrf.mxu1 }
 0x1d9   : > { %v1908_v48 = vpop.eup %1907  ;;  %v1345_v50 = vadd.f32 1.0, %v1906_v44  ;;  %1933 = vpow2.f32 %v1310_v38  ;;  %v1314_v51 = vmul.f32 1.442695, %v1256_v43  ;;  %v1259_v52 = vsub.f32 0.0, %v1835_v47  ;;  %v1440_v47 = vld [vmem:[%s2304_s9 + $0x90] sm:$0xff] }
 0x1da   : > { %v1910_v53 = vpop.eup %1909  ;;  %1494 = vst.msk [vmem:[%s2311_s13 + $0x40] sm:$0xff] %vm475_vm0, %v1462_v45  ;;  %v1465_v54 = vmul.f32 %v1433_v41, %v1401_v46  ;;  %v1400_v55 = vadd.f32 1.0, %v1908_v48  ;;  %1935 = vpow2.f32 %v1316_v42  ;;  %v1211_v56 = vpop.f32.mrf.mxu1  ;;  %v1441_v42 = vld [vmem:[%s2304_s9 + $0x98] sm:$0xff] }
 0x1db   : > { %v1912_v57 = vpop.eup %1911  ;;  %1937 = vrcp.f32 %v1345_v50  ;;  %v1344_v59 = vadd.f32 1.0, %v1910_v53  ;;  %v1320_v60 = vmul.f32 1.442695, %v1259_v52  ;;  %v1258_v61 = vsub.f32 0.0, %v1211_v56  ;;  %v1443_v53 = vld [vmem:[%s2304_s9 + $0xa8] sm:$0xff] }
 0x1dc   : > { %v1914_v62 = vpop.eup %1913  ;;  %1497 = vst.msk [vmem:[%s2311_s13 + $0x58] sm:$0xff] %vm475_vm0, %v1465_v54  ;;  %v1464_v63 = vmul.f32 %v1432_v49, %v1400_v55  ;;  %v1403_v0 = vadd.f32 1.0, %v1912_v57  ;;  %1939 = vpow2.f32 %v1314_v51  ;;  %v1838_v1 = vpop.f32.mrf.mxu1 }
 0x1dd   : > { %v1916_v4 = vpop.eup %1915  ;;  %1941 = vrcp.f32 %v1344_v59  ;;  %v1347_v6 = vadd.f32 1.0, %v1914_v62  ;;  %v1318_v7 = vmul.f32 1.442695, %v1258_v61  ;;  %v1261_v2 = vsub.f32 0.0, %v1838_v1  ;;  %v1442_v59 = vld [vmem:[%s2304_s9 + $0xa0] sm:$0xff]  ;;  %v1445_v1 = vld [vmem:[%s2304_s9 + $0xb8] sm:$0xff] }
 0x1de   : > { %v1918_v3 = vpop.eup %1917  ;;  %1496 = vst.msk [vmem:[%s2311_s13 + $0x50] sm:$0xff] %vm475_vm0, %v1464_v63  ;;  %v1467_v9 = vmul.f32 %v1435_v58, %v1403_v0  ;;  %v1402_v10 = vadd.f32 1.0, %v1916_v4  ;;  %1943 = vpow2.f32 %v1320_v60  ;;  %v1221_v12 = vpop.f32.mrf.mxu1 }
 0x1df   : > { %v1920_v13 = vpop.eup %1919  ;;  %1945 = vrcp.f32 %v1347_v6  ;;  %v1346_v15 = vadd.f32 1.0, %v1918_v3  ;;  %v1324_v16 = vmul.f32 1.442695, %v1261_v2  ;;  %v1260_v17 = vsub.f32 0.0, %v1221_v12 }
 0x1e0   : > { %v1922_v8 = vpop.eup %1921  ;;  %1499 = vst.msk [vmem:[%s2311_s13 + $0x68] sm:$0xff] %vm475_vm0, %v1467_v9  ;;  %v1466_v18 = vmul.f32 %v1434_v5, %v1402_v10  ;;  %v1405_v19 = vadd.f32 1.0, %v1920_v13  ;;  %1947 = vpow2.f32 %v1318_v7  ;;  %v1444_v10 = vld [vmem:[%s2304_s9 + $0xb0] sm:$0xff] }
 0x1e1   : > { %v1924_v20 = vpop.eup %1923  ;;  %1949 = vrcp.f32 %v1346_v15  ;;  %v1349_v21 = vadd.f32 1.0, %v1922_v8  ;;  %v1322_v22 = vmul.f32 1.442695, %v1260_v17  ;;  %v1446_v8 = vld [vmem:[%s2304_s9 + $0xc0] sm:$0xff] }
 0x1e2   : > { %v1926_v23 = vpop.eup %1925  ;;  %1498 = vst.msk [vmem:[%s2311_s13 + $0x60] sm:$0xff] %vm475_vm0, %v1466_v18  ;;  %v1469_v24 = vmul.f32 %v1437_v14, %v1405_v19  ;;  %v1404_v25 = vadd.f32 1.0, %v1924_v20  ;;  %1951 = vpow2.f32 %v1324_v16  ;;  %v1447_v14 = vld [vmem:[%s2304_s9 + $0xc8] sm:$0xff]  ;;  %v1449_v20 = vld [vmem:[%s2304_s9 + $0xd8] sm:$0xff] }
 0x1e3   : > { %v1928_v27 = vpop.eup %1927  ;;  %v1407_v28 = vadd.f32 1.0, %v1926_v23  ;;  %1953 = vrcp.f32 %v1349_v21 }
 0x1e4   : > { %v1930_v29 = vpop.eup %1929  ;;  %1501 = vst.msk [vmem:[%s2311_s13 + $0x78] sm:$0xff] %vm475_vm0, %v1469_v24  ;;  %v1468_v30 = vmul.f32 %v1436_v11, %v1404_v25  ;;  %v1348_v32 = vadd.f32 1.0, %v1928_v27  ;;  %1955 = vpow2.f32 %v1322_v22  ;;  %v1448_v24 = vld [vmem:[%s2304_s9 + $0xd0] sm:$0xff] }
 0x1e5   : > { %v1932_v33 = vpop.eup %1931  ;;  %v1471_v34 = vmul.f32 %v1439_v26, %v1407_v28  ;;  %v1406_v35 = vadd.f32 1.0, %v1930_v29  ;;  %v1451_v28 = vld [vmem:[%s2304_s9 + $0xe8] sm:$0xff] }
 0x1e6   : > { %v1934_v36 = vpop.eup %1933  ;;  %1500 = vst.msk [vmem:[%s2311_s13 + $0x70] sm:$0xff] %vm475_vm0, %v1468_v30  ;;  %1957 = vrcp.f32 %v1348_v32  ;;  %v1351_v37 = vadd.f32 1.0, %v1932_v33  ;;  %v1450_v32 = vld [vmem:[%s2304_s9 + $0xe0] sm:$0xff] }
 0x1e7   : > { %v1936_v38 = vpop.eup %1935  ;;  %1503 = vst.msk [vmem:[%s2311_s13 + $0x88] sm:$0xff] %vm475_vm0, %v1471_v34  ;;  %v1470_v39 = vmul.f32 %v1438_v31, %v1406_v35  ;;  %v1350_v40 = vadd.f32 1.0, %v1934_v36  ;;  %v1453_v36 = vld [vmem:[%s2304_s9 + $0xf8] sm:$0xff] }
 0x1e8   : > { %v1938_v41 = vpop.eup %1937  ;;  %1959 = vrcp.f32 %v1351_v37  ;;  %v1353_v43 = vadd.f32 1.0, %v1936_v38 }
 0x1e9   : > { %v1940_v44 = vpop.eup %1939  ;;  %1502 = vst.msk [vmem:[%s2311_s13 + $0x80] sm:$0xff] %vm475_vm0, %v1470_v39  ;;  %v1409_v45 = vadd.f32 1.0, %v1938_v41  ;;  %1961 = vrcp.f32 %v1350_v40  ;;  %v1452_v40 = vld [vmem:[%s2304_s9 + $0xf0] sm:$0xff] }
 0x1ea   : > { %v1942_v46 = vpop.eup %1941  ;;  %1963 = vrcp.f32 %v1353_v43  ;;  %v1352_v48 = vadd.f32 1.0, %v1940_v44 }
 0x1eb   : > { %v1944_v49 = vpop.eup %1943  ;;  %v1473_v50 = vmul.f32 %v1441_v42, %v1409_v45  ;;  %v1408_v51 = vadd.f32 1.0, %v1942_v46 }
 0x1ec   : > { %v1946_v52 = vpop.eup %1945  ;;  %1965 = vrcp.f32 %v1352_v48  ;;  %v1355_v54 = vadd.f32 1.0, %v1944_v49 }
 0x1ed   : > { %v1948_v55 = vpop.eup %1947  ;;  %1505 = vst.msk [vmem:[%s2311_s13 + $0x98] sm:$0xff] %vm475_vm0, %v1473_v50  ;;  %v1472_v56 = vmul.f32 %v1440_v47, %v1408_v51  ;;  %v1411_v57 = vadd.f32 1.0, %v1946_v52 }
 0x1ee   : > { %v1950_v58 = vpop.eup %1949  ;;  %1967 = vrcp.f32 %v1355_v54  ;;  %v1354_v60 = vadd.f32 1.0, %v1948_v55 }
 0x1ef   : > { %v1952_v61 = vpop.eup %1951  ;;  %1504 = vst.msk [vmem:[%s2311_s13 + $0x90] sm:$0xff] %vm475_vm0, %v1472_v56  ;;  %v1475_v62 = vmul.f32 %v1443_v53, %v1411_v57  ;;  %v1410_v63 = vadd.f32 1.0, %v1950_v58 }
 0x1f0   : > { %v1954_v0 = vpop.eup %1953  ;;  %1969 = vrcp.f32 %v1354_v60  ;;  %v1357_v4 = vadd.f32 1.0, %v1952_v61 }
 0x1f1   : > { %v1956_v5 = vpop.eup %1955  ;;  %1507 = vst.msk [vmem:[%s2311_s13 + $0xa8] sm:$0xff] %vm475_vm0, %v1475_v62  ;;  %v1474_v6 = vmul.f32 %v1442_v59, %v1410_v63  ;;  %v1413_v7 = vadd.f32 1.0, %v1954_v0 }
 0x1f2   : > { %1971 = vrcp.f32 %v1357_v4  ;;  %v1356_v2 = vadd.f32 1.0, %v1956_v5 }
 0x1f3   : > { %v1958_v3 = vpop.eup %1957  ;;  %1506 = vst.msk [vmem:[%s2311_s13 + $0xa0] sm:$0xff] %vm475_vm0, %v1474_v6  ;;  %v1477_v9 = vmul.f32 %v1445_v1, %v1413_v7 }
 0x1f4   : > { %v1412_v12 = vadd.f32 1.0, %v1958_v3  ;;  %1973 = vrcp.f32 %v1356_v2 }
 0x1f5   : > { %v1960_v13 = vpop.eup %1959  ;;  %1509 = vst.msk [vmem:[%s2311_s13 + $0xb8] sm:$0xff] %vm475_vm0, %v1477_v9 }
 0x1f6   : > { %v1962_v15 = vpop.eup %1961  ;;  %v1476_v16 = vmul.f32 %v1444_v10, %v1412_v12  ;;  %v1415_v17 = vadd.f32 1.0, %v1960_v13 }
 0x1f7   : > { %v1964_v18 = vpop.eup %1963  ;;  %v1414_v19 = vadd.f32 1.0, %v1962_v15 }
 0x1f8   : > { %1508 = vst.msk [vmem:[%s2311_s13 + $0xb0] sm:$0xff] %vm475_vm0, %v1476_v16  ;;  %v1479_v11 = vmul.f32 %v1447_v14, %v1415_v17  ;;  %v1417_v21 = vadd.f32 1.0, %v1964_v18 }
 0x1f9   : > { %v1966_v22 = vpop.eup %1965  ;;  %v1478_v23 = vmul.f32 %v1446_v8, %v1414_v19 }
 0x1fa   : > { %1511 = vst.msk [vmem:[%s2311_s13 + $0xc8] sm:$0xff] %vm475_vm0, %v1479_v11  ;;  %v1481_v25 = vmul.f32 %v1449_v20, %v1417_v21  ;;  %v1416_v26 = vadd.f32 1.0, %v1966_v22 }
 0x1fb   : > { %v1968_v27 = vpop.eup %1967  ;;  %1510 = vst.msk [vmem:[%s2311_s13 + $0xc0] sm:$0xff] %vm475_vm0, %v1478_v23 }
 0x1fc   : > { %1513 = vst.msk [vmem:[%s2311_s13 + $0xd8] sm:$0xff] %vm475_vm0, %v1481_v25  ;;  %v1480_v29 = vmul.f32 %v1448_v24, %v1416_v26  ;;  %v1419_v30 = vadd.f32 1.0, %v1968_v27 }
 0x1fd   : > { %v1970_v31 = vpop.eup %1969 }
 0x1fe   : > { %1512 = vst.msk [vmem:[%s2311_s13 + $0xd0] sm:$0xff] %vm475_vm0, %v1480_v29  ;;  %v1483_v33 = vmul.f32 %v1451_v28, %v1419_v30  ;;  %v1418_v34 = vadd.f32 1.0, %v1970_v31 }
 0x1ff   : > { %v1972_v35 = vpop.eup %1971 }
 0x200   : > { %1515 = vst.msk [vmem:[%s2311_s13 + $0xe8] sm:$0xff] %vm475_vm0, %v1483_v33  ;;  %v1482_v37 = vmul.f32 %v1450_v32, %v1418_v34  ;;  %v1421_v38 = vadd.f32 1.0, %v1972_v35 }
 0x201   : > { %v1974_v39 = vpop.eup %1973 }
 0x202   : > { %1514 = vst.msk [vmem:[%s2311_s13 + $0xe0] sm:$0xff] %vm475_vm0, %v1482_v37  ;;  %v1485_v41 = vmul.f32 %v1453_v36, %v1421_v38  ;;  %v1420_v42 = vadd.f32 1.0, %v1974_v39 }
 0x204   : > { %1517 = vst.msk [vmem:[%s2311_s13 + $0xf8] sm:$0xff] %vm475_vm0, %v1485_v41  ;;  %v1484_v43 = vmul.f32 %v1452_v40, %v1420_v42 }
 0x206   : > { %1516 = vst.msk [vmem:[%s2311_s13 + $0xf0] sm:$0xff] %vm475_vm0, %v1484_v43 }
 0x207 PF: > { %s18_s27 = sadd.s32 1, %s1981_s27  }
 0x208   : > { %p15_p4 = scmp.ge.s32.totalorder %s18_s27, 4  }
 0x20a   :  { %17 = sbr.rel (!%p15_p4) target bundleno = 1 (0x1), region = 85 }

</bundles_post_ra>
